<compile_context>
chip_gen: v7x
topology: tpu7x:2x2x1
jax: 0.10.0
libtpu: 0.0.40
codegen_flags: <defaults>
</compile_context>

<pallas_src>
import functools

import jax
import jax.numpy as jnp
from jax import lax
from jax.experimental import pallas as pl
from jax.experimental.pallas import tpu as pltpu


# ----------------------------------------------------------------------------
# Pallas kernel: one bidirectional LSTM layer, grid = (2,) over directions
# ----------------------------------------------------------------------------
def _bilstm_layer_kernel(len_ref, x_ref, w_ih_ref, w_hh_ref, b_ref, out_ref,
                         gates_sc):
    d = pl.program_id(0)                  # 0 = forward, 1 = backward
    T = out_ref.shape[1]
    B = out_ref.shape[2]                  # padded batch (multiple of 8)
    H = out_ref.shape[3]

    # Hoisted input projection: ONE (T*B, Din) @ (Din, 4H) MXU matmul
    # (bf16 operands, f32 accumulation), then distribute into (T, B, 4H).
    gates_x = (jnp.dot(x_ref[...], w_ih_ref[0],
                       preferred_element_type=jnp.float32) + b_ref[0])
    gates_sc[...] = gates_x.reshape(T, B, 4 * H)   # tile-aligned split (B % 8 == 0)

    w_hh = w_hh_ref[0]                    # (H, 4H) bf16
    lengths = len_ref[...]                # (B, 1) int32
    reverse = d == 1

    def step(s, carry):
        h_prev, c_prev = carry
        t = jnp.where(reverse, T - 1 - s, s)
        g = gates_sc[t] + jnp.dot(h_prev.astype(w_hh.dtype), w_hh,
                                  preferred_element_type=jnp.float32)  # (B, 4H)
        # PyTorch gate order: i, f, g, o  (elementwise kept in f32)
        i = jax.nn.sigmoid(g[:, 0 * H:1 * H])
        f = jax.nn.sigmoid(g[:, 1 * H:2 * H])
        gg = jnp.tanh(g[:, 2 * H:3 * H])
        o = jax.nn.sigmoid(g[:, 3 * H:4 * H])
        c_new = f * c_prev + i * gg
        h_new = o * jnp.tanh(c_new)
        mask = lengths > t                # packed-sequence gating, (B, 1)
        out_ref[0, t] = jnp.where(mask, h_new, 0.0)
        return (jnp.where(mask, h_new, h_prev), jnp.where(mask, c_new, c_prev))

    h0 = jnp.zeros((B, H), jnp.float32)
    c0 = jnp.zeros((B, H), jnp.float32)
    lax.fori_loop(0, T, step, (h0, c0), unroll=True)


def bidir_lstm_layer(x_flat, lengths, layer_p, T, B):
    """One bidirectional LSTM layer.

    x_flat: (T*B, Din) time-major-flattened (row t*B + b).
    Returns (T*B, 2H) time-major-flattened (fwd || bwd features).
    """
    Din = x_flat.shape[-1]
    H = layer_p["w_hh"].shape[1]
    len2d = lengths.reshape(B, 1).astype(jnp.int32)

    out = pl.pallas_call(
        _bilstm_layer_kernel,
        out_shape=jax.ShapeDtypeStruct((2, T, B, H), jnp.float32),
        grid_spec=pltpu.PrefetchScalarGridSpec(
            num_scalar_prefetch=0,
            grid=(2,),                                    # direction axis
            in_specs=[
                pl.BlockSpec((B, 1), lambda d: (0, 0)),
                pl.BlockSpec((T * B, Din), lambda d: (0, 0)),
                pl.BlockSpec((1, Din, 4 * H), lambda d: (d, 0, 0)),
                pl.BlockSpec((1, H, 4 * H), lambda d: (d, 0, 0)),
                pl.BlockSpec((1, 1, 4 * H), lambda d: (d, 0, 0)),
            ],
            out_specs=pl.BlockSpec((1, T, B, H), lambda d: (d, 0, 0, 0)),
            scratch_shapes=[pltpu.VMEM((T, B, 4 * H), jnp.float32)],
        ),
        compiler_params=pltpu.CompilerParams(
            dimension_semantics=("parallel",)),   # fwd/bwd independent (2 TCs on v7x)
    )(len2d, x_flat.astype(jnp.bfloat16),
      layer_p["w_ih"], layer_p["w_hh"], layer_p["b"])

    fwd, bwd = out[0], out[1]                       # (T, B, H) each
    return jnp.concatenate([fwd, bwd], axis=-1).reshape(T * B, 2 * H)


# ----------------------------------------------------------------------------
# Pallas kernel: hidden2out Linear + Softmax, lane-dense padded output
# ----------------------------------------------------------------------------
def _proj_softmax_kernel(x_ref, w_ref, b_ref, out_ref):
    logits = (jnp.dot(x_ref[...], w_ref[...], preferred_element_type=jnp.float32)
              + b_ref[...])
    m = jnp.max(logits, axis=-1, keepdims=True)
    e = jnp.exp(logits - m)
    denom = jnp.sum(e, axis=-1, keepdims=True)
    out_ref[...] = (e * pl.reciprocal(denom, approx=True)).astype(out_ref.dtype)


def proj_softmax_padded(x2d, w_pad, b_pad, row_tile=512):
    """x2d: (N, 2H). w_pad: (2H, P) bf16 (zero-padded cols), b_pad: (1, P)
    with -1e30 in padded slots. Returns (N, P) softmax probs (padded cols ~ 0)."""
    N, F = x2d.shape
    P = w_pad.shape[1]
    rt = min(row_tile, N)
    return pl.pallas_call(
        _proj_softmax_kernel,
        out_shape=jax.ShapeDtypeStruct((N, P), jnp.float32),
        grid_spec=pltpu.PrefetchScalarGridSpec(
            num_scalar_prefetch=0,
            grid=(pl.cdiv(N, rt),),
            in_specs=[
                pl.BlockSpec((rt, F), lambda i: (i, 0)),
                pl.BlockSpec((F, P), lambda i: (0, 0)),
                pl.BlockSpec((1, P), lambda i: (0, 0)),
            ],
            out_specs=pl.BlockSpec((rt, P), lambda i: (i, 0)),
        ),
        compiler_params=pltpu.CompilerParams(
            dimension_semantics=("parallel",)),
    )(x2d.astype(jnp.bfloat16), w_pad, b_pad)


# ----------------------------------------------------------------------------
# Parameter init (deterministic, PyTorch-style uniform) + one-time layout prep
# ----------------------------------------------------------------------------
def init_params(key, vocab_size, embedding_dim, hidden_dim, tagset_size,
                padding_idx=0):
    keys = iter(jax.random.split(key, 32))
    k = 1.0 / jnp.sqrt(hidden_dim)

    emb = jax.random.normal(next(keys), (vocab_size, embedding_dim), jnp.float32)
    if padding_idx is not None:
        emb = emb.at[padding_idx].set(0.0)

    def lstm_dir_params(in_dim):
        u = lambda shape: jax.random.uniform(next(keys), shape, jnp.float32, -k, k)
        return (u((4 * hidden_dim, in_dim)),        # weight_ih
                u((4 * hidden_dim, hidden_dim)),    # weight_hh
                u((4 * hidden_dim,)),               # bias_ih
                u((4 * hidden_dim,)))               # bias_hh

    layer0 = {"fwd": lstm_dir_params(embedding_dim),
              "bwd": lstm_dir_params(embedding_dim)}
    layer1 = {"fwd": lstm_dir_params(2 * hidden_dim),
              "bwd": lstm_dir_params(2 * hidden_dim)}

    kl = 1.0 / jnp.sqrt(2 * hidden_dim)
    w_out = jax.random.uniform(next(keys), (tagset_size, 2 * hidden_dim),
                               jnp.float32, -kl, kl)
    b_out = jax.random.uniform(next(keys), (tagset_size,), jnp.float32, -kl, kl)
    return {"embedding": emb, "lstm": [layer0, layer1],
            "w_out": w_out, "b_out": b_out}


def prepare_params(params, pad_tags=128):
    """One-time kernel-layout prep: stack fwd/bwd on a leading direction axis,
    transpose to (in, 4H), cast MXU operands to bf16, fold biases, and pad the
    output projection to a 128-lane-dense column count."""
    layers = []
    for layer in params["lstm"]:
        w_ih = jnp.stack([layer["fwd"][0].T, layer["bwd"][0].T]).astype(jnp.bfloat16)
        w_hh = jnp.stack([layer["fwd"][1].T, layer["bwd"][1].T]).astype(jnp.bfloat16)
        b = jnp.stack([(layer["fwd"][2] + layer["fwd"][3])[None, :],
                       (layer["bwd"][2] + layer["bwd"][3])[None, :]]).astype(jnp.float32)
        layers.append({"w_ih": w_ih, "w_hh": w_hh, "b": b})

    tagset, feat = params["w_out"].shape
    pad = pad_tags - tagset
    w_out = jnp.concatenate(
        [params["w_out"].T, jnp.zeros((feat, pad), jnp.float32)],
        axis=1).astype(jnp.bfloat16)                                   # (2H, 128)
    b_out = jnp.concatenate(
        [params["b_out"], jnp.full((pad,), -1e30, jnp.float32)])[None, :]  # (1, 128)

    return {"embedding": params["embedding"], "lstm": layers,
            "w_out": w_out, "b_out": b_out}


# ----------------------------------------------------------------------------
# Full forward pass (== BidirectionRnn.forward, soft_max=True, eval mode)
# ----------------------------------------------------------------------------
@functools.partial(jax.jit, static_argnames=("tagset",))
def bidirection_rnn_forward(prepped, sentence, word_len, *, tagset):
    B, T = sentence.shape
    Bp = ((B + 7) // 8) * 8           # pad batch to full 8-sublane vregs

    embeds = jnp.take(prepped["embedding"], sentence, axis=0)   # (B, T, E)
    embeds = jnp.pad(embeds, ((0, Bp - B), (0, 0), (0, 0)))
    lens = jnp.pad(word_len.astype(jnp.int32), (0, Bp - B))     # pad rows: len 0

    # time-major flatten: row t*Bp + b  == token t of sequence b
    x = jnp.transpose(embeds, (1, 0, 2)).reshape(T * Bp, -1)

    for layer_p in prepped["lstm"]:
        x = bidir_lstm_layer(x, lens, layer_p, T, Bp)           # (T*Bp, 2H)
        # TODO(synk): inter-layer Dropout(0.3) is inference-mode (identity).

    probs = proj_softmax_padded(x, prepped["w_out"], prepped["b_out"])  # (T*Bp, 128)
    probs = probs[:, :tagset].reshape(T, Bp, tagset)[:, :B, :]
    return jnp.transpose(probs, (1, 0, 2))                      # (B, T, tagset)


# ----------------------------------------------------------------------------
# Pure-JAX reference (same math, bf16-rounded MXU operands) for validation
# ----------------------------------------------------------------------------
@jax.jit
def _reference_forward(params, sentence, word_len):
    rnd = lambda a: a.astype(jnp.bfloat16).astype(jnp.float32)
    B, T = sentence.shape
    lens = word_len.astype(jnp.int32)
    x = jnp.take(params["embedding"], sentence, axis=0)         # (B, T, E)

    def run_dir(x_btd, p, reverse):
        w_ih, w_hh, b_ih, b_hh = p
        w_ih, w_hh, b = rnd(w_ih), rnd(w_hh), b_ih + b_hh
        H = w_hh.shape[1]
        h = jnp.zeros((B, H), jnp.float32)
        c = jnp.zeros((B, H), jnp.float32)
        outs = [None] * T
        for t in (range(T - 1, -1, -1) if reverse else range(T)):
            g = rnd(x_btd[:, t, :]) @ w_ih.T + rnd(h) @ w_hh.T + b
            i = jax.nn.sigmoid(g[:, 0 * H:1 * H])
            f = jax.nn.sigmoid(g[:, 1 * H:2 * H])
            gg = jnp.tanh(g[:, 2 * H:3 * H])
            o = jax.nn.sigmoid(g[:, 3 * H:4 * H])
            c_new = f * c + i * gg
            h_new = o * jnp.tanh(c_new)
            m = (lens > t)[:, None]
            h = jnp.where(m, h_new, h)
            c = jnp.where(m, c_new, c)
            outs[t] = jnp.where(m, h_new, 0.0)
        return jnp.stack(outs, axis=1)                           # (B, T, H)

    for layer in params["lstm"]:
        x = jnp.concatenate([run_dir(x, layer["fwd"], False),
                             run_dir(x, layer["bwd"], True)], axis=-1)
    logits = rnd(x) @ rnd(params["w_out"]).T + params["b_out"]
    return jax.nn.softmax(logits, axis=-1)


if __name__ == "__main__":
    VOCAB, EMB, HID, TAGS, B, T = 50, 16, 32, 5, 4, 8

    key = jax.random.PRNGKey(0)
    pkey, skey = jax.random.split(key)
    params = init_params(pkey, VOCAB, EMB, HID, TAGS, padding_idx=0)
    prepped = prepare_params(params)

    sentence = jax.random.randint(skey, (B, T), 1, VOCAB, dtype=jnp.int32)
    word_len = jnp.array([8, 5, 8, 3], dtype=jnp.int32)   # max == T
    # zero out padded token ids (padding_idx = 0), matching padded input usage
    t_idx = jnp.arange(T, dtype=jnp.int32)[None, :]
    sentence = jnp.where(t_idx < word_len[:, None], sentence, 0)

    out = bidirection_rnn_forward(prepped, sentence, word_len, tagset=TAGS)
    out = jax.block_until_ready(out)

    assert out.shape == (B, T, TAGS), out.shape
    row_sums = jnp.sum(out, axis=-1)
    assert bool(jnp.all(jnp.abs(row_sums - 1.0) < 1e-2)), "softmax rows != 1"

    ref = _reference_forward(params, sentence, word_len)
    max_err = float(jnp.max(jnp.abs(out - ref)))
    assert max_err < 2e-2, f"mismatch vs reference: {max_err}"

    print("KERNEL_OK")
</pallas_src>

<mosaic_0001>
module attributes {stable_mosaic.version = 11 : i64} {
  func.func @_proj_softmax_kernel(%arg0: i32, %arg1: memref<64x64xbf16, #tpu.memory_space<vmem>>, %arg2: memref<64x128xbf16, #tpu.memory_space<vmem>>, %arg3: memref<1x128xf32, #tpu.memory_space<vmem>>, %arg4: memref<64x128xf32, #tpu.memory_space<vmem>>) attributes {dimension_semantics = [#tpu.dimension_semantics<parallel>], iteration_bounds = array<i64: 1>, scalar_prefetch = 0 : i64, scratch_operands = 0 : i64, tpu.core_type = #tpu.core_type<tc>, window_params = [{transform_indices = @transform_0, window_bounds = array<i64: 64, 64>}, {pipeline_mode = #tpu.pipeline_mode<synchronous>, transform_indices = @transform_1, window_bounds = array<i64: 64, 128>}, {pipeline_mode = #tpu.pipeline_mode<synchronous>, transform_indices = @transform_2, window_bounds = array<i64: 1, 128>}, {transform_indices = @transform_3, window_bounds = array<i64: 64, 128>}]} {
    %c0 = arith.constant 0 : index
    %c0_0 = arith.constant 0 : index
    %0 = vector.load %arg1[%c0, %c0_0] : memref<64x64xbf16, #tpu.memory_space<vmem>>, vector<64x64xbf16>
    %c0_1 = arith.constant 0 : index
    %c0_2 = arith.constant 0 : index
    %1 = vector.load %arg2[%c0_1, %c0_2] : memref<64x128xbf16, #tpu.memory_space<vmem>>, vector<64x128xbf16>
    %cst = arith.constant dense<0.000000e+00> : vector<64x128xf32>
    %2 = tpu.matmul %0, %1, %cst {dimension_numbers = #tpu.dot_dimension_numbers<[1], [0], [0], [1], [0, 0, 1, 1], [], []>} : vector<64x64xbf16>, vector<64x128xbf16>, vector<64x128xf32> -> vector<64x128xf32>
    %c0_3 = arith.constant 0 : index
    %c0_4 = arith.constant 0 : index
    %3 = vector.load %arg3[%c0_3, %c0_4] : memref<1x128xf32, #tpu.memory_space<vmem>>, vector<1x128xf32>
    %4 = vector.broadcast %3 : vector<1x128xf32> to vector<64x128xf32>
    %5 = arith.addf %2, %4 : vector<64x128xf32>
    %cst_5 = arith.constant dense<0xFF800000> : vector<64xf32>
    %6 = vector.multi_reduction <maximumf>, %5, %cst_5 [1] : vector<64x128xf32> to vector<64xf32>
    %7 = vector.shape_cast %6 : vector<64xf32> to vector<64x1xf32>
    %8 = vector.broadcast %7 : vector<64x1xf32> to vector<64x128xf32>
    %9 = arith.subf %5, %8 : vector<64x128xf32>
    %10 = math.exp %9 : vector<64x128xf32>
    %cst_6 = arith.constant dense<0.000000e+00> : vector<64xf32>
    %11 = vector.multi_reduction <add>, %10, %cst_6 [1] : vector<64x128xf32> to vector<64xf32>
    %12 = vector.shape_cast %11 : vector<64xf32> to vector<64x1xf32>
    %13 = tpu.reciprocal %12 {approx = true} : vector<64x1xf32> -> vector<64x1xf32>
    %14 = vector.broadcast %13 : vector<64x1xf32> to vector<64x128xf32>
    %15 = arith.mulf %10, %14 : vector<64x128xf32>
    %c0_7 = arith.constant 0 : index
    %c0_8 = arith.constant 0 : index
    %16 = vector.load %arg4[%c0_7, %c0_8] : memref<64x128xf32, #tpu.memory_space<vmem>>, vector<64x128xf32>
    tpu.vector_store %arg4[%c0_7, %c0_8], %15 {strides = array<i32>} : memref<64x128xf32, #tpu.memory_space<vmem>>, vector<64x128xf32>,
    return
  }
  func.func @transform_0(%arg0: i32) -> (i32, i32) {
    %c0_i32 = arith.constant 0 : i32
    %c0_i32_0 = arith.constant 0 : i32
    return %arg0, %c0_i32 : i32, i32
  }
  func.func @transform_1(%arg0: i32) -> (i32, i32) {
    %c0_i32 = arith.constant 0 : i32
    %c0_i32_0 = arith.constant 0 : i32
    %c0_i32_1 = arith.constant 0 : i32
    return %c0_i32, %c0_i32_0 : i32, i32
  }
  func.func @transform_2(%arg0: i32) -> (i32, i32) {
    %c0_i32 = arith.constant 0 : i32
    %c0_i32_0 = arith.constant 0 : i32
    %c0_i32_1 = arith.constant 0 : i32
    return %c0_i32, %c0_i32_0 : i32, i32
  }
  func.func @transform_3(%arg0: i32) -> (i32, i32) {
    %c0_i32 = arith.constant 0 : i32
    %c0_i32_0 = arith.constant 0 : i32
    return %arg0, %c0_i32 : i32, i32
  }
}

module attributes {stable_mosaic.version = 11 : i64} {
  func.func @_bilstm_layer_kernel(%arg0: i32, %arg1: memref<8x1xi32, #tpu.memory_space<vmem>>, %arg2: memref<64x16xbf16, #tpu.memory_space<vmem>>, %arg3: memref<1x16x128xbf16, #tpu.memory_space<vmem>>, %arg4: memref<1x32x128xbf16, #tpu.memory_space<vmem>>, %arg5: memref<1x1x128xf32, #tpu.memory_space<vmem>>, %arg6: memref<1x8x8x32xf32, #tpu.memory_space<vmem>>, %arg7: memref<8x8x128xf32, #tpu.memory_space<vmem>>) attributes {dimension_semantics = [#tpu.dimension_semantics<parallel>], iteration_bounds = array<i64: 2>, scalar_prefetch = 0 : i64, scratch_operands = 1 : i64, tpu.core_type = #tpu.core_type<tc>, window_params = [{pipeline_mode = #tpu.pipeline_mode<synchronous>, transform_indices = @transform_0, window_bounds = array<i64: 8, 1>}, {pipeline_mode = #tpu.pipeline_mode<synchronous>, transform_indices = @transform_1, window_bounds = array<i64: 64, 16>}, {transform_indices = @transform_2, window_bounds = array<i64: 1, 16, 128>}, {transform_indices = @transform_3, window_bounds = array<i64: 1, 32, 128>}, {transform_indices = @transform_4, window_bounds = array<i64: 1, 1, 128>}, {transform_indices = @transform_5, window_bounds = array<i64: 1, 8, 8, 32>}]} {
    %c0 = arith.constant 0 : index
    %c0_0 = arith.constant 0 : index
    %0 = vector.load %arg2[%c0, %c0_0] : memref<64x16xbf16, #tpu.memory_space<vmem>>, vector<64x16xbf16>
    %c0_1 = arith.constant 0 : index
    %c0_2 = arith.constant 0 : index
    %c0_3 = arith.constant 0 : index
    %1 = vector.load %arg3[%c0_1, %c0_2, %c0_3] : memref<1x16x128xbf16, #tpu.memory_space<vmem>>, vector<1x16x128xbf16>
    %2 = vector.shape_cast %1 : vector<1x16x128xbf16> to vector<16x128xbf16>
    %cst = arith.constant dense<0.000000e+00> : vector<64x128xf32>
    %3 = tpu.matmul %0, %2, %cst {dimension_numbers = #tpu.dot_dimension_numbers<[1], [0], [0], [1], [0, 0, 1, 1], [], []>} : vector<64x16xbf16>, vector<16x128xbf16>, vector<64x128xf32> -> vector<64x128xf32>
    %c0_4 = arith.constant 0 : index
    %c0_5 = arith.constant 0 : index
    %c0_6 = arith.constant 0 : index
    %4 = vector.load %arg5[%c0_4, %c0_5, %c0_6] : memref<1x1x128xf32, #tpu.memory_space<vmem>>, vector<1x1x128xf32>
    %5 = vector.shape_cast %4 : vector<1x1x128xf32> to vector<1x128xf32>
    %6 = vector.broadcast %5 : vector<1x128xf32> to vector<64x128xf32>
    %7 = arith.addf %3, %6 : vector<64x128xf32>
    %8 = vector.shape_cast %7 : vector<64x128xf32> to vector<8x8x128xf32>
    %c0_7 = arith.constant 0 : index
    %c0_8 = arith.constant 0 : index
    %c0_9 = arith.constant 0 : index
    %9 = vector.load %arg7[%c0_7, %c0_8, %c0_9] : memref<8x8x128xf32, #tpu.memory_space<vmem>>, vector<8x8x128xf32>
    tpu.vector_store %arg7[%c0_7, %c0_8, %c0_9], %8 {strides = array<i32>} : memref<8x8x128xf32, #tpu.memory_space<vmem>>, vector<8x8x128xf32>,
    %c0_10 = arith.constant 0 : index
    %c0_11 = arith.constant 0 : index
    %c0_12 = arith.constant 0 : index
    %10 = vector.load %arg4[%c0_10, %c0_11, %c0_12] : memref<1x32x128xbf16, #tpu.memory_space<vmem>>, vector<1x32x128xbf16>
    %11 = vector.shape_cast %10 : vector<1x32x128xbf16> to vector<32x128xbf16>
    %c0_13 = arith.constant 0 : index
    %c0_14 = arith.constant 0 : index
    %12 = vector.load %arg1[%c0_13, %c0_14] : memref<8x1xi32, #tpu.memory_space<vmem>>, vector<8x1xi32>
    %c1_i32 = arith.constant 1 : i32
    %13 = arith.cmpi eq, %arg0, %c1_i32 : i32
    %cst_15 = arith.constant 0.000000e+00 : f32
    %14 = vector.broadcast %cst_15 : f32 to vector<8x32xf32>
    %cst_16 = arith.constant 0.000000e+00 : f32
    %15 = vector.broadcast %cst_16 : f32 to vector<8x32xf32>
    %c0_i32 = arith.constant 0 : i32
    %c7_i32 = arith.constant 7 : i32
    %16 = arith.subi %c7_i32, %c0_i32 : i32
    %17 = arith.select %13, %16, %c0_i32 : i32
    %18 = arith.index_cast %17 : i32 to index
    %c0_17 = arith.constant 0 : index
    %c0_18 = arith.constant 0 : index
    %19 = vector.load %arg7[%18, %c0_17, %c0_18] : memref<8x8x128xf32, #tpu.memory_space<vmem>>, vector<1x8x128xf32>
    %20 = vector.shape_cast %19 : vector<1x8x128xf32> to vector<8x128xf32>
    %21 = arith.truncf %14 : vector<8x32xf32> to vector<8x32xbf16>
    %cst_19 = arith.constant dense<0.000000e+00> : vector<8x128xf32>
    %22 = tpu.matmul %21, %11, %cst_19 {dimension_numbers = #tpu.dot_dimension_numbers<[1], [0], [0], [1], [0, 0, 1, 1], [], []>} : vector<8x32xbf16>, vector<32x128xbf16>, vector<8x128xf32> -> vector<8x128xf32>
    %23 = arith.addf %20, %22 : vector<8x128xf32>
    %24 = vector.extract_strided_slice %23 {offsets = [0, 0], sizes = [8, 32], strides = [1, 1]} : vector<8x128xf32> to vector<8x32xf32>
    %25 = arith.negf %24 : vector<8x32xf32>
    %26 = math.exp %25 : vector<8x32xf32>
    %cst_20 = arith.constant 1.000000e+00 : f32
    %27 = vector.broadcast %cst_20 : f32 to vector<8x32xf32>
    %28 = arith.addf %27, %26 : vector<8x32xf32>
    %29 = arith.divf %27, %28 : vector<8x32xf32>
    %30 = vector.extract_strided_slice %23 {offsets = [0, 32], sizes = [8, 32], strides = [1, 1]} : vector<8x128xf32> to vector<8x32xf32>
    %31 = arith.negf %30 : vector<8x32xf32>
    %32 = math.exp %31 : vector<8x32xf32>
    %cst_21 = arith.constant 1.000000e+00 : f32
    %33 = vector.broadcast %cst_21 : f32 to vector<8x32xf32>
    %34 = arith.addf %33, %32 : vector<8x32xf32>
    %35 = arith.divf %33, %34 : vector<8x32xf32>
    %36 = vector.extract_strided_slice %23 {offsets = [0, 64], sizes = [8, 32], strides = [1, 1]} : vector<8x128xf32> to vector<8x32xf32>
    %37 = math.tanh %36 : vector<8x32xf32>
    %38 = vector.extract_strided_slice %23 {offsets = [0, 96], sizes = [8, 32], strides = [1, 1]} : vector<8x128xf32> to vector<8x32xf32>
    %39 = arith.negf %38 : vector<8x32xf32>
    %40 = math.exp %39 : vector<8x32xf32>
    %cst_22 = arith.constant 1.000000e+00 : f32
    %41 = vector.broadcast %cst_22 : f32 to vector<8x32xf32>
    %42 = arith.addf %41, %40 : vector<8x32xf32>
    %43 = arith.divf %41, %42 : vector<8x32xf32>
    %44 = arith.mulf %35, %15 : vector<8x32xf32>
    %45 = arith.mulf %29, %37 : vector<8x32xf32>
    %46 = arith.addf %44, %45 : vector<8x32xf32>
    %47 = math.tanh %46 : vector<8x32xf32>
    %48 = arith.mulf %43, %47 : vector<8x32xf32>
    %49 = vector.broadcast %17 : i32 to vector<8x1xi32>
    %50 = arith.cmpi sgt, %12, %49 : vector<8x1xi32>
    %cst_23 = arith.constant 0.000000e+00 : f32
    %51 = vector.shape_cast %50 : vector<8x1xi1> to vector<8x1xi1>
    %52 = vector.broadcast %51 : vector<8x1xi1> to vector<8x32xi1>
    %53 = vector.broadcast %cst_23 : f32 to vector<8x32xf32>
    %54 = arith.select %52, %48, %53 : vector<8x32xi1>, vector<8x32xf32>
    %c0_24 = arith.constant 0 : index
    %55 = arith.index_cast %17 : i32 to index
    %c0_25 = arith.constant 0 : index
    %c0_26 = arith.constant 0 : index
    %56 = vector.load %arg6[%c0_24, %55, %c0_25, %c0_26] : memref<1x8x8x32xf32, #tpu.memory_space<vmem>>, vector<1x1x8x32xf32>
    %57 = vector.shape_cast %56 : vector<1x1x8x32xf32> to vector<8x32xf32>
    %58 = vector.shape_cast %54 : vector<8x32xf32> to vector<1x1x8x32xf32>
    tpu.vector_store %arg6[%c0_24, %55, %c0_25, %c0_26], %58 {strides = array<i32>} : memref<1x8x8x32xf32, #tpu.memory_space<vmem>>, vector<1x1x8x32xf32>,
    %59 = vector.shape_cast %50 : vector<8x1xi1> to vector<8x1xi1>
    %60 = vector.broadcast %59 : vector<8x1xi1> to vector<8x32xi1>
    %61 = arith.select %60, %48, %14 : vector<8x32xi1>, vector<8x32xf32>
    %62 = vector.shape_cast %50 : vector<8x1xi1> to vector<8x1xi1>
    %63 = vector.broadcast %62 : vector<8x1xi1> to vector<8x32xi1>
    %64 = arith.select %63, %46, %15 : vector<8x32xi1>, vector<8x32xf32>
    %c1_i32_27 = arith.constant 1 : i32
    %c7_i32_28 = arith.constant 7 : i32
    %65 = arith.subi %c7_i32_28, %c1_i32_27 : i32
    %66 = arith.select %13, %65, %c1_i32_27 : i32
    %67 = arith.index_cast %66 : i32 to index
    %c0_29 = arith.constant 0 : index
    %c0_30 = arith.constant 0 : index
    %68 = vector.load %arg7[%67, %c0_29, %c0_30] : memref<8x8x128xf32, #tpu.memory_space<vmem>>, vector<1x8x128xf32>
    %69 = vector.shape_cast %68 : vector<1x8x128xf32> to vector<8x128xf32>
    %70 = arith.truncf %61 : vector<8x32xf32> to vector<8x32xbf16>
    %cst_31 = arith.constant dense<0.000000e+00> : vector<8x128xf32>
    %71 = tpu.matmul %70, %11, %cst_31 {dimension_numbers = #tpu.dot_dimension_numbers<[1], [0], [0], [1], [0, 0, 1, 1], [], []>} : vector<8x32xbf16>, vector<32x128xbf16>, vector<8x128xf32> -> vector<8x128xf32>
    %72 = arith.addf %69, %71 : vector<8x128xf32>
    %73 = vector.extract_strided_slice %72 {offsets = [0, 0], sizes = [8, 32], strides = [1, 1]} : vector<8x128xf32> to vector<8x32xf32>
    %74 = arith.negf %73 : vector<8x32xf32>
    %75 = math.exp %74 : vector<8x32xf32>
    %cst_32 = arith.constant 1.000000e+00 : f32
    %76 = vector.broadcast %cst_32 : f32 to vector<8x32xf32>
    %77 = arith.addf %76, %75 : vector<8x32xf32>
    %78 = arith.divf %76, %77 : vector<8x32xf32>
    %79 = vector.extract_strided_slice %72 {offsets = [0, 32], sizes = [8, 32], strides = [1, 1]} : vector<8x128xf32> to vector<8x32xf32>
    %80 = arith.negf %79 : vector<8x32xf32>
    %81 = math.exp %80 : vector<8x32xf32>
    %cst_33 = arith.constant 1.000000e+00 : f32
    %82 = vector.broadcast %cst_33 : f32 to vector<8x32xf32>
    %83 = arith.addf %82, %81 : vector<8x32xf32>
    %84 = arith.divf %82, %83 : vector<8x32xf32>
    %85 = vector.extract_strided_slice %72 {offsets = [0, 64], sizes = [8, 32], strides = [1, 1]} : vector<8x128xf32> to vector<8x32xf32>
    %86 = math.tanh %85 : vector<8x32xf32>
    %87 = vector.extract_strided_slice %72 {offsets = [0, 96], sizes = [8, 32], strides = [1, 1]} : vector<8x128xf32> to vector<8x32xf32>
    %88 = arith.negf %87 : vector<8x32xf32>
    %89 = math.exp %88 : vector<8x32xf32>
    %cst_34 = arith.constant 1.000000e+00 : f32
    %90 = vector.broadcast %cst_34 : f32 to vector<8x32xf32>
    %91 = arith.addf %90, %89 : vector<8x32xf32>
    %92 = arith.divf %90, %91 : vector<8x32xf32>
    %93 = arith.mulf %84, %64 : vector<8x32xf32>
    %94 = arith.mulf %78, %86 : vector<8x32xf32>
    %95 = arith.addf %93, %94 : vector<8x32xf32>
    %96 = math.tanh %95 : vector<8x32xf32>
    %97 = arith.mulf %92, %96 : vector<8x32xf32>
    %98 = vector.broadcast %66 : i32 to vector<8x1xi32>
    %99 = arith.cmpi sgt, %12, %98 : vector<8x1xi32>
    %cst_35 = arith.constant 0.000000e+00 : f32
    %100 = vector.shape_cast %99 : vector<8x1xi1> to vector<8x1xi1>
    %101 = vector.broadcast %100 : vector<8x1xi1> to vector<8x32xi1>
    %102 = vector.broadcast %cst_35 : f32 to vector<8x32xf32>
    %103 = arith.select %101, %97, %102 : vector<8x32xi1>, vector<8x32xf32>
    %c0_36 = arith.constant 0 : index
    %104 = arith.index_cast %66 : i32 to index
    %c0_37 = arith.constant 0 : index
    %c0_38 = arith.constant 0 : index
    %105 = vector.load %arg6[%c0_36, %104, %c0_37, %c0_38] : memref<1x8x8x32xf32, #tpu.memory_space<vmem>>, vector<1x1x8x32xf32>
    %106 = vector.shape_cast %105 : vector<1x1x8x32xf32> to vector<8x32xf32>
    %107 = vector.shape_cast %103 : vector<8x32xf32> to vector<1x1x8x32xf32>
    tpu.vector_store %arg6[%c0_36, %104, %c0_37, %c0_38], %107 {strides = array<i32>} : memref<1x8x8x32xf32, #tpu.memory_space<vmem>>, vector<1x1x8x32xf32>,
    %108 = vector.shape_cast %99 : vector<8x1xi1> to vector<8x1xi1>
    %109 = vector.broadcast %108 : vector<8x1xi1> to vector<8x32xi1>
    %110 = arith.select %109, %97, %61 : vector<8x32xi1>, vector<8x32xf32>
    %111 = vector.shape_cast %99 : vector<8x1xi1> to vector<8x1xi1>
    %112 = vector.broadcast %111 : vector<8x1xi1> to vector<8x32xi1>
    %113 = arith.select %112, %95, %64 : vector<8x32xi1>, vector<8x32xf32>
    %c2_i32 = arith.constant 2 : i32
    %c7_i32_39 = arith.constant 7 : i32
    %114 = arith.subi %c7_i32_39, %c2_i32 : i32
    %115 = arith.select %13, %114, %c2_i32 : i32
    %116 = arith.index_cast %115 : i32 to index
    %c0_40 = arith.constant 0 : index
    %c0_41 = arith.constant 0 : index
    %117 = vector.load %arg7[%116, %c0_40, %c0_41] : memref<8x8x128xf32, #tpu.memory_space<vmem>>, vector<1x8x128xf32>
    %118 = vector.shape_cast %117 : vector<1x8x128xf32> to vector<8x128xf32>
    %119 = arith.truncf %110 : vector<8x32xf32> to vector<8x32xbf16>
    %cst_42 = arith.constant dense<0.000000e+00> : vector<8x128xf32>
    %120 = tpu.matmul %119, %11, %cst_42 {dimension_numbers = #tpu.dot_dimension_numbers<[1], [0], [0], [1], [0, 0, 1, 1], [], []>} : vector<8x32xbf16>, vector<32x128xbf16>, vector<8x128xf32> -> vector<8x128xf32>
    %121 = arith.addf %118, %120 : vector<8x128xf32>
    %122 = vector.extract_strided_slice %121 {offsets = [0, 0], sizes = [8, 32], strides = [1, 1]} : vector<8x128xf32> to vector<8x32xf32>
    %123 = arith.negf %122 : vector<8x32xf32>
    %124 = math.exp %123 : vector<8x32xf32>
    %cst_43 = arith.constant 1.000000e+00 : f32
    %125 = vector.broadcast %cst_43 : f32 to vector<8x32xf32>
    %126 = arith.addf %125, %124 : vector<8x32xf32>
    %127 = arith.divf %125, %126 : vector<8x32xf32>
    %128 = vector.extract_strided_slice %121 {offsets = [0, 32], sizes = [8, 32], strides = [1, 1]} : vector<8x128xf32> to vector<8x32xf32>
    %129 = arith.negf %128 : vector<8x32xf32>
    %130 = math.exp %129 : vector<8x32xf32>
    %cst_44 = arith.constant 1.000000e+00 : f32
    %131 = vector.broadcast %cst_44 : f32 to vector<8x32xf32>
    %132 = arith.addf %131, %130 : vector<8x32xf32>
    %133 = arith.divf %131, %132 : vector<8x32xf32>
    %134 = vector.extract_strided_slice %121 {offsets = [0, 64], sizes = [8, 32], strides = [1, 1]} : vector<8x128xf32> to vector<8x32xf32>
    %135 = math.tanh %134 : vector<8x32xf32>
    %136 = vector.extract_strided_slice %121 {offsets = [0, 96], sizes = [8, 32], strides = [1, 1]} : vector<8x128xf32> to vector<8x32xf32>
    %137 = arith.negf %136 : vector<8x32xf32>
    %138 = math.exp %137 : vector<8x32xf32>
    %cst_45 = arith.constant 1.000000e+00 : f32
    %139 = vector.broadcast %cst_45 : f32 to vector<8x32xf32>
    %140 = arith.addf %139, %138 : vector<8x32xf32>
    %141 = arith.divf %139, %140 : vector<8x32xf32>
    %142 = arith.mulf %133, %113 : vector<8x32xf32>
    %143 = arith.mulf %127, %135 : vector<8x32xf32>
    %144 = arith.addf %142, %143 : vector<8x32xf32>
    %145 = math.tanh %144 : vector<8x32xf32>
    %146 = arith.mulf %141, %145 : vector<8x32xf32>
    %147 = vector.broadcast %115 : i32 to vector<8x1xi32>
    %148 = arith.cmpi sgt, %12, %147 : vector<8x1xi32>
    %cst_46 = arith.constant 0.000000e+00 : f32
    %149 = vector.shape_cast %148 : vector<8x1xi1> to vector<8x1xi1>
    %150 = vector.broadcast %149 : vector<8x1xi1> to vector<8x32xi1>
    %151 = vector.broadcast %cst_46 : f32 to vector<8x32xf32>
    %152 = arith.select %150, %146, %151 : vector<8x32xi1>, vector<8x32xf32>
    %c0_47 = arith.constant 0 : index
    %153 = arith.index_cast %115 : i32 to index
    %c0_48 = arith.constant 0 : index
    %c0_49 = arith.constant 0 : index
    %154 = vector.load %arg6[%c0_47, %153, %c0_48, %c0_49] : memref<1x8x8x32xf32, #tpu.memory_space<vmem>>, vector<1x1x8x32xf32>
    %155 = vector.shape_cast %154 : vector<1x1x8x32xf32> to vector<8x32xf32>
    %156 = vector.shape_cast %152 : vector<8x32xf32> to vector<1x1x8x32xf32>
    tpu.vector_store %arg6[%c0_47, %153, %c0_48, %c0_49], %156 {strides = array<i32>} : memref<1x8x8x32xf32, #tpu.memory_space<vmem>>, vector<1x1x8x32xf32>,
    %157 = vector.shape_cast %148 : vector<8x1xi1> to vector<8x1xi1>
    %158 = vector.broadcast %157 : vector<8x1xi1> to vector<8x32xi1>
    %159 = arith.select %158, %146, %110 : vector<8x32xi1>, vector<8x32xf32>
    %160 = vector.shape_cast %148 : vector<8x1xi1> to vector<8x1xi1>
    %161 = vector.broadcast %160 : vector<8x1xi1> to vector<8x32xi1>
    %162 = arith.select %161, %144, %113 : vector<8x32xi1>, vector<8x32xf32>
    %c3_i32 = arith.constant 3 : i32
    %c7_i32_50 = arith.constant 7 : i32
    %163 = arith.subi %c7_i32_50, %c3_i32 : i32
    %164 = arith.select %13, %163, %c3_i32 : i32
    %165 = arith.index_cast %164 : i32 to index
    %c0_51 = arith.constant 0 : index
    %c0_52 = arith.constant 0 : index
    %166 = vector.load %arg7[%165, %c0_51, %c0_52] : memref<8x8x128xf32, #tpu.memory_space<vmem>>, vector<1x8x128xf32>
    %167 = vector.shape_cast %166 : vector<1x8x128xf32> to vector<8x128xf32>
    %168 = arith.truncf %159 : vector<8x32xf32> to vector<8x32xbf16>
    %cst_53 = arith.constant dense<0.000000e+00> : vector<8x128xf32>
    %169 = tpu.matmul %168, %11, %cst_53 {dimension_numbers = #tpu.dot_dimension_numbers<[1], [0], [0], [1], [0, 0, 1, 1], [], []>} : vector<8x32xbf16>, vector<32x128xbf16>, vector<8x128xf32> -> vector<8x128xf32>
    %170 = arith.addf %167, %169 : vector<8x128xf32>
    %171 = vector.extract_strided_slice %170 {offsets = [0, 0], sizes = [8, 32], strides = [1, 1]} : vector<8x128xf32> to vector<8x32xf32>
    %172 = arith.negf %171 : vector<8x32xf32>
    %173 = math.exp %172 : vector<8x32xf32>
    %cst_54 = arith.constant 1.000000e+00 : f32
    %174 = vector.broadcast %cst_54 : f32 to vector<8x32xf32>
    %175 = arith.addf %174, %173 : vector<8x32xf32>
    %176 = arith.divf %174, %175 : vector<8x32xf32>
    %177 = vector.extract_strided_slice %170 {offsets = [0, 32], sizes = [8, 32], strides = [1, 1]} : vector<8x128xf32> to vector<8x32xf32>
    %178 = arith.negf %177 : vector<8x32xf32>
    %179 = math.exp %178 : vector<8x32xf32>
    %cst_55 = arith.constant 1.000000e+00 : f32
    %180 = vector.broadcast %cst_55 : f32 to vector<8x32xf32>
    %181 = arith.addf %180, %179 : vector<8x32xf32>
    %182 = arith.divf %180, %181 : vector<8x32xf32>
    %183 = vector.extract_strided_slice %170 {offsets = [0, 64], sizes = [8, 32], strides = [1, 1]} : vector<8x128xf32> to vector<8x32xf32>
    %184 = math.tanh %183 : vector<8x32xf32>
    %185 = vector.extract_strided_slice %170 {offsets = [0, 96], sizes = [8, 32], strides = [1, 1]} : vector<8x128xf32> to vector<8x32xf32>
    %186 = arith.negf %185 : vector<8x32xf32>
    %187 = math.exp %186 : vector<8x32xf32>
    %cst_56 = arith.constant 1.000000e+00 : f32
    %188 = vector.broadcast %cst_56 : f32 to vector<8x32xf32>
    %189 = arith.addf %188, %187 : vector<8x32xf32>
    %190 = arith.divf %188, %189 : vector<8x32xf32>
    %191 = arith.mulf %182, %162 : vector<8x32xf32>
    %192 = arith.mulf %176, %184 : vector<8x32xf32>
    %193 = arith.addf %191, %192 : vector<8x32xf32>
    %194 = math.tanh %193 : vector<8x32xf32>
    %195 = arith.mulf %190, %194 : vector<8x32xf32>
    %196 = vector.broadcast %164 : i32 to vector<8x1xi32>
    %197 = arith.cmpi sgt, %12, %196 : vector<8x1xi32>
    %cst_57 = arith.constant 0.000000e+00 : f32
    %198 = vector.shape_cast %197 : vector<8x1xi1> to vector<8x1xi1>
    %199 = vector.broadcast %198 : vector<8x1xi1> to vector<8x32xi1>
    %200 = vector.broadcast %cst_57 : f32 to vector<8x32xf32>
    %201 = arith.select %199, %195, %200 : vector<8x32xi1>, vector<8x32xf32>
    %c0_58 = arith.constant 0 : index
    %202 = arith.index_cast %164 : i32 to index
    %c0_59 = arith.constant 0 : index
    %c0_60 = arith.constant 0 : index
    %203 = vector.load %arg6[%c0_58, %202, %c0_59, %c0_60] : memref<1x8x8x32xf32, #tpu.memory_space<vmem>>, vector<1x1x8x32xf32>
    %204 = vector.shape_cast %203 : vector<1x1x8x32xf32> to vector<8x32xf32>
    %205 = vector.shape_cast %201 : vector<8x32xf32> to vector<1x1x8x32xf32>
    tpu.vector_store %arg6[%c0_58, %202, %c0_59, %c0_60], %205 {strides = array<i32>} : memref<1x8x8x32xf32, #tpu.memory_space<vmem>>, vector<1x1x8x32xf32>,
    %206 = vector.shape_cast %197 : vector<8x1xi1> to vector<8x1xi1>
    %207 = vector.broadcast %206 : vector<8x1xi1> to vector<8x32xi1>
    %208 = arith.select %207, %195, %159 : vector<8x32xi1>, vector<8x32xf32>
    %209 = vector.shape_cast %197 : vector<8x1xi1> to vector<8x1xi1>
    %210 = vector.broadcast %209 : vector<8x1xi1> to vector<8x32xi1>
    %211 = arith.select %210, %193, %162 : vector<8x32xi1>, vector<8x32xf32>
    %c4_i32 = arith.constant 4 : i32
    %c7_i32_61 = arith.constant 7 : i32
    %212 = arith.subi %c7_i32_61, %c4_i32 : i32
    %213 = arith.select %13, %212, %c4_i32 : i32
    %214 = arith.index_cast %213 : i32 to index
    %c0_62 = arith.constant 0 : index
    %c0_63 = arith.constant 0 : index
    %215 = vector.load %arg7[%214, %c0_62, %c0_63] : memref<8x8x128xf32, #tpu.memory_space<vmem>>, vector<1x8x128xf32>
    %216 = vector.shape_cast %215 : vector<1x8x128xf32> to vector<8x128xf32>
    %217 = arith.truncf %208 : vector<8x32xf32> to vector<8x32xbf16>
    %cst_64 = arith.constant dense<0.000000e+00> : vector<8x128xf32>
    %218 = tpu.matmul %217, %11, %cst_64 {dimension_numbers = #tpu.dot_dimension_numbers<[1], [0], [0], [1], [0, 0, 1, 1], [], []>} : vector<8x32xbf16>, vector<32x128xbf16>, vector<8x128xf32> -> vector<8x128xf32>
    %219 = arith.addf %216, %218 : vector<8x128xf32>
    %220 = vector.extract_strided_slice %219 {offsets = [0, 0], sizes = [8, 32], strides = [1, 1]} : vector<8x128xf32> to vector<8x32xf32>
    %221 = arith.negf %220 : vector<8x32xf32>
    %222 = math.exp %221 : vector<8x32xf32>
    %cst_65 = arith.constant 1.000000e+00 : f32
    %223 = vector.broadcast %cst_65 : f32 to vector<8x32xf32>
    %224 = arith.addf %223, %222 : vector<8x32xf32>
    %225 = arith.divf %223, %224 : vector<8x32xf32>
    %226 = vector.extract_strided_slice %219 {offsets = [0, 32], sizes = [8, 32], strides = [1, 1]} : vector<8x128xf32> to vector<8x32xf32>
    %227 = arith.negf %226 : vector<8x32xf32>
    %228 = math.exp %227 : vector<8x32xf32>
    %cst_66 = arith.constant 1.000000e+00 : f32
    %229 = vector.broadcast %cst_66 : f32 to vector<8x32xf32>
    %230 = arith.addf %229, %228 : vector<8x32xf32>
    %231 = arith.divf %229, %230 : vector<8x32xf32>
    %232 = vector.extract_strided_slice %219 {offsets = [0, 64], sizes = [8, 32], strides = [1, 1]} : vector<8x128xf32> to vector<8x32xf32>
    %233 = math.tanh %232 : vector<8x32xf32>
    %234 = vector.extract_strided_slice %219 {offsets = [0, 96], sizes = [8, 32], strides = [1, 1]} : vector<8x128xf32> to vector<8x32xf32>
    %235 = arith.negf %234 : vector<8x32xf32>
    %236 = math.exp %235 : vector<8x32xf32>
    %cst_67 = arith.constant 1.000000e+00 : f32
    %237 = vector.broadcast %cst_67 : f32 to vector<8x32xf32>
    %238 = arith.addf %237, %236 : vector<8x32xf32>
    %239 = arith.divf %237, %238 : vector<8x32xf32>
    %240 = arith.mulf %231, %211 : vector<8x32xf32>
    %241 = arith.mulf %225, %233 : vector<8x32xf32>
    %242 = arith.addf %240, %241 : vector<8x32xf32>
    %243 = math.tanh %242 : vector<8x32xf32>
    %244 = arith.mulf %239, %243 : vector<8x32xf32>
    %245 = vector.broadcast %213 : i32 to vector<8x1xi32>
    %246 = arith.cmpi sgt, %12, %245 : vector<8x1xi32>
    %cst_68 = arith.constant 0.000000e+00 : f32
    %247 = vector.shape_cast %246 : vector<8x1xi1> to vector<8x1xi1>
    %248 = vector.broadcast %247 : vector<8x1xi1> to vector<8x32xi1>
    %249 = vector.broadcast %cst_68 : f32 to vector<8x32xf32>
    %250 = arith.select %248, %244, %249 : vector<8x32xi1>, vector<8x32xf32>
    %c0_69 = arith.constant 0 : index
    %251 = arith.index_cast %213 : i32 to index
    %c0_70 = arith.constant 0 : index
    %c0_71 = arith.constant 0 : index
    %252 = vector.load %arg6[%c0_69, %251, %c0_70, %c0_71] : memref<1x8x8x32xf32, #tpu.memory_space<vmem>>, vector<1x1x8x32xf32>
    %253 = vector.shape_cast %252 : vector<1x1x8x32xf32> to vector<8x32xf32>
    %254 = vector.shape_cast %250 : vector<8x32xf32> to vector<1x1x8x32xf32>
    tpu.vector_store %arg6[%c0_69, %251, %c0_70, %c0_71], %254 {strides = array<i32>} : memref<1x8x8x32xf32, #tpu.memory_space<vmem>>, vector<1x1x8x32xf32>,
    %255 = vector.shape_cast %246 : vector<8x1xi1> to vector<8x1xi1>
    %256 = vector.broadcast %255 : vector<8x1xi1> to vector<8x32xi1>
    %257 = arith.select %256, %244, %208 : vector<8x32xi1>, vector<8x32xf32>
    %258 = vector.shape_cast %246 : vector<8x1xi1> to vector<8x1xi1>
    %259 = vector.broadcast %258 : vector<8x1xi1> to vector<8x32xi1>
    %260 = arith.select %259, %242, %211 : vector<8x32xi1>, vector<8x32xf32>
    %c5_i32 = arith.constant 5 : i32
    %c7_i32_72 = arith.constant 7 : i32
    %261 = arith.subi %c7_i32_72, %c5_i32 : i32
    %262 = arith.select %13, %261, %c5_i32 : i32
    %263 = arith.index_cast %262 : i32 to index
    %c0_73 = arith.constant 0 : index
    %c0_74 = arith.constant 0 : index
    %264 = vector.load %arg7[%263, %c0_73, %c0_74] : memref<8x8x128xf32, #tpu.memory_space<vmem>>, vector<1x8x128xf32>
    %265 = vector.shape_cast %264 : vector<1x8x128xf32> to vector<8x128xf32>
    %266 = arith.truncf %257 : vector<8x32xf32> to vector<8x32xbf16>
    %cst_75 = arith.constant dense<0.000000e+00> : vector<8x128xf32>
    %267 = tpu.matmul %266, %11, %cst_75 {dimension_numbers = #tpu.dot_dimension_numbers<[1], [0], [0], [1], [0, 0, 1, 1], [], []>} : vector<8x32xbf16>, vector<32x128xbf16>, vector<8x128xf32> -> vector<8x128xf32>
    %268 = arith.addf %265, %267 : vector<8x128xf32>
    %269 = vector.extract_strided_slice %268 {offsets = [0, 0], sizes = [8, 32], strides = [1, 1]} : vector<8x128xf32> to vector<8x32xf32>
    %270 = arith.negf %269 : vector<8x32xf32>
    %271 = math.exp %270 : vector<8x32xf32>
    %cst_76 = arith.constant 1.000000e+00 : f32
    %272 = vector.broadcast %cst_76 : f32 to vector<8x32xf32>
    %273 = arith.addf %272, %271 : vector<8x32xf32>
    %274 = arith.divf %272, %273 : vector<8x32xf32>
    %275 = vector.extract_strided_slice %268 {offsets = [0, 32], sizes = [8, 32], strides = [1, 1]} : vector<8x128xf32> to vector<8x32xf32>
    %276 = arith.negf %275 : vector<8x32xf32>
    %277 = math.exp %276 : vector<8x32xf32>
    %cst_77 = arith.constant 1.000000e+00 : f32
    %278 = vector.broadcast %cst_77 : f32 to vector<8x32xf32>
    %279 = arith.addf %278, %277 : vector<8x32xf32>
    %280 = arith.divf %278, %279 : vector<8x32xf32>
    %281 = vector.extract_strided_slice %268 {offsets = [0, 64], sizes = [8, 32], strides = [1, 1]} : vector<8x128xf32> to vector<8x32xf32>
    %282 = math.tanh %281 : vector<8x32xf32>
    %283 = vector.extract_strided_slice %268 {offsets = [0, 96], sizes = [8, 32], strides = [1, 1]} : vector<8x128xf32> to vector<8x32xf32>
    %284 = arith.negf %283 : vector<8x32xf32>
    %285 = math.exp %284 : vector<8x32xf32>
    %cst_78 = arith.constant 1.000000e+00 : f32
    %286 = vector.broadcast %cst_78 : f32 to vector<8x32xf32>
    %287 = arith.addf %286, %285 : vector<8x32xf32>
    %288 = arith.divf %286, %287 : vector<8x32xf32>
    %289 = arith.mulf %280, %260 : vector<8x32xf32>
    %290 = arith.mulf %274, %282 : vector<8x32xf32>
    %291 = arith.addf %289, %290 : vector<8x32xf32>
    %292 = math.tanh %291 : vector<8x32xf32>
    %293 = arith.mulf %288, %292 : vector<8x32xf32>
    %294 = vector.broadcast %262 : i32 to vector<8x1xi32>
    %295 = arith.cmpi sgt, %12, %294 : vector<8x1xi32>
    %cst_79 = arith.constant 0.000000e+00 : f32
    %296 = vector.shape_cast %295 : vector<8x1xi1> to vector<8x1xi1>
    %297 = vector.broadcast %296 : vector<8x1xi1> to vector<8x32xi1>
    %298 = vector.broadcast %cst_79 : f32 to vector<8x32xf32>
    %299 = arith.select %297, %293, %298 : vector<8x32xi1>, vector<8x32xf32>
    %c0_80 = arith.constant 0 : index
    %300 = arith.index_cast %262 : i32 to index
    %c0_81 = arith.constant 0 : index
    %c0_82 = arith.constant 0 : index
    %301 = vector.load %arg6[%c0_80, %300, %c0_81, %c0_82] : memref<1x8x8x32xf32, #tpu.memory_space<vmem>>, vector<1x1x8x32xf32>
    %302 = vector.shape_cast %301 : vector<1x1x8x32xf32> to vector<8x32xf32>
    %303 = vector.shape_cast %299 : vector<8x32xf32> to vector<1x1x8x32xf32>
    tpu.vector_store %arg6[%c0_80, %300, %c0_81, %c0_82], %303 {strides = array<i32>} : memref<1x8x8x32xf32, #tpu.memory_space<vmem>>, vector<1x1x8x32xf32>,
    %304 = vector.shape_cast %295 : vector<8x1xi1> to vector<8x1xi1>
    %305 = vector.broadcast %304 : vector<8x1xi1> to vector<8x32xi1>
    %306 = arith.select %305, %293, %257 : vector<8x32xi1>, vector<8x32xf32>
    %307 = vector.shape_cast %295 : vector<8x1xi1> to vector<8x1xi1>
    %308 = vector.broadcast %307 : vector<8x1xi1> to vector<8x32xi1>
    %309 = arith.select %308, %291, %260 : vector<8x32xi1>, vector<8x32xf32>
    %c6_i32 = arith.constant 6 : i32
    %c7_i32_83 = arith.constant 7 : i32
    %310 = arith.subi %c7_i32_83, %c6_i32 : i32
    %311 = arith.select %13, %310, %c6_i32 : i32
    %312 = arith.index_cast %311 : i32 to index
    %c0_84 = arith.constant 0 : index
    %c0_85 = arith.constant 0 : index
    %313 = vector.load %arg7[%312, %c0_84, %c0_85] : memref<8x8x128xf32, #tpu.memory_space<vmem>>, vector<1x8x128xf32>
    %314 = vector.shape_cast %313 : vector<1x8x128xf32> to vector<8x128xf32>
    %315 = arith.truncf %306 : vector<8x32xf32> to vector<8x32xbf16>
    %cst_86 = arith.constant dense<0.000000e+00> : vector<8x128xf32>
    %316 = tpu.matmul %315, %11, %cst_86 {dimension_numbers = #tpu.dot_dimension_numbers<[1], [0], [0], [1], [0, 0, 1, 1], [], []>} : vector<8x32xbf16>, vector<32x128xbf16>, vector<8x128xf32> -> vector<8x128xf32>
    %317 = arith.addf %314, %316 : vector<8x128xf32>
    %318 = vector.extract_strided_slice %317 {offsets = [0, 0], sizes = [8, 32], strides = [1, 1]} : vector<8x128xf32> to vector<8x32xf32>
    %319 = arith.negf %318 : vector<8x32xf32>
    %320 = math.exp %319 : vector<8x32xf32>
    %cst_87 = arith.constant 1.000000e+00 : f32
    %321 = vector.broadcast %cst_87 : f32 to vector<8x32xf32>
    %322 = arith.addf %321, %320 : vector<8x32xf32>
    %323 = arith.divf %321, %322 : vector<8x32xf32>
    %324 = vector.extract_strided_slice %317 {offsets = [0, 32], sizes = [8, 32], strides = [1, 1]} : vector<8x128xf32> to vector<8x32xf32>
    %325 = arith.negf %324 : vector<8x32xf32>
    %326 = math.exp %325 : vector<8x32xf32>
    %cst_88 = arith.constant 1.000000e+00 : f32
    %327 = vector.broadcast %cst_88 : f32 to vector<8x32xf32>
    %328 = arith.addf %327, %326 : vector<8x32xf32>
    %329 = arith.divf %327, %328 : vector<8x32xf32>
    %330 = vector.extract_strided_slice %317 {offsets = [0, 64], sizes = [8, 32], strides = [1, 1]} : vector<8x128xf32> to vector<8x32xf32>
    %331 = math.tanh %330 : vector<8x32xf32>
    %332 = vector.extract_strided_slice %317 {offsets = [0, 96], sizes = [8, 32], strides = [1, 1]} : vector<8x128xf32> to vector<8x32xf32>
    %333 = arith.negf %332 : vector<8x32xf32>
    %334 = math.exp %333 : vector<8x32xf32>
    %cst_89 = arith.constant 1.000000e+00 : f32
    %335 = vector.broadcast %cst_89 : f32 to vector<8x32xf32>
    %336 = arith.addf %335, %334 : vector<8x32xf32>
    %337 = arith.divf %335, %336 : vector<8x32xf32>
    %338 = arith.mulf %329, %309 : vector<8x32xf32>
    %339 = arith.mulf %323, %331 : vector<8x32xf32>
    %340 = arith.addf %338, %339 : vector<8x32xf32>
    %341 = math.tanh %340 : vector<8x32xf32>
    %342 = arith.mulf %337, %341 : vector<8x32xf32>
    %343 = vector.broadcast %311 : i32 to vector<8x1xi32>
    %344 = arith.cmpi sgt, %12, %343 : vector<8x1xi32>
    %cst_90 = arith.constant 0.000000e+00 : f32
    %345 = vector.shape_cast %344 : vector<8x1xi1> to vector<8x1xi1>
    %346 = vector.broadcast %345 : vector<8x1xi1> to vector<8x32xi1>
    %347 = vector.broadcast %cst_90 : f32 to vector<8x32xf32>
    %348 = arith.select %346, %342, %347 : vector<8x32xi1>, vector<8x32xf32>
    %c0_91 = arith.constant 0 : index
    %349 = arith.index_cast %311 : i32 to index
    %c0_92 = arith.constant 0 : index
    %c0_93 = arith.constant 0 : index
    %350 = vector.load %arg6[%c0_91, %349, %c0_92, %c0_93] : memref<1x8x8x32xf32, #tpu.memory_space<vmem>>, vector<1x1x8x32xf32>
    %351 = vector.shape_cast %350 : vector<1x1x8x32xf32> to vector<8x32xf32>
    %352 = vector.shape_cast %348 : vector<8x32xf32> to vector<1x1x8x32xf32>
    tpu.vector_store %arg6[%c0_91, %349, %c0_92, %c0_93], %352 {strides = array<i32>} : memref<1x8x8x32xf32, #tpu.memory_space<vmem>>, vector<1x1x8x32xf32>,
    %353 = vector.shape_cast %344 : vector<8x1xi1> to vector<8x1xi1>
    %354 = vector.broadcast %353 : vector<8x1xi1> to vector<8x32xi1>
    %355 = arith.select %354, %342, %306 : vector<8x32xi1>, vector<8x32xf32>
    %356 = vector.shape_cast %344 : vector<8x1xi1> to vector<8x1xi1>
    %357 = vector.broadcast %356 : vector<8x1xi1> to vector<8x32xi1>
    %358 = arith.select %357, %340, %309 : vector<8x32xi1>, vector<8x32xf32>
    %c7_i32_94 = arith.constant 7 : i32
    %c7_i32_95 = arith.constant 7 : i32
    %359 = arith.subi %c7_i32_95, %c7_i32_94 : i32
    %360 = arith.select %13, %359, %c7_i32_94 : i32
    %361 = arith.index_cast %360 : i32 to index
    %c0_96 = arith.constant 0 : index
    %c0_97 = arith.constant 0 : index
    %362 = vector.load %arg7[%361, %c0_96, %c0_97] : memref<8x8x128xf32, #tpu.memory_space<vmem>>, vector<1x8x128xf32>
    %363 = vector.shape_cast %362 : vector<1x8x128xf32> to vector<8x128xf32>
    %364 = arith.truncf %355 : vector<8x32xf32> to vector<8x32xbf16>
    %cst_98 = arith.constant dense<0.000000e+00> : vector<8x128xf32>
    %365 = tpu.matmul %364, %11, %cst_98 {dimension_numbers = #tpu.dot_dimension_numbers<[1], [0], [0], [1], [0, 0, 1, 1], [], []>} : vector<8x32xbf16>, vector<32x128xbf16>, vector<8x128xf32> -> vector<8x128xf32>
    %366 = arith.addf %363, %365 : vector<8x128xf32>
    %367 = vector.extract_strided_slice %366 {offsets = [0, 0], sizes = [8, 32], strides = [1, 1]} : vector<8x128xf32> to vector<8x32xf32>
    %368 = arith.negf %367 : vector<8x32xf32>
    %369 = math.exp %368 : vector<8x32xf32>
    %cst_99 = arith.constant 1.000000e+00 : f32
    %370 = vector.broadcast %cst_99 : f32 to vector<8x32xf32>
    %371 = arith.addf %370, %369 : vector<8x32xf32>
    %372 = arith.divf %370, %371 : vector<8x32xf32>
    %373 = vector.extract_strided_slice %366 {offsets = [0, 32], sizes = [8, 32], strides = [1, 1]} : vector<8x128xf32> to vector<8x32xf32>
    %374 = arith.negf %373 : vector<8x32xf32>
    %375 = math.exp %374 : vector<8x32xf32>
    %cst_100 = arith.constant 1.000000e+00 : f32
    %376 = vector.broadcast %cst_100 : f32 to vector<8x32xf32>
    %377 = arith.addf %376, %375 : vector<8x32xf32>
    %378 = arith.divf %376, %377 : vector<8x32xf32>
    %379 = vector.extract_strided_slice %366 {offsets = [0, 64], sizes = [8, 32], strides = [1, 1]} : vector<8x128xf32> to vector<8x32xf32>
    %380 = math.tanh %379 : vector<8x32xf32>
    %381 = vector.extract_strided_slice %366 {offsets = [0, 96], sizes = [8, 32], strides = [1, 1]} : vector<8x128xf32> to vector<8x32xf32>
    %382 = arith.negf %381 : vector<8x32xf32>
    %383 = math.exp %382 : vector<8x32xf32>
    %cst_101 = arith.constant 1.000000e+00 : f32
    %384 = vector.broadcast %cst_101 : f32 to vector<8x32xf32>
    %385 = arith.addf %384, %383 : vector<8x32xf32>
    %386 = arith.divf %384, %385 : vector<8x32xf32>
    %387 = arith.mulf %378, %358 : vector<8x32xf32>
    %388 = arith.mulf %372, %380 : vector<8x32xf32>
    %389 = arith.addf %387, %388 : vector<8x32xf32>
    %390 = math.tanh %389 : vector<8x32xf32>
    %391 = arith.mulf %386, %390 : vector<8x32xf32>
    %392 = vector.broadcast %360 : i32 to vector<8x1xi32>
    %393 = arith.cmpi sgt, %12, %392 : vector<8x1xi32>
    %cst_102 = arith.constant 0.000000e+00 : f32
    %394 = vector.shape_cast %393 : vector<8x1xi1> to vector<8x1xi1>
    %395 = vector.broadcast %394 : vector<8x1xi1> to vector<8x32xi1>
    %396 = vector.broadcast %cst_102 : f32 to vector<8x32xf32>
    %397 = arith.select %395, %391, %396 : vector<8x32xi1>, vector<8x32xf32>
    %c0_103 = arith.constant 0 : index
    %398 = arith.index_cast %360 : i32 to index
    %c0_104 = arith.constant 0 : index
    %c0_105 = arith.constant 0 : index
    %399 = vector.load %arg6[%c0_103, %398, %c0_104, %c0_105] : memref<1x8x8x32xf32, #tpu.memory_space<vmem>>, vector<1x1x8x32xf32>
    %400 = vector.shape_cast %399 : vector<1x1x8x32xf32> to vector<8x32xf32>
    %401 = vector.shape_cast %397 : vector<8x32xf32> to vector<1x1x8x32xf32>
    tpu.vector_store %arg6[%c0_103, %398, %c0_104, %c0_105], %401 {strides = array<i32>} : memref<1x8x8x32xf32, #tpu.memory_space<vmem>>, vector<1x1x8x32xf32>,
    %402 = vector.shape_cast %393 : vector<8x1xi1> to vector<8x1xi1>
    %403 = vector.broadcast %402 : vector<8x1xi1> to vector<8x32xi1>
    %404 = arith.select %403, %391, %355 : vector<8x32xi1>, vector<8x32xf32>
    %405 = vector.shape_cast %393 : vector<8x1xi1> to vector<8x1xi1>
    %406 = vector.broadcast %405 : vector<8x1xi1> to vector<8x32xi1>
    %407 = arith.select %406, %389, %358 : vector<8x32xi1>, vector<8x32xf32>
    %c8_i32 = arith.constant 8 : i32
    return
  }
  func.func @transform_0(%arg0: i32) -> (i32, i32) {
    %c0_i32 = arith.constant 0 : i32
    %c0_i32_0 = arith.constant 0 : i32
    %c0_i32_1 = arith.constant 0 : i32
    return %c0_i32, %c0_i32_0 : i32, i32
  }
  func.func @transform_1(%arg0: i32) -> (i32, i32) {
    %c0_i32 = arith.constant 0 : i32
    %c0_i32_0 = arith.constant 0 : i32
    %c0_i32_1 = arith.constant 0 : i32
    return %c0_i32, %c0_i32_0 : i32, i32
  }
  func.func @transform_2(%arg0: i32) -> (i32, i32, i32) {
    %c0_i32 = arith.constant 0 : i32
    %c0_i32_0 = arith.constant 0 : i32
    %c0_i32_1 = arith.constant 0 : i32
    return %arg0, %c0_i32, %c0_i32_0 : i32, i32, i32
  }
  func.func @transform_3(%arg0: i32) -> (i32, i32, i32) {
    %c0_i32 = arith.constant 0 : i32
    %c0_i32_0 = arith.constant 0 : i32
    %c0_i32_1 = arith.constant 0 : i32
    return %arg0, %c0_i32, %c0_i32_0 : i32, i32, i32
  }
  func.func @transform_4(%arg0: i32) -> (i32, i32, i32) {
    %c0_i32 = arith.constant 0 : i32
    %c0_i32_0 = arith.constant 0 : i32
    %c0_i32_1 = arith.constant 0 : i32
    return %arg0, %c0_i32, %c0_i32_0 : i32, i32, i32
  }
  func.func @transform_5(%arg0: i32) -> (i32, i32, i32, i32) {
    %c0_i32 = arith.constant 0 : i32
    %c0_i32_0 = arith.constant 0 : i32
    %c0_i32_1 = arith.constant 0 : i32
    %c0_i32_2 = arith.constant 0 : i32
    return %arg0, %c0_i32, %c0_i32_0, %c0_i32_1 : i32, i32, i32, i32
  }
}

module attributes {stable_mosaic.version = 11 : i64} {
  func.func @_bilstm_layer_kernel(%arg0: i32, %arg1: memref<8x1xi32, #tpu.memory_space<vmem>>, %arg2: memref<64x64xbf16, #tpu.memory_space<vmem>>, %arg3: memref<1x64x128xbf16, #tpu.memory_space<vmem>>, %arg4: memref<1x32x128xbf16, #tpu.memory_space<vmem>>, %arg5: memref<1x1x128xf32, #tpu.memory_space<vmem>>, %arg6: memref<1x8x8x32xf32, #tpu.memory_space<vmem>>, %arg7: memref<8x8x128xf32, #tpu.memory_space<vmem>>) attributes {dimension_semantics = [#tpu.dimension_semantics<parallel>], iteration_bounds = array<i64: 2>, scalar_prefetch = 0 : i64, scratch_operands = 1 : i64, tpu.core_type = #tpu.core_type<tc>, window_params = [{pipeline_mode = #tpu.pipeline_mode<synchronous>, transform_indices = @transform_0, window_bounds = array<i64: 8, 1>}, {pipeline_mode = #tpu.pipeline_mode<synchronous>, transform_indices = @transform_1, window_bounds = array<i64: 64, 64>}, {transform_indices = @transform_2, window_bounds = array<i64: 1, 64, 128>}, {transform_indices = @transform_3, window_bounds = array<i64: 1, 32, 128>}, {transform_indices = @transform_4, window_bounds = array<i64: 1, 1, 128>}, {transform_indices = @transform_5, window_bounds = array<i64: 1, 8, 8, 32>}]} {
    %c0 = arith.constant 0 : index
    %c0_0 = arith.constant 0 : index
    %0 = vector.load %arg2[%c0, %c0_0] : memref<64x64xbf16, #tpu.memory_space<vmem>>, vector<64x64xbf16>
    %c0_1 = arith.constant 0 : index
    %c0_2 = arith.constant 0 : index
    %c0_3 = arith.constant 0 : index
    %1 = vector.load %arg3[%c0_1, %c0_2, %c0_3] : memref<1x64x128xbf16, #tpu.memory_space<vmem>>, vector<1x64x128xbf16>
    %2 = vector.shape_cast %1 : vector<1x64x128xbf16> to vector<64x128xbf16>
    %cst = arith.constant dense<0.000000e+00> : vector<64x128xf32>
    %3 = tpu.matmul %0, %2, %cst {dimension_numbers = #tpu.dot_dimension_numbers<[1], [0], [0], [1], [0, 0, 1, 1], [], []>} : vector<64x64xbf16>, vector<64x128xbf16>, vector<64x128xf32> -> vector<64x128xf32>
    %c0_4 = arith.constant 0 : index
    %c0_5 = arith.constant 0 : index
    %c0_6 = arith.constant 0 : index
    %4 = vector.load %arg5[%c0_4, %c0_5, %c0_6] : memref<1x1x128xf32, #tpu.memory_space<vmem>>, vector<1x1x128xf32>
    %5 = vector.shape_cast %4 : vector<1x1x128xf32> to vector<1x128xf32>
    %6 = vector.broadcast %5 : vector<1x128xf32> to vector<64x128xf32>
    %7 = arith.addf %3, %6 : vector<64x128xf32>
    %8 = vector.shape_cast %7 : vector<64x128xf32> to vector<8x8x128xf32>
    %c0_7 = arith.constant 0 : index
    %c0_8 = arith.constant 0 : index
    %c0_9 = arith.constant 0 : index
    %9 = vector.load %arg7[%c0_7, %c0_8, %c0_9] : memref<8x8x128xf32, #tpu.memory_space<vmem>>, vector<8x8x128xf32>
    tpu.vector_store %arg7[%c0_7, %c0_8, %c0_9], %8 {strides = array<i32>} : memref<8x8x128xf32, #tpu.memory_space<vmem>>, vector<8x8x128xf32>,
    %c0_10 = arith.constant 0 : index
    %c0_11 = arith.constant 0 : index
    %c0_12 = arith.constant 0 : index
    %10 = vector.load %arg4[%c0_10, %c0_11, %c0_12] : memref<1x32x128xbf16, #tpu.memory_space<vmem>>, vector<1x32x128xbf16>
    %11 = vector.shape_cast %10 : vector<1x32x128xbf16> to vector<32x128xbf16>
    %c0_13 = arith.constant 0 : index
    %c0_14 = arith.constant 0 : index
    %12 = vector.load %arg1[%c0_13, %c0_14] : memref<8x1xi32, #tpu.memory_space<vmem>>, vector<8x1xi32>
    %c1_i32 = arith.constant 1 : i32
    %13 = arith.cmpi eq, %arg0, %c1_i32 : i32
    %cst_15 = arith.constant 0.000000e+00 : f32
    %14 = vector.broadcast %cst_15 : f32 to vector<8x32xf32>
    %cst_16 = arith.constant 0.000000e+00 : f32
    %15 = vector.broadcast %cst_16 : f32 to vector<8x32xf32>
    %c0_i32 = arith.constant 0 : i32
    %c7_i32 = arith.constant 7 : i32
    %16 = arith.subi %c7_i32, %c0_i32 : i32
    %17 = arith.select %13, %16, %c0_i32 : i32
    %18 = arith.index_cast %17 : i32 to index
    %c0_17 = arith.constant 0 : index
    %c0_18 = arith.constant 0 : index
    %19 = vector.load %arg7[%18, %c0_17, %c0_18] : memref<8x8x128xf32, #tpu.memory_space<vmem>>, vector<1x8x128xf32>
    %20 = vector.shape_cast %19 : vector<1x8x128xf32> to vector<8x128xf32>
    %21 = arith.truncf %14 : vector<8x32xf32> to vector<8x32xbf16>
    %cst_19 = arith.constant dense<0.000000e+00> : vector<8x128xf32>
    %22 = tpu.matmul %21, %11, %cst_19 {dimension_numbers = #tpu.dot_dimension_numbers<[1], [0], [0], [1], [0, 0, 1, 1], [], []>} : vector<8x32xbf16>, vector<32x128xbf16>, vector<8x128xf32> -> vector<8x128xf32>
    %23 = arith.addf %20, %22 : vector<8x128xf32>
    %24 = vector.extract_strided_slice %23 {offsets = [0, 0], sizes = [8, 32], strides = [1, 1]} : vector<8x128xf32> to vector<8x32xf32>
    %25 = arith.negf %24 : vector<8x32xf32>
    %26 = math.exp %25 : vector<8x32xf32>
    %cst_20 = arith.constant 1.000000e+00 : f32
    %27 = vector.broadcast %cst_20 : f32 to vector<8x32xf32>
    %28 = arith.addf %27, %26 : vector<8x32xf32>
    %29 = arith.divf %27, %28 : vector<8x32xf32>
    %30 = vector.extract_strided_slice %23 {offsets = [0, 32], sizes = [8, 32], strides = [1, 1]} : vector<8x128xf32> to vector<8x32xf32>
    %31 = arith.negf %30 : vector<8x32xf32>
    %32 = math.exp %31 : vector<8x32xf32>
    %cst_21 = arith.constant 1.000000e+00 : f32
    %33 = vector.broadcast %cst_21 : f32 to vector<8x32xf32>
    %34 = arith.addf %33, %32 : vector<8x32xf32>
    %35 = arith.divf %33, %34 : vector<8x32xf32>
    %36 = vector.extract_strided_slice %23 {offsets = [0, 64], sizes = [8, 32], strides = [1, 1]} : vector<8x128xf32> to vector<8x32xf32>
    %37 = math.tanh %36 : vector<8x32xf32>
    %38 = vector.extract_strided_slice %23 {offsets = [0, 96], sizes = [8, 32], strides = [1, 1]} : vector<8x128xf32> to vector<8x32xf32>
    %39 = arith.negf %38 : vector<8x32xf32>
    %40 = math.exp %39 : vector<8x32xf32>
    %cst_22 = arith.constant 1.000000e+00 : f32
    %41 = vector.broadcast %cst_22 : f32 to vector<8x32xf32>
    %42 = arith.addf %41, %40 : vector<8x32xf32>
    %43 = arith.divf %41, %42 : vector<8x32xf32>
    %44 = arith.mulf %35, %15 : vector<8x32xf32>
    %45 = arith.mulf %29, %37 : vector<8x32xf32>
    %46 = arith.addf %44, %45 : vector<8x32xf32>
    %47 = math.tanh %46 : vector<8x32xf32>
    %48 = arith.mulf %43, %47 : vector<8x32xf32>
    %49 = vector.broadcast %17 : i32 to vector<8x1xi32>
    %50 = arith.cmpi sgt, %12, %49 : vector<8x1xi32>
    %cst_23 = arith.constant 0.000000e+00 : f32
    %51 = vector.shape_cast %50 : vector<8x1xi1> to vector<8x1xi1>
    %52 = vector.broadcast %51 : vector<8x1xi1> to vector<8x32xi1>
    %53 = vector.broadcast %cst_23 : f32 to vector<8x32xf32>
    %54 = arith.select %52, %48, %53 : vector<8x32xi1>, vector<8x32xf32>
    %c0_24 = arith.constant 0 : index
    %55 = arith.index_cast %17 : i32 to index
    %c0_25 = arith.constant 0 : index
    %c0_26 = arith.constant 0 : index
    %56 = vector.load %arg6[%c0_24, %55, %c0_25, %c0_26] : memref<1x8x8x32xf32, #tpu.memory_space<vmem>>, vector<1x1x8x32xf32>
    %57 = vector.shape_cast %56 : vector<1x1x8x32xf32> to vector<8x32xf32>
    %58 = vector.shape_cast %54 : vector<8x32xf32> to vector<1x1x8x32xf32>
    tpu.vector_store %arg6[%c0_24, %55, %c0_25, %c0_26], %58 {strides = array<i32>} : memref<1x8x8x32xf32, #tpu.memory_space<vmem>>, vector<1x1x8x32xf32>,
    %59 = vector.shape_cast %50 : vector<8x1xi1> to vector<8x1xi1>
    %60 = vector.broadcast %59 : vector<8x1xi1> to vector<8x32xi1>
    %61 = arith.select %60, %48, %14 : vector<8x32xi1>, vector<8x32xf32>
    %62 = vector.shape_cast %50 : vector<8x1xi1> to vector<8x1xi1>
    %63 = vector.broadcast %62 : vector<8x1xi1> to vector<8x32xi1>
    %64 = arith.select %63, %46, %15 : vector<8x32xi1>, vector<8x32xf32>
    %c1_i32_27 = arith.constant 1 : i32
    %c7_i32_28 = arith.constant 7 : i32
    %65 = arith.subi %c7_i32_28, %c1_i32_27 : i32
    %66 = arith.select %13, %65, %c1_i32_27 : i32
    %67 = arith.index_cast %66 : i32 to index
    %c0_29 = arith.constant 0 : index
    %c0_30 = arith.constant 0 : index
    %68 = vector.load %arg7[%67, %c0_29, %c0_30] : memref<8x8x128xf32, #tpu.memory_space<vmem>>, vector<1x8x128xf32>
    %69 = vector.shape_cast %68 : vector<1x8x128xf32> to vector<8x128xf32>
    %70 = arith.truncf %61 : vector<8x32xf32> to vector<8x32xbf16>
    %cst_31 = arith.constant dense<0.000000e+00> : vector<8x128xf32>
    %71 = tpu.matmul %70, %11, %cst_31 {dimension_numbers = #tpu.dot_dimension_numbers<[1], [0], [0], [1], [0, 0, 1, 1], [], []>} : vector<8x32xbf16>, vector<32x128xbf16>, vector<8x128xf32> -> vector<8x128xf32>
    %72 = arith.addf %69, %71 : vector<8x128xf32>
    %73 = vector.extract_strided_slice %72 {offsets = [0, 0], sizes = [8, 32], strides = [1, 1]} : vector<8x128xf32> to vector<8x32xf32>
    %74 = arith.negf %73 : vector<8x32xf32>
    %75 = math.exp %74 : vector<8x32xf32>
    %cst_32 = arith.constant 1.000000e+00 : f32
    %76 = vector.broadcast %cst_32 : f32 to vector<8x32xf32>
    %77 = arith.addf %76, %75 : vector<8x32xf32>
    %78 = arith.divf %76, %77 : vector<8x32xf32>
    %79 = vector.extract_strided_slice %72 {offsets = [0, 32], sizes = [8, 32], strides = [1, 1]} : vector<8x128xf32> to vector<8x32xf32>
    %80 = arith.negf %79 : vector<8x32xf32>
    %81 = math.exp %80 : vector<8x32xf32>
    %cst_33 = arith.constant 1.000000e+00 : f32
    %82 = vector.broadcast %cst_33 : f32 to vector<8x32xf32>
    %83 = arith.addf %82, %81 : vector<8x32xf32>
    %84 = arith.divf %82, %83 : vector<8x32xf32>
    %85 = vector.extract_strided_slice %72 {offsets = [0, 64], sizes = [8, 32], strides = [1, 1]} : vector<8x128xf32> to vector<8x32xf32>
    %86 = math.tanh %85 : vector<8x32xf32>
    %87 = vector.extract_strided_slice %72 {offsets = [0, 96], sizes = [8, 32], strides = [1, 1]} : vector<8x128xf32> to vector<8x32xf32>
    %88 = arith.negf %87 : vector<8x32xf32>
    %89 = math.exp %88 : vector<8x32xf32>
    %cst_34 = arith.constant 1.000000e+00 : f32
    %90 = vector.broadcast %cst_34 : f32 to vector<8x32xf32>
    %91 = arith.addf %90, %89 : vector<8x32xf32>
    %92 = arith.divf %90, %91 : vector<8x32xf32>
    %93 = arith.mulf %84, %64 : vector<8x32xf32>
    %94 = arith.mulf %78, %86 : vector<8x32xf32>
    %95 = arith.addf %93, %94 : vector<8x32xf32>
    %96 = math.tanh %95 : vector<8x32xf32>
    %97 = arith.mulf %92, %96 : vector<8x32xf32>
    %98 = vector.broadcast %66 : i32 to vector<8x1xi32>
    %99 = arith.cmpi sgt, %12, %98 : vector<8x1xi32>
    %cst_35 = arith.constant 0.000000e+00 : f32
    %100 = vector.shape_cast %99 : vector<8x1xi1> to vector<8x1xi1>
    %101 = vector.broadcast %100 : vector<8x1xi1> to vector<8x32xi1>
    %102 = vector.broadcast %cst_35 : f32 to vector<8x32xf32>
    %103 = arith.select %101, %97, %102 : vector<8x32xi1>, vector<8x32xf32>
    %c0_36 = arith.constant 0 : index
    %104 = arith.index_cast %66 : i32 to index
    %c0_37 = arith.constant 0 : index
    %c0_38 = arith.constant 0 : index
    %105 = vector.load %arg6[%c0_36, %104, %c0_37, %c0_38] : memref<1x8x8x32xf32, #tpu.memory_space<vmem>>, vector<1x1x8x32xf32>
    %106 = vector.shape_cast %105 : vector<1x1x8x32xf32> to vector<8x32xf32>
    %107 = vector.shape_cast %103 : vector<8x32xf32> to vector<1x1x8x32xf32>
    tpu.vector_store %arg6[%c0_36, %104, %c0_37, %c0_38], %107 {strides = array<i32>} : memref<1x8x8x32xf32, #tpu.memory_space<vmem>>, vector<1x1x8x32xf32>,
    %108 = vector.shape_cast %99 : vector<8x1xi1> to vector<8x1xi1>
    %109 = vector.broadcast %108 : vector<8x1xi1> to vector<8x32xi1>
    %110 = arith.select %109, %97, %61 : vector<8x32xi1>, vector<8x32xf32>
    %111 = vector.shape_cast %99 : vector<8x1xi1> to vector<8x1xi1>
    %112 = vector.broadcast %111 : vector<8x1xi1> to vector<8x32xi1>
    %113 = arith.select %112, %95, %64 : vector<8x32xi1>, vector<8x32xf32>
    %c2_i32 = arith.constant 2 : i32
    %c7_i32_39 = arith.constant 7 : i32
    %114 = arith.subi %c7_i32_39, %c2_i32 : i32
    %115 = arith.select %13, %114, %c2_i32 : i32
    %116 = arith.index_cast %115 : i32 to index
    %c0_40 = arith.constant 0 : index
    %c0_41 = arith.constant 0 : index
    %117 = vector.load %arg7[%116, %c0_40, %c0_41] : memref<8x8x128xf32, #tpu.memory_space<vmem>>, vector<1x8x128xf32>
    %118 = vector.shape_cast %117 : vector<1x8x128xf32> to vector<8x128xf32>
    %119 = arith.truncf %110 : vector<8x32xf32> to vector<8x32xbf16>
    %cst_42 = arith.constant dense<0.000000e+00> : vector<8x128xf32>
    %120 = tpu.matmul %119, %11, %cst_42 {dimension_numbers = #tpu.dot_dimension_numbers<[1], [0], [0], [1], [0, 0, 1, 1], [], []>} : vector<8x32xbf16>, vector<32x128xbf16>, vector<8x128xf32> -> vector<8x128xf32>
    %121 = arith.addf %118, %120 : vector<8x128xf32>
    %122 = vector.extract_strided_slice %121 {offsets = [0, 0], sizes = [8, 32], strides = [1, 1]} : vector<8x128xf32> to vector<8x32xf32>
    %123 = arith.negf %122 : vector<8x32xf32>
    %124 = math.exp %123 : vector<8x32xf32>
    %cst_43 = arith.constant 1.000000e+00 : f32
    %125 = vector.broadcast %cst_43 : f32 to vector<8x32xf32>
    %126 = arith.addf %125, %124 : vector<8x32xf32>
    %127 = arith.divf %125, %126 : vector<8x32xf32>
    %128 = vector.extract_strided_slice %121 {offsets = [0, 32], sizes = [8, 32], strides = [1, 1]} : vector<8x128xf32> to vector<8x32xf32>
    %129 = arith.negf %128 : vector<8x32xf32>
    %130 = math.exp %129 : vector<8x32xf32>
    %cst_44 = arith.constant 1.000000e+00 : f32
    %131 = vector.broadcast %cst_44 : f32 to vector<8x32xf32>
    %132 = arith.addf %131, %130 : vector<8x32xf32>
    %133 = arith.divf %131, %132 : vector<8x32xf32>
    %134 = vector.extract_strided_slice %121 {offsets = [0, 64], sizes = [8, 32], strides = [1, 1]} : vector<8x128xf32> to vector<8x32xf32>
    %135 = math.tanh %134 : vector<8x32xf32>
    %136 = vector.extract_strided_slice %121 {offsets = [0, 96], sizes = [8, 32], strides = [1, 1]} : vector<8x128xf32> to vector<8x32xf32>
    %137 = arith.negf %136 : vector<8x32xf32>
    %138 = math.exp %137 : vector<8x32xf32>
    %cst_45 = arith.constant 1.000000e+00 : f32
    %139 = vector.broadcast %cst_45 : f32 to vector<8x32xf32>
    %140 = arith.addf %139, %138 : vector<8x32xf32>
    %141 = arith.divf %139, %140 : vector<8x32xf32>
    %142 = arith.mulf %133, %113 : vector<8x32xf32>
    %143 = arith.mulf %127, %135 : vector<8x32xf32>
    %144 = arith.addf %142, %143 : vector<8x32xf32>
    %145 = math.tanh %144 : vector<8x32xf32>
    %146 = arith.mulf %141, %145 : vector<8x32xf32>
    %147 = vector.broadcast %115 : i32 to vector<8x1xi32>
    %148 = arith.cmpi sgt, %12, %147 : vector<8x1xi32>
    %cst_46 = arith.constant 0.000000e+00 : f32
    %149 = vector.shape_cast %148 : vector<8x1xi1> to vector<8x1xi1>
    %150 = vector.broadcast %149 : vector<8x1xi1> to vector<8x32xi1>
    %151 = vector.broadcast %cst_46 : f32 to vector<8x32xf32>
    %152 = arith.select %150, %146, %151 : vector<8x32xi1>, vector<8x32xf32>
    %c0_47 = arith.constant 0 : index
    %153 = arith.index_cast %115 : i32 to index
    %c0_48 = arith.constant 0 : index
    %c0_49 = arith.constant 0 : index
    %154 = vector.load %arg6[%c0_47, %153, %c0_48, %c0_49] : memref<1x8x8x32xf32, #tpu.memory_space<vmem>>, vector<1x1x8x32xf32>
    %155 = vector.shape_cast %154 : vector<1x1x8x32xf32> to vector<8x32xf32>
    %156 = vector.shape_cast %152 : vector<8x32xf32> to vector<1x1x8x32xf32>
    tpu.vector_store %arg6[%c0_47, %153, %c0_48, %c0_49], %156 {strides = array<i32>} : memref<1x8x8x32xf32, #tpu.memory_space<vmem>>, vector<1x1x8x32xf32>,
    %157 = vector.shape_cast %148 : vector<8x1xi1> to vector<8x1xi1>
    %158 = vector.broadcast %157 : vector<8x1xi1> to vector<8x32xi1>
    %159 = arith.select %158, %146, %110 : vector<8x32xi1>, vector<8x32xf32>
    %160 = vector.shape_cast %148 : vector<8x1xi1> to vector<8x1xi1>
    %161 = vector.broadcast %160 : vector<8x1xi1> to vector<8x32xi1>
    %162 = arith.select %161, %144, %113 : vector<8x32xi1>, vector<8x32xf32>
    %c3_i32 = arith.constant 3 : i32
    %c7_i32_50 = arith.constant 7 : i32
    %163 = arith.subi %c7_i32_50, %c3_i32 : i32
    %164 = arith.select %13, %163, %c3_i32 : i32
    %165 = arith.index_cast %164 : i32 to index
    %c0_51 = arith.constant 0 : index
    %c0_52 = arith.constant 0 : index
    %166 = vector.load %arg7[%165, %c0_51, %c0_52] : memref<8x8x128xf32, #tpu.memory_space<vmem>>, vector<1x8x128xf32>
    %167 = vector.shape_cast %166 : vector<1x8x128xf32> to vector<8x128xf32>
    %168 = arith.truncf %159 : vector<8x32xf32> to vector<8x32xbf16>
    %cst_53 = arith.constant dense<0.000000e+00> : vector<8x128xf32>
    %169 = tpu.matmul %168, %11, %cst_53 {dimension_numbers = #tpu.dot_dimension_numbers<[1], [0], [0], [1], [0, 0, 1, 1], [], []>} : vector<8x32xbf16>, vector<32x128xbf16>, vector<8x128xf32> -> vector<8x128xf32>
    %170 = arith.addf %167, %169 : vector<8x128xf32>
    %171 = vector.extract_strided_slice %170 {offsets = [0, 0], sizes = [8, 32], strides = [1, 1]} : vector<8x128xf32> to vector<8x32xf32>
    %172 = arith.negf %171 : vector<8x32xf32>
    %173 = math.exp %172 : vector<8x32xf32>
    %cst_54 = arith.constant 1.000000e+00 : f32
    %174 = vector.broadcast %cst_54 : f32 to vector<8x32xf32>
    %175 = arith.addf %174, %173 : vector<8x32xf32>
    %176 = arith.divf %174, %175 : vector<8x32xf32>
    %177 = vector.extract_strided_slice %170 {offsets = [0, 32], sizes = [8, 32], strides = [1, 1]} : vector<8x128xf32> to vector<8x32xf32>
    %178 = arith.negf %177 : vector<8x32xf32>
    %179 = math.exp %178 : vector<8x32xf32>
    %cst_55 = arith.constant 1.000000e+00 : f32
    %180 = vector.broadcast %cst_55 : f32 to vector<8x32xf32>
    %181 = arith.addf %180, %179 : vector<8x32xf32>
    %182 = arith.divf %180, %181 : vector<8x32xf32>
    %183 = vector.extract_strided_slice %170 {offsets = [0, 64], sizes = [8, 32], strides = [1, 1]} : vector<8x128xf32> to vector<8x32xf32>
    %184 = math.tanh %183 : vector<8x32xf32>
    %185 = vector.extract_strided_slice %170 {offsets = [0, 96], sizes = [8, 32], strides = [1, 1]} : vector<8x128xf32> to vector<8x32xf32>
    %186 = arith.negf %185 : vector<8x32xf32>
    %187 = math.exp %186 : vector<8x32xf32>
    %cst_56 = arith.constant 1.000000e+00 : f32
    %188 = vector.broadcast %cst_56 : f32 to vector<8x32xf32>
    %189 = arith.addf %188, %187 : vector<8x32xf32>
    %190 = arith.divf %188, %189 : vector<8x32xf32>
    %191 = arith.mulf %182, %162 : vector<8x32xf32>
    %192 = arith.mulf %176, %184 : vector<8x32xf32>
    %193 = arith.addf %191, %192 : vector<8x32xf32>
    %194 = math.tanh %193 : vector<8x32xf32>
    %195 = arith.mulf %190, %194 : vector<8x32xf32>
    %196 = vector.broadcast %164 : i32 to vector<8x1xi32>
    %197 = arith.cmpi sgt, %12, %196 : vector<8x1xi32>
    %cst_57 = arith.constant 0.000000e+00 : f32
    %198 = vector.shape_cast %197 : vector<8x1xi1> to vector<8x1xi1>
    %199 = vector.broadcast %198 : vector<8x1xi1> to vector<8x32xi1>
    %200 = vector.broadcast %cst_57 : f32 to vector<8x32xf32>
    %201 = arith.select %199, %195, %200 : vector<8x32xi1>, vector<8x32xf32>
    %c0_58 = arith.constant 0 : index
    %202 = arith.index_cast %164 : i32 to index
    %c0_59 = arith.constant 0 : index
    %c0_60 = arith.constant 0 : index
    %203 = vector.load %arg6[%c0_58, %202, %c0_59, %c0_60] : memref<1x8x8x32xf32, #tpu.memory_space<vmem>>, vector<1x1x8x32xf32>
    %204 = vector.shape_cast %203 : vector<1x1x8x32xf32> to vector<8x32xf32>
    %205 = vector.shape_cast %201 : vector<8x32xf32> to vector<1x1x8x32xf32>
    tpu.vector_store %arg6[%c0_58, %202, %c0_59, %c0_60], %205 {strides = array<i32>} : memref<1x8x8x32xf32, #tpu.memory_space<vmem>>, vector<1x1x8x32xf32>,
    %206 = vector.shape_cast %197 : vector<8x1xi1> to vector<8x1xi1>
    %207 = vector.broadcast %206 : vector<8x1xi1> to vector<8x32xi1>
    %208 = arith.select %207, %195, %159 : vector<8x32xi1>, vector<8x32xf32>
    %209 = vector.shape_cast %197 : vector<8x1xi1> to vector<8x1xi1>
    %210 = vector.broadcast %209 : vector<8x1xi1> to vector<8x32xi1>
    %211 = arith.select %210, %193, %162 : vector<8x32xi1>, vector<8x32xf32>
    %c4_i32 = arith.constant 4 : i32
    %c7_i32_61 = arith.constant 7 : i32
    %212 = arith.subi %c7_i32_61, %c4_i32 : i32
    %213 = arith.select %13, %212, %c4_i32 : i32
    %214 = arith.index_cast %213 : i32 to index
    %c0_62 = arith.constant 0 : index
    %c0_63 = arith.constant 0 : index
    %215 = vector.load %arg7[%214, %c0_62, %c0_63] : memref<8x8x128xf32, #tpu.memory_space<vmem>>, vector<1x8x128xf32>
    %216 = vector.shape_cast %215 : vector<1x8x128xf32> to vector<8x128xf32>
    %217 = arith.truncf %208 : vector<8x32xf32> to vector<8x32xbf16>
    %cst_64 = arith.constant dense<0.000000e+00> : vector<8x128xf32>
    %218 = tpu.matmul %217, %11, %cst_64 {dimension_numbers = #tpu.dot_dimension_numbers<[1], [0], [0], [1], [0, 0, 1, 1], [], []>} : vector<8x32xbf16>, vector<32x128xbf16>, vector<8x128xf32> -> vector<8x128xf32>
    %219 = arith.addf %216, %218 : vector<8x128xf32>
    %220 = vector.extract_strided_slice %219 {offsets = [0, 0], sizes = [8, 32], strides = [1, 1]} : vector<8x128xf32> to vector<8x32xf32>
    %221 = arith.negf %220 : vector<8x32xf32>
    %222 = math.exp %221 : vector<8x32xf32>
    %cst_65 = arith.constant 1.000000e+00 : f32
    %223 = vector.broadcast %cst_65 : f32 to vector<8x32xf32>
    %224 = arith.addf %223, %222 : vector<8x32xf32>
    %225 = arith.divf %223, %224 : vector<8x32xf32>
    %226 = vector.extract_strided_slice %219 {offsets = [0, 32], sizes = [8, 32], strides = [1, 1]} : vector<8x128xf32> to vector<8x32xf32>
    %227 = arith.negf %226 : vector<8x32xf32>
    %228 = math.exp %227 : vector<8x32xf32>
    %cst_66 = arith.constant 1.000000e+00 : f32
    %229 = vector.broadcast %cst_66 : f32 to vector<8x32xf32>
    %230 = arith.addf %229, %228 : vector<8x32xf32>
    %231 = arith.divf %229, %230 : vector<8x32xf32>
    %232 = vector.extract_strided_slice %219 {offsets = [0, 64], sizes = [8, 32], strides = [1, 1]} : vector<8x128xf32> to vector<8x32xf32>
    %233 = math.tanh %232 : vector<8x32xf32>
    %234 = vector.extract_strided_slice %219 {offsets = [0, 96], sizes = [8, 32], strides = [1, 1]} : vector<8x128xf32> to vector<8x32xf32>
    %235 = arith.negf %234 : vector<8x32xf32>
    %236 = math.exp %235 : vector<8x32xf32>
    %cst_67 = arith.constant 1.000000e+00 : f32
    %237 = vector.broadcast %cst_67 : f32 to vector<8x32xf32>
    %238 = arith.addf %237, %236 : vector<8x32xf32>
    %239 = arith.divf %237, %238 : vector<8x32xf32>
    %240 = arith.mulf %231, %211 : vector<8x32xf32>
    %241 = arith.mulf %225, %233 : vector<8x32xf32>
    %242 = arith.addf %240, %241 : vector<8x32xf32>
    %243 = math.tanh %242 : vector<8x32xf32>
    %244 = arith.mulf %239, %243 : vector<8x32xf32>
    %245 = vector.broadcast %213 : i32 to vector<8x1xi32>
    %246 = arith.cmpi sgt, %12, %245 : vector<8x1xi32>
    %cst_68 = arith.constant 0.000000e+00 : f32
    %247 = vector.shape_cast %246 : vector<8x1xi1> to vector<8x1xi1>
    %248 = vector.broadcast %247 : vector<8x1xi1> to vector<8x32xi1>
    %249 = vector.broadcast %cst_68 : f32 to vector<8x32xf32>
    %250 = arith.select %248, %244, %249 : vector<8x32xi1>, vector<8x32xf32>
    %c0_69 = arith.constant 0 : index
    %251 = arith.index_cast %213 : i32 to index
    %c0_70 = arith.constant 0 : index
    %c0_71 = arith.constant 0 : index
    %252 = vector.load %arg6[%c0_69, %251, %c0_70, %c0_71] : memref<1x8x8x32xf32, #tpu.memory_space<vmem>>, vector<1x1x8x32xf32>
    %253 = vector.shape_cast %252 : vector<1x1x8x32xf32> to vector<8x32xf32>
    %254 = vector.shape_cast %250 : vector<8x32xf32> to vector<1x1x8x32xf32>
    tpu.vector_store %arg6[%c0_69, %251, %c0_70, %c0_71], %254 {strides = array<i32>} : memref<1x8x8x32xf32, #tpu.memory_space<vmem>>, vector<1x1x8x32xf32>,
    %255 = vector.shape_cast %246 : vector<8x1xi1> to vector<8x1xi1>
    %256 = vector.broadcast %255 : vector<8x1xi1> to vector<8x32xi1>
    %257 = arith.select %256, %244, %208 : vector<8x32xi1>, vector<8x32xf32>
    %258 = vector.shape_cast %246 : vector<8x1xi1> to vector<8x1xi1>
    %259 = vector.broadcast %258 : vector<8x1xi1> to vector<8x32xi1>
    %260 = arith.select %259, %242, %211 : vector<8x32xi1>, vector<8x32xf32>
    %c5_i32 = arith.constant 5 : i32
    %c7_i32_72 = arith.constant 7 : i32
    %261 = arith.subi %c7_i32_72, %c5_i32 : i32
    %262 = arith.select %13, %261, %c5_i32 : i32
    %263 = arith.index_cast %262 : i32 to index
    %c0_73 = arith.constant 0 : index
    %c0_74 = arith.constant 0 : index
    %264 = vector.load %arg7[%263, %c0_73, %c0_74] : memref<8x8x128xf32, #tpu.memory_space<vmem>>, vector<1x8x128xf32>
    %265 = vector.shape_cast %264 : vector<1x8x128xf32> to vector<8x128xf32>
    %266 = arith.truncf %257 : vector<8x32xf32> to vector<8x32xbf16>
    %cst_75 = arith.constant dense<0.000000e+00> : vector<8x128xf32>
    %267 = tpu.matmul %266, %11, %cst_75 {dimension_numbers = #tpu.dot_dimension_numbers<[1], [0], [0], [1], [0, 0, 1, 1], [], []>} : vector<8x32xbf16>, vector<32x128xbf16>, vector<8x128xf32> -> vector<8x128xf32>
    %268 = arith.addf %265, %267 : vector<8x128xf32>
    %269 = vector.extract_strided_slice %268 {offsets = [0, 0], sizes = [8, 32], strides = [1, 1]} : vector<8x128xf32> to vector<8x32xf32>
    %270 = arith.negf %269 : vector<8x32xf32>
    %271 = math.exp %270 : vector<8x32xf32>
    %cst_76 = arith.constant 1.000000e+00 : f32
    %272 = vector.broadcast %cst_76 : f32 to vector<8x32xf32>
    %273 = arith.addf %272, %271 : vector<8x32xf32>
    %274 = arith.divf %272, %273 : vector<8x32xf32>
    %275 = vector.extract_strided_slice %268 {offsets = [0, 32], sizes = [8, 32], strides = [1, 1]} : vector<8x128xf32> to vector<8x32xf32>
    %276 = arith.negf %275 : vector<8x32xf32>
    %277 = math.exp %276 : vector<8x32xf32>
    %cst_77 = arith.constant 1.000000e+00 : f32
    %278 = vector.broadcast %cst_77 : f32 to vector<8x32xf32>
    %279 = arith.addf %278, %277 : vector<8x32xf32>
    %280 = arith.divf %278, %279 : vector<8x32xf32>
    %281 = vector.extract_strided_slice %268 {offsets = [0, 64], sizes = [8, 32], strides = [1, 1]} : vector<8x128xf32> to vector<8x32xf32>
    %282 = math.tanh %281 : vector<8x32xf32>
    %283 = vector.extract_strided_slice %268 {offsets = [0, 96], sizes = [8, 32], strides = [1, 1]} : vector<8x128xf32> to vector<8x32xf32>
    %284 = arith.negf %283 : vector<8x32xf32>
    %285 = math.exp %284 : vector<8x32xf32>
    %cst_78 = arith.constant 1.000000e+00 : f32
    %286 = vector.broadcast %cst_78 : f32 to vector<8x32xf32>
    %287 = arith.addf %286, %285 : vector<8x32xf32>
    %288 = arith.divf %286, %287 : vector<8x32xf32>
    %289 = arith.mulf %280, %260 : vector<8x32xf32>
    %290 = arith.mulf %274, %282 : vector<8x32xf32>
    %291 = arith.addf %289, %290 : vector<8x32xf32>
    %292 = math.tanh %291 : vector<8x32xf32>
    %293 = arith.mulf %288, %292 : vector<8x32xf32>
    %294 = vector.broadcast %262 : i32 to vector<8x1xi32>
    %295 = arith.cmpi sgt, %12, %294 : vector<8x1xi32>
    %cst_79 = arith.constant 0.000000e+00 : f32
    %296 = vector.shape_cast %295 : vector<8x1xi1> to vector<8x1xi1>
    %297 = vector.broadcast %296 : vector<8x1xi1> to vector<8x32xi1>
    %298 = vector.broadcast %cst_79 : f32 to vector<8x32xf32>
    %299 = arith.select %297, %293, %298 : vector<8x32xi1>, vector<8x32xf32>
    %c0_80 = arith.constant 0 : index
    %300 = arith.index_cast %262 : i32 to index
    %c0_81 = arith.constant 0 : index
    %c0_82 = arith.constant 0 : index
    %301 = vector.load %arg6[%c0_80, %300, %c0_81, %c0_82] : memref<1x8x8x32xf32, #tpu.memory_space<vmem>>, vector<1x1x8x32xf32>
    %302 = vector.shape_cast %301 : vector<1x1x8x32xf32> to vector<8x32xf32>
    %303 = vector.shape_cast %299 : vector<8x32xf32> to vector<1x1x8x32xf32>
    tpu.vector_store %arg6[%c0_80, %300, %c0_81, %c0_82], %303 {strides = array<i32>} : memref<1x8x8x32xf32, #tpu.memory_space<vmem>>, vector<1x1x8x32xf32>,
    %304 = vector.shape_cast %295 : vector<8x1xi1> to vector<8x1xi1>
    %305 = vector.broadcast %304 : vector<8x1xi1> to vector<8x32xi1>
    %306 = arith.select %305, %293, %257 : vector<8x32xi1>, vector<8x32xf32>
    %307 = vector.shape_cast %295 : vector<8x1xi1> to vector<8x1xi1>
    %308 = vector.broadcast %307 : vector<8x1xi1> to vector<8x32xi1>
    %309 = arith.select %308, %291, %260 : vector<8x32xi1>, vector<8x32xf32>
    %c6_i32 = arith.constant 6 : i32
    %c7_i32_83 = arith.constant 7 : i32
    %310 = arith.subi %c7_i32_83, %c6_i32 : i32
    %311 = arith.select %13, %310, %c6_i32 : i32
    %312 = arith.index_cast %311 : i32 to index
    %c0_84 = arith.constant 0 : index
    %c0_85 = arith.constant 0 : index
    %313 = vector.load %arg7[%312, %c0_84, %c0_85] : memref<8x8x128xf32, #tpu.memory_space<vmem>>, vector<1x8x128xf32>
    %314 = vector.shape_cast %313 : vector<1x8x128xf32> to vector<8x128xf32>
    %315 = arith.truncf %306 : vector<8x32xf32> to vector<8x32xbf16>
    %cst_86 = arith.constant dense<0.000000e+00> : vector<8x128xf32>
    %316 = tpu.matmul %315, %11, %cst_86 {dimension_numbers = #tpu.dot_dimension_numbers<[1], [0], [0], [1], [0, 0, 1, 1], [], []>} : vector<8x32xbf16>, vector<32x128xbf16>, vector<8x128xf32> -> vector<8x128xf32>
    %317 = arith.addf %314, %316 : vector<8x128xf32>
    %318 = vector.extract_strided_slice %317 {offsets = [0, 0], sizes = [8, 32], strides = [1, 1]} : vector<8x128xf32> to vector<8x32xf32>
    %319 = arith.negf %318 : vector<8x32xf32>
    %320 = math.exp %319 : vector<8x32xf32>
    %cst_87 = arith.constant 1.000000e+00 : f32
    %321 = vector.broadcast %cst_87 : f32 to vector<8x32xf32>
    %322 = arith.addf %321, %320 : vector<8x32xf32>
    %323 = arith.divf %321, %322 : vector<8x32xf32>
    %324 = vector.extract_strided_slice %317 {offsets = [0, 32], sizes = [8, 32], strides = [1, 1]} : vector<8x128xf32> to vector<8x32xf32>
    %325 = arith.negf %324 : vector<8x32xf32>
    %326 = math.exp %325 : vector<8x32xf32>
    %cst_88 = arith.constant 1.000000e+00 : f32
    %327 = vector.broadcast %cst_88 : f32 to vector<8x32xf32>
    %328 = arith.addf %327, %326 : vector<8x32xf32>
    %329 = arith.divf %327, %328 : vector<8x32xf32>
    %330 = vector.extract_strided_slice %317 {offsets = [0, 64], sizes = [8, 32], strides = [1, 1]} : vector<8x128xf32> to vector<8x32xf32>
    %331 = math.tanh %330 : vector<8x32xf32>
    %332 = vector.extract_strided_slice %317 {offsets = [0, 96], sizes = [8, 32], strides = [1, 1]} : vector<8x128xf32> to vector<8x32xf32>
    %333 = arith.negf %332 : vector<8x32xf32>
    %334 = math.exp %333 : vector<8x32xf32>
    %cst_89 = arith.constant 1.000000e+00 : f32
    %335 = vector.broadcast %cst_89 : f32 to vector<8x32xf32>
    %336 = arith.addf %335, %334 : vector<8x32xf32>
    %337 = arith.divf %335, %336 : vector<8x32xf32>
    %338 = arith.mulf %329, %309 : vector<8x32xf32>
    %339 = arith.mulf %323, %331 : vector<8x32xf32>
    %340 = arith.addf %338, %339 : vector<8x32xf32>
    %341 = math.tanh %340 : vector<8x32xf32>
    %342 = arith.mulf %337, %341 : vector<8x32xf32>
    %343 = vector.broadcast %311 : i32 to vector<8x1xi32>
    %344 = arith.cmpi sgt, %12, %343 : vector<8x1xi32>
    %cst_90 = arith.constant 0.000000e+00 : f32
    %345 = vector.shape_cast %344 : vector<8x1xi1> to vector<8x1xi1>
    %346 = vector.broadcast %345 : vector<8x1xi1> to vector<8x32xi1>
    %347 = vector.broadcast %cst_90 : f32 to vector<8x32xf32>
    %348 = arith.select %346, %342, %347 : vector<8x32xi1>, vector<8x32xf32>
    %c0_91 = arith.constant 0 : index
    %349 = arith.index_cast %311 : i32 to index
    %c0_92 = arith.constant 0 : index
    %c0_93 = arith.constant 0 : index
    %350 = vector.load %arg6[%c0_91, %349, %c0_92, %c0_93] : memref<1x8x8x32xf32, #tpu.memory_space<vmem>>, vector<1x1x8x32xf32>
    %351 = vector.shape_cast %350 : vector<1x1x8x32xf32> to vector<8x32xf32>
    %352 = vector.shape_cast %348 : vector<8x32xf32> to vector<1x1x8x32xf32>
    tpu.vector_store %arg6[%c0_91, %349, %c0_92, %c0_93], %352 {strides = array<i32>} : memref<1x8x8x32xf32, #tpu.memory_space<vmem>>, vector<1x1x8x32xf32>,
    %353 = vector.shape_cast %344 : vector<8x1xi1> to vector<8x1xi1>
    %354 = vector.broadcast %353 : vector<8x1xi1> to vector<8x32xi1>
    %355 = arith.select %354, %342, %306 : vector<8x32xi1>, vector<8x32xf32>
    %356 = vector.shape_cast %344 : vector<8x1xi1> to vector<8x1xi1>
    %357 = vector.broadcast %356 : vector<8x1xi1> to vector<8x32xi1>
    %358 = arith.select %357, %340, %309 : vector<8x32xi1>, vector<8x32xf32>
    %c7_i32_94 = arith.constant 7 : i32
    %c7_i32_95 = arith.constant 7 : i32
    %359 = arith.subi %c7_i32_95, %c7_i32_94 : i32
    %360 = arith.select %13, %359, %c7_i32_94 : i32
    %361 = arith.index_cast %360 : i32 to index
    %c0_96 = arith.constant 0 : index
    %c0_97 = arith.constant 0 : index
    %362 = vector.load %arg7[%361, %c0_96, %c0_97] : memref<8x8x128xf32, #tpu.memory_space<vmem>>, vector<1x8x128xf32>
    %363 = vector.shape_cast %362 : vector<1x8x128xf32> to vector<8x128xf32>
    %364 = arith.truncf %355 : vector<8x32xf32> to vector<8x32xbf16>
    %cst_98 = arith.constant dense<0.000000e+00> : vector<8x128xf32>
    %365 = tpu.matmul %364, %11, %cst_98 {dimension_numbers = #tpu.dot_dimension_numbers<[1], [0], [0], [1], [0, 0, 1, 1], [], []>} : vector<8x32xbf16>, vector<32x128xbf16>, vector<8x128xf32> -> vector<8x128xf32>
    %366 = arith.addf %363, %365 : vector<8x128xf32>
    %367 = vector.extract_strided_slice %366 {offsets = [0, 0], sizes = [8, 32], strides = [1, 1]} : vector<8x128xf32> to vector<8x32xf32>
    %368 = arith.negf %367 : vector<8x32xf32>
    %369 = math.exp %368 : vector<8x32xf32>
    %cst_99 = arith.constant 1.000000e+00 : f32
    %370 = vector.broadcast %cst_99 : f32 to vector<8x32xf32>
    %371 = arith.addf %370, %369 : vector<8x32xf32>
    %372 = arith.divf %370, %371 : vector<8x32xf32>
    %373 = vector.extract_strided_slice %366 {offsets = [0, 32], sizes = [8, 32], strides = [1, 1]} : vector<8x128xf32> to vector<8x32xf32>
    %374 = arith.negf %373 : vector<8x32xf32>
    %375 = math.exp %374 : vector<8x32xf32>
    %cst_100 = arith.constant 1.000000e+00 : f32
    %376 = vector.broadcast %cst_100 : f32 to vector<8x32xf32>
    %377 = arith.addf %376, %375 : vector<8x32xf32>
    %378 = arith.divf %376, %377 : vector<8x32xf32>
    %379 = vector.extract_strided_slice %366 {offsets = [0, 64], sizes = [8, 32], strides = [1, 1]} : vector<8x128xf32> to vector<8x32xf32>
    %380 = math.tanh %379 : vector<8x32xf32>
    %381 = vector.extract_strided_slice %366 {offsets = [0, 96], sizes = [8, 32], strides = [1, 1]} : vector<8x128xf32> to vector<8x32xf32>
    %382 = arith.negf %381 : vector<8x32xf32>
    %383 = math.exp %382 : vector<8x32xf32>
    %cst_101 = arith.constant 1.000000e+00 : f32
    %384 = vector.broadcast %cst_101 : f32 to vector<8x32xf32>
    %385 = arith.addf %384, %383 : vector<8x32xf32>
    %386 = arith.divf %384, %385 : vector<8x32xf32>
    %387 = arith.mulf %378, %358 : vector<8x32xf32>
    %388 = arith.mulf %372, %380 : vector<8x32xf32>
    %389 = arith.addf %387, %388 : vector<8x32xf32>
    %390 = math.tanh %389 : vector<8x32xf32>
    %391 = arith.mulf %386, %390 : vector<8x32xf32>
    %392 = vector.broadcast %360 : i32 to vector<8x1xi32>
    %393 = arith.cmpi sgt, %12, %392 : vector<8x1xi32>
    %cst_102 = arith.constant 0.000000e+00 : f32
    %394 = vector.shape_cast %393 : vector<8x1xi1> to vector<8x1xi1>
    %395 = vector.broadcast %394 : vector<8x1xi1> to vector<8x32xi1>
    %396 = vector.broadcast %cst_102 : f32 to vector<8x32xf32>
    %397 = arith.select %395, %391, %396 : vector<8x32xi1>, vector<8x32xf32>
    %c0_103 = arith.constant 0 : index
    %398 = arith.index_cast %360 : i32 to index
    %c0_104 = arith.constant 0 : index
    %c0_105 = arith.constant 0 : index
    %399 = vector.load %arg6[%c0_103, %398, %c0_104, %c0_105] : memref<1x8x8x32xf32, #tpu.memory_space<vmem>>, vector<1x1x8x32xf32>
    %400 = vector.shape_cast %399 : vector<1x1x8x32xf32> to vector<8x32xf32>
    %401 = vector.shape_cast %397 : vector<8x32xf32> to vector<1x1x8x32xf32>
    tpu.vector_store %arg6[%c0_103, %398, %c0_104, %c0_105], %401 {strides = array<i32>} : memref<1x8x8x32xf32, #tpu.memory_space<vmem>>, vector<1x1x8x32xf32>,
    %402 = vector.shape_cast %393 : vector<8x1xi1> to vector<8x1xi1>
    %403 = vector.broadcast %402 : vector<8x1xi1> to vector<8x32xi1>
    %404 = arith.select %403, %391, %355 : vector<8x32xi1>, vector<8x32xf32>
    %405 = vector.shape_cast %393 : vector<8x1xi1> to vector<8x1xi1>
    %406 = vector.broadcast %405 : vector<8x1xi1> to vector<8x32xi1>
    %407 = arith.select %406, %389, %358 : vector<8x32xi1>, vector<8x32xf32>
    %c8_i32 = arith.constant 8 : i32
    return
  }
  func.func @transform_0(%arg0: i32) -> (i32, i32) {
    %c0_i32 = arith.constant 0 : i32
    %c0_i32_0 = arith.constant 0 : i32
    %c0_i32_1 = arith.constant 0 : i32
    return %c0_i32, %c0_i32_0 : i32, i32
  }
  func.func @transform_1(%arg0: i32) -> (i32, i32) {
    %c0_i32 = arith.constant 0 : i32
    %c0_i32_0 = arith.constant 0 : i32
    %c0_i32_1 = arith.constant 0 : i32
    return %c0_i32, %c0_i32_0 : i32, i32
  }
  func.func @transform_2(%arg0: i32) -> (i32, i32, i32) {
    %c0_i32 = arith.constant 0 : i32
    %c0_i32_0 = arith.constant 0 : i32
    %c0_i32_1 = arith.constant 0 : i32
    return %arg0, %c0_i32, %c0_i32_0 : i32, i32, i32
  }
  func.func @transform_3(%arg0: i32) -> (i32, i32, i32) {
    %c0_i32 = arith.constant 0 : i32
    %c0_i32_0 = arith.constant 0 : i32
    %c0_i32_1 = arith.constant 0 : i32
    return %arg0, %c0_i32, %c0_i32_0 : i32, i32, i32
  }
  func.func @transform_4(%arg0: i32) -> (i32, i32, i32) {
    %c0_i32 = arith.constant 0 : i32
    %c0_i32_0 = arith.constant 0 : i32
    %c0_i32_1 = arith.constant 0 : i32
    return %arg0, %c0_i32, %c0_i32_0 : i32, i32, i32
  }
  func.func @transform_5(%arg0: i32) -> (i32, i32, i32, i32) {
    %c0_i32 = arith.constant 0 : i32
    %c0_i32_0 = arith.constant 0 : i32
    %c0_i32_1 = arith.constant 0 : i32
    %c0_i32_2 = arith.constant 0 : i32
    return %arg0, %c0_i32, %c0_i32_0, %c0_i32_1 : i32, i32, i32, i32
  }
}

</mosaic_0001>

<bundles_post_ra>
// kernel: bidirection_rnn_forward.5
= control target key start
LH: loop header
LB: loop body
LE: loop exit
PB: predicated region body
PF: predicated region fallthrough
CT: control target
= control target key end

     0   :  { %vm82_vm0 = vcmask 523264   ;;  %s404_s1 = inlined_call_operand.vmem [shape: bf16[64,128], index: 1, kind: input, shape index: {}]   ;;  %s405_s0 = inlined_call_operand.vmem [shape: bf16[64,64], index: 0, kind: input, shape index: {}]   ;;  %s406_s2 = inlined_call_operand.vmem [shape: f32[1,128], index: 2, kind: input, shape index: {}]   ;;  %s407_s3 = inlined_call_operand.vmem [shape: f32[64,128], index: 3, kind: output, shape index: {}]  }
   0x1   :  { %v289_v0 = vld [vmem:[%s404_s1] sm:$0xff]   ;;  %v290_v1 = vld [vmem:[%s404_s1 + $0x8] sm:$0xff]   ;;  %v291_v2 = vld [vmem:[%s404_s1 + $0x10] sm:$0xff]  }
   0x2   :  { %265 = vmatprep.subr.bf16.mxu0 %v289_v0  ;;  %281 = vmatprep.subr.bf16.mxu1 %v289_v0  ;;  %v293_v3 = vld [vmem:[%s405_s0] sm:$0xff]   ;;  %v295_v4 = vld [vmem:[%s405_s0 + $0x10] sm:$0xff]   ;;  %v292_v5 = vld [vmem:[%s404_s1 + $0x18] sm:$0xff]  }
   0x3   :  { %266 = vmatpush3.bf16.msra.mxu0 %v289_v0  ;;  %285 = vmatpush3.bf16.msra.mxu1 %v289_v0  ;;  %v294_v6 = vld [vmem:[%s405_s0 + $0x8] sm:$0xff]   ;;  %v296_v7 = vld [vmem:[%s405_s0 + $0x18] sm:$0xff]   ;;  %v244_v8 = vld [vmem:[%s406_s2] ss:$0 sm:$0xff] }
   0x4   :  { %267 = vmatprep.subr.bf16.mxu0 %v290_v1  ;;  %282 = vmatprep.subr.bf16.mxu1 %v290_v1 }
   0x5   :  { %273 = vmatprep.mubr.msk.bf16.mxu0 %vm82_vm0, %v293_v3  ;;  %277 = vmatprep.mubr.msk.bf16.mxu1 %vm82_vm0, %v295_v4 }
   0x7   :  { %268 = vmatpush3.bf16.msra.mxu0 %v290_v1  ;;  %286 = vmatpush3.bf16.msra.mxu1 %v290_v1 }
   0x8   :  { %269 = vmatprep.subr.bf16.mxu0 %v291_v2  ;;  %283 = vmatprep.subr.bf16.mxu1 %v291_v2 }
   0xb   :  { %270 = vmatpush3.bf16.msra.mxu0 %v291_v2  ;;  %287 = vmatpush3.bf16.msra.mxu1 %v291_v2 }
   0xc   :  { %271 = vmatprep.subr.bf16.mxu0 %v292_v5  ;;  %284 = vmatprep.subr.bf16.mxu1 %v292_v5 }
   0xf   :  { %272 = vmatpush3.bf16.msra.mxu0 %v292_v5  ;;  %288 = vmatpush3.bf16.msra.mxu1 %v292_v5 }
  0x12   :  { %274 = vmatmul.mubr.msk.bf16.vlgmr.msra.gmra.mrb[0].mxu0 %vm82_vm0, %v294_v6  ;;  %278 = vmatmul.mubr.msk.bf16.vlgmr.msra.gmra.mrb[0].mxu1 %vm82_vm0, %v296_v7 }
  0xe5   :  { %v275_v9 = vpop.f32.mrb[0].mxu0  ;;  %v279_v10 = vpop.f32.mrb[0].mxu1 }
  0xe6   :  { %v138_v11 = vadd.f32 %v275_v9, %v244_v8  ;;  %v129_v12 = vpop.f32.mrb[1].mxu0  ;;  %v145_v13 = vpop.f32.mrb[1].mxu1  ;;  %v154_v24 = vadd.f32 %v279_v10, %v244_v8 }
  0xe7   :  { %v130_v14 = vadd.f32 %v244_v8, %v129_v12  ;;  %v276_v15 = vpop.f32.mrb[2].mxu0  ;;  %v280_v16 = vpop.f32.mrb[2].mxu1  ;;  %v146_v19 = vadd.f32 %v244_v8, %v145_v13 }
  0xe8   :  { %164 = vmax.xlane.f32.xlu1 %v138_v11  ;;  %v132_v17 = vpop.f32.mrb[3].mxu0  ;;  %v148_v18 = vpop.f32.mrb[3].mxu1  ;;  %v141_v20 = vadd.f32 %v276_v15, %v244_v8  ;;  %v157_v23 = vadd.f32 %v280_v16, %v244_v8 }
  0xe9   :  { %160 = vmax.xlane.f32.xlu0 %v130_v14  ;;  %v149_v21 = vadd.f32 %v244_v8, %v148_v18  ;;  %v133_v22 = vadd.f32 %v244_v8, %v132_v17 }
  0xec   :  { %166 = vmax.xlane.f32.xlu1 %v141_v20 }
  0xed   :  { %168 = vmax.xlane.f32.xlu0 %v146_v19 }
  0xf0   :  { %170 = vmax.xlane.f32.xlu1 %v149_v21 }
  0xf1   :  { %162 = vmax.xlane.f32.xlu0 %v133_v22 }
  0xf4   :  { %174 = vmax.xlane.f32.xlu1 %v157_v23 }
  0xf5   :  { %172 = vmax.xlane.f32.xlu0 %v154_v24 }
 0x175   :  { %v165_v25 = vpop.xlane.xlu1 %164 }
 0x176   :  { %v178_v26 = vsub.f32 %v138_v11, %v165_v25  ;;  %v161_v27 = vpop.xlane.xlu0 %160 }
 0x177   :  { %v176_v28 = vsub.f32 %v130_v14, %v161_v27 }
 0x178   :  { %v188_v29 = vmul.f32 1.442695, %v178_v26 }
 0x179   :  { %v184_v30 = vmul.f32 1.442695, %v176_v28  ;;  %v167_v31 = vpop.xlane.xlu1 %166 }
 0x17a   :  { %297 = vpow2.f32 %v188_v29  ;;  %v179_v32 = vsub.f32 %v141_v20, %v167_v31  ;;  %v169_v33 = vpop.xlane.xlu0 %168 }
 0x17b   :  { %v180_v34 = vsub.f32 %v146_v19, %v169_v33  ;;  %299 = vpow2.f32 %v184_v30 }
 0x17c   :  { %v190_v35 = vmul.f32 1.442695, %v179_v32 }
 0x17d   :  { %v171_v36 = vpop.xlane.xlu1 %170  ;;  %v192_v37 = vmul.f32 1.442695, %v180_v34 }
 0x17e   :  { %301 = vpow2.f32 %v190_v35  ;;  %v181_v38 = vsub.f32 %v149_v21, %v171_v36  ;;  %v163_v39 = vpop.xlane.xlu0 %162 }
 0x17f   :  { %v177_v40 = vsub.f32 %v133_v22, %v163_v39  ;;  %303 = vpow2.f32 %v192_v37 }
 0x180   :  { %v194_v43 = vmul.f32 1.442695, %v181_v38 }
 0x181   :  { %v186_v41 = vmul.f32 1.442695, %v177_v40  ;;  %v175_v42 = vpop.xlane.xlu1 %174 }
 0x182   :  { %v173_v44 = vpop.xlane.xlu0 %172  ;;  %v183_v45 = vsub.f32 %v157_v23, %v175_v42 }
 0x183   :  { %305 = vpow2.f32 %v186_v41  ;;  %v182_v46 = vsub.f32 %v154_v24, %v173_v44 }
 0x184   :  { %v298_v47 = vpop.eup %297  ;;  %307 = vpow2.f32 %v194_v43  ;;  %v198_v50 = vmul.f32 1.442695, %v183_v45 }
 0x185   :  { %v196_v48 = vmul.f32 1.442695, %v182_v46  ;;  %204 = vadd.xlane.f32.xlu0 %v298_v47  ;;  %v300_v49 = vpop.eup %299 }
 0x187   :  { %309 = vpow2.f32 %v196_v48 }
 0x188   :  { %v302_v51 = vpop.eup %301  ;;  %311 = vpow2.f32 %v198_v50 }
 0x189   :  { %206 = vadd.xlane.f32.xlu1 %v302_v51  ;;  %200 = vadd.xlane.f32.xlu0 %v300_v49  ;;  %v304_v52 = vpop.eup %303 }
 0x18d   :  { %v306_v53 = vpop.eup %305  ;;  %208 = vadd.xlane.f32.xlu0 %v304_v52 }
 0x18e   :  { %202 = vadd.xlane.f32.xlu1 %v306_v53  ;;  %v308_v54 = vpop.eup %307 }
 0x191   :  { %v310_v55 = vpop.eup %309 }
 0x192   :  { %210 = vadd.xlane.f32.xlu1 %v308_v54  ;;  %212 = vadd.xlane.f32.xlu0 %v310_v55  ;;  %v312_v56 = vpop.eup %311 }
 0x196   :  { %214 = vadd.xlane.f32.xlu1 %v312_v56 }
 0x212   :  { %v205_v57 = vpop.xlane.xlu0 %204 }
 0x213   :  { %313 = vrcp.f32 %v205_v57 }
 0x216   :  { %v207_v58 = vpop.xlane.xlu1 %206  ;;  %v201_v59 = vpop.xlane.xlu0 %200 }
 0x217   :  { %315 = vrcp.f32 %v207_v58 }
 0x218   :  { %317 = vrcp.f32 %v201_v59 }
 0x21a   :  { %v209_v60 = vpop.xlane.xlu0 %208 }
 0x21b   :  { %319 = vrcp.f32 %v209_v60  ;;  %v203_v61 = vpop.xlane.xlu1 %202 }
 0x21c   :  { %321 = vrcp.f32 %v203_v61 }
 0x21d   :  { %v314_v62 = vpop.eup %313 }
 0x21e   :  { %v226_v63 = vmul.f32 %v314_v62, %v298_v47 }
 0x21f   :  { %v211_v0 = vpop.xlane.xlu1 %210  ;;  %v213_v1 = vpop.xlane.xlu0 %212 }
 0x220   :  { %234 = vst [vmem:[%s407_s3 + $0x10] sm:$0xff] %v226_v63  ;;  %323 = vrcp.f32 %v211_v0 }
 0x221   :  { %v316_v2 = vpop.eup %315  ;;  %325 = vrcp.f32 %v213_v1 }
 0x222   :  { %v318_v3 = vpop.eup %317  ;;  %v227_v4 = vmul.f32 %v316_v2, %v302_v51 }
 0x223   :  { %v224_v5 = vmul.f32 %v318_v3, %v300_v49  ;;  %v215_v6 = vpop.xlane.xlu1 %214 }
 0x224   :  { %235 = vst [vmem:[%s407_s3 + $0x18] sm:$0xff] %v227_v4  ;;  %327 = vrcp.f32 %v215_v6 }
 0x225   :  { %v320_v7 = vpop.eup %319  ;;  %232 = vst [vmem:[%s407_s3] sm:$0xff] %v224_v5 }
 0x226   :  { %v322_v8 = vpop.eup %321  ;;  %v228_v9 = vmul.f32 %v320_v7, %v304_v52 }
 0x227   :  { %v225_v10 = vmul.f32 %v322_v8, %v306_v53 }
 0x228   :  { %236 = vst [vmem:[%s407_s3 + $0x20] sm:$0xff] %v228_v9 }
 0x229   :  { %233 = vst [vmem:[%s407_s3 + $0x8] sm:$0xff] %v225_v10 }
 0x22a   :  { %v324_v11 = vpop.eup %323 }
 0x22b   :  { %v326_v12 = vpop.eup %325  ;;  %v229_v13 = vmul.f32 %v324_v11, %v308_v54 }
 0x22c   :  { %v230_v14 = vmul.f32 %v326_v12, %v310_v55 }
 0x22d   :  { %237 = vst [vmem:[%s407_s3 + $0x28] sm:$0xff] %v229_v13 }
 0x22e   :  { %v328_v15 = vpop.eup %327  ;;  %238 = vst [vmem:[%s407_s3 + $0x30] sm:$0xff] %v230_v14 }
 0x22f   :  { %v231_v16 = vmul.f32 %v328_v15, %v312_v56 }
 0x231   :  { %239 = vst [vmem:[%s407_s3 + $0x38] sm:$0xff] %v231_v16 }

// kernel: bidirection_rnn_forward.3
= control target key start
LH: loop header
LB: loop body
LE: loop exit
PB: predicated region body
PF: predicated region fallthrough
CT: control target
= control target key end

     0   :  { %s1528_s18 = smov 0   ;;  %s1874_s0 = inlined_call_operand.vmem [shape: s32[8,1], index: 0, kind: input, shape index: {}]   ;;  %s1875_s1 = inlined_call_operand.vmem [shape: bf16[64,16], index: 1, kind: input, shape index: {}]   ;;  %s1876_s2 = inlined_call_operand.vmem [shape: bf16[2,16,128], index: 2, kind: input, shape index: {}]   ;;  %s1877_s3 = inlined_call_operand.vmem [shape: bf16[2,32,128], index: 3, kind: input, shape index: {}]   ;;  %s1878_s4 = inlined_call_operand.vmem [shape: f32[2,1,128], index: 4, kind: input, shape index: {}]   ;;  %s1879_s5 = inlined_call_operand.vmem [shape: f32[2,8,8,32], index: 5, kind: output, shape index: {}]  }
   0x1 LB: > { %s1534_s19 = sadd.s32 4294967295, %s1491_s18   ;;  %p1249_p0 = scmp.ge.s32.totalorder %s1491_s18, 1  ;;  %s1491_s18 = sphi %s1528_s18, %s15_s18  }
   0x2   : > { %p205_p1 = scmp.lt.s32.totalorder %s1491_s18, 3 }
   0x4   : > { %p206_p2 = pnand %p1249_p0, %p205_p1 }
   0x5   : > { %p241_p3 = scmp.lt.s32.totalorder (!%p206_p2), %s1534_s19, 1  ;;  %v1417_v0 = vld [vmem:[%s1875_s1] sm:$0xff] (!%p206_p2)   ;;  %vm303_vm0 = vcmask (!%p206_p2), 130048   ;;  %v1493_v1 = vmov (!%p206_p2), 0.0   ;;  %vm1494_vm1 = vmmov (!%p206_p2), 0   ;;  %v1495_v2 = vmov (!%p206_p2), 0  }
   0x6   : > { %209 = sbr.rel (%p206_p2) target bundleno = 5682 (0x1632), region = 40  ;;  %1327 = vmatprep.mubr.msk.bf16.mxu0 (!%p206_p2), %vm303_vm0, %v1417_v0  ;;  %1335 = vmatprep.subr.bf16.mxu1 (!%p206_p2), %v1493_v1  ;;  %v1418_v5 = vld [vmem:[%s1875_s1 + $0x8] sm:$0xff] (!%p206_p2)   ;;  %v1419_v6 = vld [vmem:[%s1875_s1 + $0x10] sm:$0xff] (!%p206_p2)   ;;  %v1420_v8 = vld [vmem:[%s1875_s1 + $0x18] sm:$0xff] (!%p206_p2)   ;;  %p394_p4 = scmp.eq.s32.totalorder (!%p206_p2), %s1534_s19, 1  ;;  %vm411_vm4 = vcmask (!%p206_p2), 261120  }
   0x7   : > { %1339 = vmatprep.mubr.msk.bf16.mxu1 (!%p206_p2), %vm1494_vm1, %v1493_v1  ;;  %1412 = vset.pattern.permute.xlu1 (!%p206_p2), %v1495_v2  ;;  %v1601_v9 = vld [vmem:[%s1874_s0] sm:$0xff] (!%p206_p2) }
   0x8   : > { %1413 = vset.pattern.permute.xlu0 (!%p206_p2), %v1495_v2 }
   0xd   : > { %s1543_s22 = scalar_select %p241_p3, %s1534_s19, 1 }
   0xe   : > { %s1596_s12 = scalar_select %p394_p4, 7, 0 }
   0xf   : > { %s1293_s23 = sshll.u32 %s1543_s22, 3  ;;  %s1294_s24 = sshll.u32 %s1543_s22, 4 }
  0x10   : > { %s245_s27 = scalar_lea.vmem %s1876_s2, %s1293_s23  ;;  %s250_s30 = scalar_lea.vmem %s1877_s3, %s1294_s24  ;;  %v480_v10 = vstv %s1596_s12 }
  0x11   : > { %v1414_v3 = vld [vmem:[%s245_s27] sm:$0xff]   ;;  %v1567_v7 = vld [vmem:[%s250_s30 + $0x8] sm:$0xff]   ;;  %vm481_vm2 = vcmp.gt.s32.totalorder %v1601_v9, %v480_v10  ;;  %s253_s17 = scalar_lea.vmem %s1878_s4, %s1543_s22  ;;  %s1266_s20 = sshll.u32 %s1596_s12, 3 }
  0x12   : > { %1325 = vmatprep.subr.bf16.mxu0 %v1414_v3  ;;  %v1559_v4 = vld [vmem:[%s250_s30] sm:$0xff]   ;;  %v482_v11 = vsel %vm481_vm2, 1, %v1495_v2  ;;  %s397_s21 = scalar_lea.vmem [#allocation2], %s1266_s20  ;;  %s1496_s23 = smov 64  }
  0x13   : > { %1326 = vmatpush3.bf16.msra.mxu0 %v1414_v3  ;;  %1336 = vmatpush3.bf16.msra.mxu1 %v1559_v4  ;;  %v1256_v12 = vld [vmem:[%s253_s17] ss:$0 sm:$0xff]  ;;  %s1497_s24 = smov 32   ;;  %s1295_s19 = sshll.u32 %s1543_s22, 6 }
  0x14   : > { %1351 = vmatprep.subr.bf16.mxu0 %v1493_v1  ;;  %1337 = vmatprep.subr.bf16.mxu1 %v1493_v1  ;;  %s1631_s25 = scalar_select %p394_p4, 6, 1 }
  0x15   : > { %484 = vperm.xlu1 %1412, %v482_v11   ;;  %s1662_s28 = scalar_select %p394_p4, 5, 2 }
  0x16   : > { %1328 = vmatmul.mubr.msk.bf16.vlgmr.msra.gmra.mrb[0].mxu0 %vm303_vm0, %v1418_v5  ;;  %s1270_s26 = sshll.u32 %s1631_s25, 3  ;;  %v571_v58 = vstv %s1631_s25 }
  0x17   : > { %1331 = vmatprep.mubr.msk.bf16.mxu0 %vm303_vm0, %v1419_v6  ;;  %1352 = vmatpush3.bf16.msra.mxu0 %v1559_v4  ;;  %s497_s27 = scalar_lea.vmem [#allocation2], %s1270_s26  ;;  %vm572_vm5 = vcmp.gt.s32.totalorder %v1601_v9, %v571_v58  ;;  %s1273_s29 = sshll.u32 %s1662_s28, 3 }
  0x18   : > { %1338 = vmatpush3.bf16.msra.mxu1 %v1567_v7  ;;  %1353 = vmatprep.subr.bf16.mxu0 %v1493_v1  ;;  %v573_v60 = vsel %vm572_vm5, 1, %v1495_v2  ;;  %s589_s30 = scalar_lea.vmem [#allocation2], %s1273_s29 }
  0x19   : > { %1343 = vmatprep.subr.bf16.mxu1 %v1493_v1  ;;  %s1693_s6 = scalar_select %p394_p4, 4, 3 }
  0x1a   : > { %s1723_s9 = scalar_select %p394_p4, 3, 4 }
  0x1b   : > { %1340 = vmatmul.mubr.bf16.vlgmr.msra.gmra.mrb[0].mxu1 %v1495_v2  ;;  %1354 = vmatpush3.bf16.msra.mxu0 %v1567_v7  ;;  %s1276_s7 = sshll.u32 %s1693_s6, 3 }
  0x1c   : > { %1344 = vmatpush3.bf16.msra.mxu1 %v1559_v4  ;;  %1347 = vmatprep.mubr.msk.bf16.mxu1 %vm1494_vm1, %v1493_v1  ;;  %s681_s8 = scalar_lea.vmem [#allocation2], %s1276_s7  ;;  %s1279_s10 = sshll.u32 %s1723_s9, 3 }
  0x1d   : > { %1345 = vmatprep.subr.bf16.mxu1 %v1493_v1  ;;  %1367 = vmatprep.subr.bf16.mxu0 %v1493_v1  ;;  %s773_s11 = scalar_lea.vmem [#allocation2], %s1279_s10 }
  0x1e   : > { %1332 = vmatmul.mubr.msk.bf16.gmra.mrb[4].mxu0 %vm303_vm0, %v1420_v8  ;;  %s1753_s13 = scalar_select %p394_p4, 2, 5 }
  0x1f   : > { %1355 = vmatprep.mubr.msk.bf16.mxu0 %vm1494_vm1, %v1493_v1  ;;  %s1778_s16 = scalar_select %p394_p4, 1, 6 }
  0x20   : > { %1346 = vmatpush3.bf16.msra.mxu1 %v1567_v7  ;;  %s1282_s14 = sshll.u32 %s1753_s13, 3 }
  0x21   : > { %1359 = vmatprep.subr.bf16.mxu1 %v1493_v1  ;;  %s865_s15 = scalar_lea.vmem [#allocation2], %s1282_s14  ;;  %s1285_s17 = sshll.u32 %s1778_s16, 3 }
  0x94   : > { %v485_v46 = vpop.permute.xlu1 %484 }
  0x95   : > { %vm486_vm3 = vcmp.eq.s32.totalorder %v485_v46, 1 }
  0xe9   : > { %v1329_v13 = vpop.f32.mrb[0].mxu0 }
  0xea   : > { %v359_v14 = vadd.f32 %v1329_v13, %v1256_v12  ;;  %v350_v15 = vpop.f32.mrb[1].mxu0 }
  0xeb   : > { %v351_v16 = vadd.f32 %v1256_v12, %v350_v15  ;;  %v1330_v17 = vpop.f32.mrb[2].mxu0 }
  0xec   : > { %383 = vst [vmem:[#allocation2 + $0x10] sm:$0xff] %v359_v14  ;;  %v362_v18 = vadd.f32 %v1330_v17, %v1256_v12  ;;  %v353_v19 = vpop.f32.mrb[3].mxu0 }
  0xed   : > { %381 = vst [vmem:[#allocation2] sm:$0xff] %v351_v16  ;;  %v354_v20 = vadd.f32 %v1256_v12, %v353_v19 }
  0xee   : > { %384 = vst [vmem:[#allocation2 + $0x18] sm:$0xff] %v362_v18  ;;  %v449_v21 = vpop.f32.mrb[0].mxu1 }
  0xef   : > { %382 = vst [vmem:[#allocation2 + $0x8] sm:$0xff] %v354_v20  ;;  %v1341_v22 = vpop.f32.mrb[1].mxu1 }
  0xf0   : > { %v452_v23 = vpop.f32.mrb[2].mxu1 }
  0xf1   : > { %v1333_v24 = vpop.f32.mrb[4].mxu0  ;;  %v1342_v25 = vpop.f32.mrb[3].mxu1 }
  0xf2   : > { %v375_v26 = vadd.f32 %v1333_v24, %v1256_v12  ;;  %v366_v27 = vpop.f32.mrb[5].mxu0  ;;  %v663_v25 = vstv %s1662_s28 }
  0xf3   : > { %v367_v28 = vadd.f32 %v1256_v12, %v366_v27  ;;  %v1334_v29 = vpop.f32.mrb[6].mxu0  ;;  %vm664_vm7 = vcmp.gt.s32.totalorder %v1601_v9, %v663_v25 }
  0xf4   : > { %387 = vst [vmem:[#allocation2 + $0x30] sm:$0xff] %v375_v26  ;;  %v378_v30 = vadd.f32 %v1334_v29, %v1256_v12  ;;  %v369_v31 = vpop.f32.mrb[7].mxu0  ;;  %v665_v27 = vsel %vm664_vm7, 1, %v1495_v2 }
  0xf5   : > { %385 = vst [vmem:[#allocation2 + $0x20] sm:$0xff] %v367_v28  ;;  %v370_v32 = vadd.f32 %v1256_v12, %v369_v31 }
  0xf6   : > { %388 = vst [vmem:[#allocation2 + $0x38] sm:$0xff] %v378_v30 }
  0xf7   : > { %386 = vst [vmem:[#allocation2 + $0x28] sm:$0xff] %v370_v32 }
  0xfe   : > { %v398_v33 = vld [vmem:[%s397_s21] sm:$0xff]  ;;  %s957_s21 = scalar_lea.vmem [#allocation2], %s1285_s17 }
  0xff   : > { %v455_v34 = vadd.f32 %v449_v21, %v398_v33  ;;  %v498_v52 = vld [vmem:[%s497_s27] sm:$0xff]  ;;  %s1796_s27 = scalar_select %p394_p4, 0, 7 }
 0x100   : > { %v590_v19 = vld [vmem:[%s589_s30] sm:$0xff] }
 0x101   : > { %1421 = vtanh.f32 %v455_v34  ;;  %v1269_v36 = vmul.f32 -1.442695, %v455_v34  ;;  %s1288_s30 = sshll.u32 %s1796_s27, 3 }
 0x103   : > { %1423 = vpow2.f32 %v1269_v36 }
 0x10b   : > { %v1422_v35 = vpop.eup %1421 }
 0x10c   : > { %465 = vrot.lane.b32.xlu0 %v1422_v35, %s1496_s23 }
 0x10d   : > { %v1424_v37 = vpop.eup %1423 }
 0x10e   : > { %v459_v38 = vadd.f32 1.0, %v1424_v37 }
 0x110   : > { %1425 = vrcp.f32 %v459_v38 }
 0x11a   : > { %v1426_v39 = vpop.eup %1425 }
 0x11b   : > { %v463_v42 = vmul.f32 0.0, %v1426_v39 }
 0x17e   : > { %v466_v40 = vpop.permute.xlu0 %465 }
 0x17f   : > { %v468_v41 = vmul.f32 %v1426_v39, %v466_v40 }
 0x181   : > { %470 = vrot.lane.b32.xlu0 %v468_v41, %s1497_s24 }
 0x1f3   : > { %v471_v43 = vpop.permute.xlu0 %470 }
 0x1f4   : > { %v473_v44 = vadd.f32 %v471_v43, %v463_v42 }
 0x1f6   : > { %1427 = vtanh.f32 %v473_v44  ;;  %v494_v6 = vsel %vm486_vm3, %v473_v44, 0.0 }
 0x200   : > { %v1428_v45 = vpop.eup %1427 }
 0x201   : > { %476 = vrot.lane.b32.xlu1 %v1428_v45, %s1496_s23  ;;  %v682_v45 = vld [vmem:[%s681_s8] sm:$0xff]  ;;  %s1049_s8 = scalar_lea.vmem [#allocation2], %s1288_s30 }
 0x273   : > { %v477_v47 = vpop.permute.xlu1 %476 }
 0x274   : > { %v479_v48 = vmul.f32 %v1426_v39, %v477_v47 }
 0x276   : > { %v1617_v49 = vsel %vm486_vm3, %v479_v48, 0.0 }
 0x277   : > { %v499_v50 = vpack.c.bf16 %v1617_v49, %v1617_v49 }
 0x279   : > { %501 = vrot.lane.b32.xlu0 %v499_v50, %s1497_s24 }
 0x2eb   : > { %v502_v51 = vpop.permute.xlu0 %501 }
 0x2ec   : > { %1348 = vmatmul.mubr.msk.bf16.vlgmr.msra.gmra.mrb[4].mxu1 %vm411_vm4, %v502_v51 }
 0x2ed   : > { %1360 = vmatpush3.bf16.msra.mxu1 %v1559_v4  ;;  %1363 = vmatprep.mubr.msk.bf16.mxu1 %vm1494_vm1, %v1493_v1 }
 0x2ee   : > { %1361 = vmatprep.subr.bf16.mxu1 %v1493_v1 }
 0x2f1   : > { %1362 = vmatpush3.bf16.msra.mxu1 %v1567_v7 }
 0x2f2   : > { %1375 = vmatprep.subr.bf16.mxu1 %v1493_v1 }
 0x3bf   : > { %v540_v53 = vpop.f32.mrb[4].mxu1 }
 0x3c0   : > { %v546_v54 = vadd.f32 %v540_v53, %v498_v52  ;;  %v1349_v55 = vpop.f32.mrb[5].mxu1  ;;  %v755_v52 = vstv %s1693_s6 }
 0x3c1   : > { %v543_v56 = vpop.f32.mrb[6].mxu1  ;;  %vm756_vm9 = vcmp.gt.s32.totalorder %v1601_v9, %v755_v52 }
 0x3c2   : > { %1429 = vtanh.f32 %v546_v54  ;;  %v1350_v57 = vpop.f32.mrb[7].mxu1  ;;  %v1272_v61 = vmul.f32 -1.442695, %v546_v54  ;;  %v757_v54 = vsel %vm756_vm9, 1, %v1495_v2 }
 0x3c4   : > { %1431 = vpow2.f32 %v1272_v61 }
 0x3cc   : > { %v1430_v59 = vpop.eup %1429 }
 0x3cd   : > { %556 = vrot.lane.b32.xlu1 %v1430_v59, %s1496_s23 }
 0x3ce   : > { %v1432_v62 = vpop.eup %1431 }
 0x3cf   : > { %v550_v63 = vadd.f32 1.0, %v1432_v62 }
 0x3d1   : > { %575 = vperm.xlu1 %1412, %v573_v60   ;;  %1433 = vrcp.f32 %v550_v63 }
 0x3db   : > { %v1434_v0 = vpop.eup %1433 }
 0x3dc   : > { %v554_v8 = vmul.f32 %v1434_v0, %v494_v6 }
 0x43f   : > { %v557_v3 = vpop.permute.xlu1 %556 }
 0x440   : > { %v559_v5 = vmul.f32 %v1434_v0, %v557_v3 }
 0x442   : > { %561 = vrot.lane.b32.xlu0 %v559_v5, %s1497_s24 }
 0x450   : > { %v1643_v13 = vpop.permute.xlu1 %575 }
 0x451   : > { %vm577_vm6 = vcmp.eq.s32.totalorder %v1643_v13, 1 }
 0x4b4   : > { %v562_v10 = vpop.permute.xlu0 %561 }
 0x4b5   : > { %v564_v11 = vadd.f32 %v562_v10, %v554_v8 }
 0x4b7   : > { %1435 = vtanh.f32 %v564_v11  ;;  %v586_v34 = vsel %vm577_vm6, %v564_v11, %v494_v6 }
 0x4c1   : > { %v1436_v12 = vpop.eup %1435 }
 0x4c2   : > { %567 = vrot.lane.b32.xlu0 %v1436_v12, %s1496_s23 }
 0x534   : > { %v568_v14 = vpop.permute.xlu0 %567 }
 0x535   : > { %v1645_v15 = vmul.f32 %v1434_v0, %v568_v14  ;;  %v774_v14 = vld [vmem:[%s773_s11] sm:$0xff] }
 0x537   : > { %v585_v16 = vsel %vm577_vm6, %v1645_v15, %v1617_v49 }
 0x538   : > { %v591_v17 = vpack.c.bf16 %v585_v16, %v585_v16 }
 0x53a   : > { %593 = vrot.lane.b32.xlu1 %v591_v17, %s1497_s24 }
 0x5ac   : > { %v594_v18 = vpop.permute.xlu1 %593 }
 0x5ad   : > { %1356 = vmatmul.mubr.msk.bf16.vlgmr.msra.gmra.mrb[8].mxu0 %vm411_vm4, %v594_v18 }
 0x5ae   : > { %1368 = vmatpush3.bf16.msra.mxu0 %v1559_v4  ;;  %1371 = vmatprep.mubr.msk.bf16.mxu0 %vm1494_vm1, %v1493_v1 }
 0x5af   : > { %1369 = vmatprep.subr.bf16.mxu0 %v1493_v1 }
 0x5b2   : > { %1370 = vmatpush3.bf16.msra.mxu0 %v1567_v7 }
 0x5b3   : > { %1383 = vmatprep.subr.bf16.mxu0 %v1493_v1 }
 0x680   : > { %v632_v20 = vpop.f32.mrb[8].mxu0 }
 0x681   : > { %v638_v21 = vadd.f32 %v632_v20, %v590_v19  ;;  %v1357_v22 = vpop.f32.mrb[9].mxu0 }
 0x682   : > { %v635_v23 = vpop.f32.mrb[10].mxu0 }
 0x683   : > { %1437 = vtanh.f32 %v638_v21  ;;  %v1358_v24 = vpop.f32.mrb[11].mxu0  ;;  %v1275_v28 = vmul.f32 -1.442695, %v638_v21  ;;  %v847_v21 = vstv %s1723_s9 }
 0x684   : > { %vm848_vm11 = vcmp.gt.s32.totalorder %v1601_v9, %v847_v21 }
 0x685   : > { %1439 = vpow2.f32 %v1275_v28  ;;  %v849_v23 = vsel %vm848_vm11, 1, %v1495_v2 }
 0x68d   : > { %v1438_v26 = vpop.eup %1437 }
 0x68e   : > { %648 = vrot.lane.b32.xlu0 %v1438_v26, %s1496_s23 }
 0x68f   : > { %v1440_v29 = vpop.eup %1439 }
 0x690   : > { %v642_v30 = vadd.f32 1.0, %v1440_v29 }
 0x692   : > { %667 = vperm.xlu0 %1413, %v665_v27   ;;  %1441 = vrcp.f32 %v642_v30 }
 0x69c   : > { %v1442_v31 = vpop.eup %1441 }
 0x69d   : > { %v646_v35 = vmul.f32 %v1442_v31, %v586_v34 }
 0x700   : > { %v649_v32 = vpop.permute.xlu0 %648 }
 0x701   : > { %v651_v33 = vmul.f32 %v1442_v31, %v649_v32 }
 0x703   : > { %653 = vrot.lane.b32.xlu1 %v651_v33, %s1497_s24 }
 0x711   : > { %v1675_v39 = vpop.permute.xlu0 %667 }
 0x712   : > { %vm669_vm8 = vcmp.eq.s32.totalorder %v1675_v39, 1 }
 0x775   : > { %v654_v36 = vpop.permute.xlu1 %653 }
 0x776   : > { %v656_v37 = vadd.f32 %v654_v36, %v646_v35 }
 0x778   : > { %1443 = vtanh.f32 %v656_v37  ;;  %v678_v61 = vsel %vm669_vm8, %v656_v37, %v586_v34 }
 0x782   : > { %v1444_v38 = vpop.eup %1443 }
 0x783   : > { %659 = vrot.lane.b32.xlu1 %v1444_v38, %s1496_s23 }
 0x7f5   : > { %v660_v40 = vpop.permute.xlu1 %659 }
 0x7f6   : > { %v1677_v41 = vmul.f32 %v1442_v31, %v660_v40 }
 0x7f8   : > { %v677_v42 = vsel %vm669_vm8, %v1677_v41, %v585_v16 }
 0x7f9   : > { %v683_v43 = vpack.c.bf16 %v677_v42, %v677_v42 }
 0x7fb   : > { %685 = vrot.lane.b32.xlu1 %v683_v43, %s1497_s24  ;;  %v866_v43 = vld [vmem:[%s865_s15] sm:$0xff] }
 0x86d   : > { %v686_v44 = vpop.permute.xlu1 %685 }
 0x86e   : > { %1364 = vmatmul.mubr.msk.bf16.vlgmr.msra.gmra.mrb[8].mxu1 %vm411_vm4, %v686_v44 }
 0x86f   : > { %1376 = vmatpush3.bf16.msra.mxu1 %v1559_v4  ;;  %1379 = vmatprep.mubr.msk.bf16.mxu1 %vm1494_vm1, %v1493_v1 }
 0x870   : > { %1377 = vmatprep.subr.bf16.mxu1 %v1493_v1 }
 0x873   : > { %1378 = vmatpush3.bf16.msra.mxu1 %v1567_v7 }
 0x874   : > { %1391 = vmatprep.subr.bf16.mxu1 %v1493_v1 }
 0x941   : > { %v724_v46 = vpop.f32.mrb[8].mxu1 }
 0x942   : > { %v730_v47 = vadd.f32 %v724_v46, %v682_v45  ;;  %v1365_v48 = vpop.f32.mrb[9].mxu1 }
 0x943   : > { %v727_v50 = vpop.f32.mrb[10].mxu1  ;;  %v939_v48 = vstv %s1753_s13 }
 0x944   : > { %1445 = vtanh.f32 %v730_v47  ;;  %v1366_v51 = vpop.f32.mrb[11].mxu1  ;;  %v1278_v55 = vmul.f32 -1.442695, %v730_v47  ;;  %vm940_vm13 = vcmp.gt.s32.totalorder %v1601_v9, %v939_v48 }
 0x946   : > { %1447 = vpow2.f32 %v1278_v55 }
 0x94e   : > { %v1446_v53 = vpop.eup %1445 }
 0x94f   : > { %740 = vrot.lane.b32.xlu0 %v1446_v53, %s1496_s23 }
 0x950   : > { %v1448_v56 = vpop.eup %1447 }
 0x951   : > { %v734_v57 = vadd.f32 1.0, %v1448_v56 }
 0x953   : > { %759 = vperm.xlu0 %1413, %v757_v54   ;;  %1449 = vrcp.f32 %v734_v57 }
 0x95d   : > { %v1450_v58 = vpop.eup %1449 }
 0x95e   : > { %v738_v62 = vmul.f32 %v1450_v58, %v678_v61 }
 0x9c1   : > { %v741_v59 = vpop.permute.xlu0 %740 }
 0x9c2   : > { %v743_v60 = vmul.f32 %v1450_v58, %v741_v59 }
 0x9c4   : > { %745 = vrot.lane.b32.xlu1 %v743_v60, %s1497_s24 }
 0x9d2   : > { %v1706_v5 = vpop.permute.xlu0 %759 }
 0x9d3   : > { %vm761_vm10 = vcmp.eq.s32.totalorder %v1706_v5, 1 }
 0xa36   : > { %v746_v63 = vpop.permute.xlu1 %745 }
 0xa37   : > { %v748_v0 = vadd.f32 %v746_v63, %v738_v62 }
 0xa39   : > { %1451 = vtanh.f32 %v748_v0  ;;  %v770_v30 = vsel %vm761_vm10, %v748_v0, %v678_v61 }
 0xa43   : > { %v1452_v3 = vpop.eup %1451 }
 0xa44   : > { %751 = vrot.lane.b32.xlu1 %v1452_v3, %s1496_s23 }
 0xab6   : > { %v752_v6 = vpop.permute.xlu1 %751 }
 0xab7   : > { %v1708_v8 = vmul.f32 %v1450_v58, %v752_v6 }
 0xab9   : > { %v769_v10 = vsel %vm761_vm10, %v1708_v8, %v677_v42 }
 0xaba   : > { %v775_v11 = vpack.c.bf16 %v769_v10, %v769_v10 }
 0xabc   : > { %777 = vrot.lane.b32.xlu0 %v775_v11, %s1497_s24 }
 0xb2e   : > { %v778_v12 = vpop.permute.xlu0 %777 }
 0xb2f   : > { %1372 = vmatmul.mubr.msk.bf16.vlgmr.msra.gmra.mrb[12].mxu0 %vm411_vm4, %v778_v12 }
 0xb30   : > { %1384 = vmatpush3.bf16.msra.mxu0 %v1559_v4  ;;  %1387 = vmatprep.mubr.msk.bf16.mxu0 %vm1494_vm1, %v1493_v1 }
 0xb31   : > { %1385 = vmatprep.subr.bf16.mxu0 %v1493_v1 }
 0xb34   : > { %1386 = vmatpush3.bf16.msra.mxu0 %v1567_v7 }
 0xc02   : > { %v816_v16 = vpop.f32.mrb[12].mxu0 }
 0xc03   : > { %v822_v17 = vadd.f32 %v816_v16, %v774_v14  ;;  %v1373_v18 = vpop.f32.mrb[13].mxu0 }
 0xc04   : > { %v819_v19 = vpop.f32.mrb[14].mxu0  ;;  %v1031_v18 = vstv %s1778_s16 }
 0xc05   : > { %1453 = vtanh.f32 %v822_v17  ;;  %v1374_v20 = vpop.f32.mrb[15].mxu0  ;;  %v1281_v24 = vmul.f32 -1.442695, %v822_v17  ;;  %vm1032_vm15 = vcmp.gt.s32.totalorder %v1601_v9, %v1031_v18 }
 0xc06   : > { %v1033_v20 = vsel %vm1032_vm15, 1, %v1495_v2 }
 0xc07   : > { %1455 = vpow2.f32 %v1281_v24 }
 0xc0f   : > { %v1454_v22 = vpop.eup %1453 }
 0xc10   : > { %832 = vrot.lane.b32.xlu1 %v1454_v22, %s1496_s23 }
 0xc11   : > { %v1456_v25 = vpop.eup %1455 }
 0xc12   : > { %v826_v26 = vadd.f32 1.0, %v1456_v25 }
 0xc14   : > { %851 = vperm.xlu1 %1412, %v849_v23   ;;  %1457 = vrcp.f32 %v826_v26 }
 0xc1e   : > { %v1458_v27 = vpop.eup %1457 }
 0xc1f   : > { %v830_v31 = vmul.f32 %v1458_v27, %v770_v30 }
 0xc82   : > { %v833_v28 = vpop.permute.xlu1 %832 }
 0xc83   : > { %v835_v29 = vmul.f32 %v1458_v27, %v833_v28 }
 0xc85   : > { %837 = vrot.lane.b32.xlu0 %v835_v29, %s1497_s24 }
 0xc93   : > { %v1736_v35 = vpop.permute.xlu1 %851 }
 0xc94   : > { %vm853_vm12 = vcmp.eq.s32.totalorder %v1736_v35, 1 }
 0xcf7   : > { %v838_v32 = vpop.permute.xlu0 %837 }
 0xcf8   : > { %v840_v33 = vadd.f32 %v838_v32, %v830_v31 }
 0xcfa   : > { %1459 = vtanh.f32 %v840_v33  ;;  %v862_v56 = vsel %vm853_vm12, %v840_v33, %v770_v30 }
 0xd04   : > { %v1460_v34 = vpop.eup %1459 }
 0xd05   : > { %843 = vrot.lane.b32.xlu0 %v1460_v34, %s1496_s23 }
 0xd77   : > { %v844_v36 = vpop.permute.xlu0 %843 }
 0xd78   : > { %v1738_v37 = vmul.f32 %v1458_v27, %v844_v36 }
 0xd7a   : > { %v861_v38 = vsel %vm853_vm12, %v1738_v37, %v769_v10  ;;  %v958_v10 = vld [vmem:[%s957_s21] sm:$0xff]  ;;  %s1822_s21 = scalar_lea.vmem %s1879_s5, %s1295_s19 }
 0xd7b   : > { %v867_v40 = vpack.c.bf16 %v861_v38, %v861_v38  ;;  %s583_s22 = scalar_lea.vmem %s1822_s21, %s1270_s26  ;;  %s675_s12 = scalar_lea.vmem %s1822_s21, %s1273_s29 }
 0xd7c   : > { %s951_s25 = scalar_lea.vmem %s1822_s21, %s1282_s14  ;;  %s1135_s26 = scalar_lea.vmem %s1822_s21, %s1288_s30 }
 0xd7d   : > { %869 = vrot.lane.b32.xlu1 %v867_v40, %s1497_s24 }
 0xdef   : > { %v870_v42 = vpop.permute.xlu1 %869 }
 0xdf0   : > { %1380 = vmatmul.mubr.msk.bf16.vlgmr.msra.gmra.mrb[12].mxu1 %vm411_vm4, %v870_v42  ;;  %v1050_v42 = vld [vmem:[%s1049_s8] sm:$0xff]  ;;  %s492_s8 = scalar_lea.vmem %s1822_s21, %s1266_s20  ;;  %s767_s20 = scalar_lea.vmem %s1822_s21, %s1276_s7 }
 0xdf1   : > { %1392 = vmatpush3.bf16.msra.mxu1 %v1559_v4  ;;  %1395 = vmatprep.mubr.msk.bf16.mxu1 %vm1494_vm1, %v1493_v1 }
 0xdf2   : > { %1393 = vmatprep.subr.bf16.mxu1 %v1493_v1 }
 0xdf5   : > { %1394 = vmatpush3.bf16.msra.mxu1 %v1567_v7  ;;  %v941_v7 = vsel %vm940_vm13, 1, %v1495_v2 }
 0xec3   : > { %v908_v44 = vpop.f32.mrb[12].mxu1 }
 0xec4   : > { %v914_v45 = vadd.f32 %v908_v44, %v866_v43  ;;  %v1381_v4 = vpop.f32.mrb[13].mxu1 }
 0xec5   : > { %v911_v46 = vpop.f32.mrb[14].mxu1 }
 0xec6   : > { %1461 = vtanh.f32 %v914_v45  ;;  %v1382_v47 = vpop.f32.mrb[15].mxu1  ;;  %v1284_v50 = vmul.f32 -1.442695, %v914_v45 }
 0xec7   : > { %v1123_v47 = vstv %s1796_s27 }
 0xec8   : > { %1463 = vpow2.f32 %v1284_v50  ;;  %vm1124_vm1 = vcmp.gt.s32.totalorder %v1601_v9, %v1123_v47  ;;  %v854_v9 = vsel %vm853_vm12, %v1738_v37, 0.0 }
 0xed0   : > { %v1462_v1 = vpop.eup %1461 }
 0xed1   : > { %924 = vrot.lane.b32.xlu0 %v1462_v1, %s1496_s23  ;;  %v1125_v1 = vsel %vm1124_vm1, 1, %v1495_v2 }
 0xed2   : > { %v1464_v51 = vpop.eup %1463 }
 0xed3   : > { %v918_v52 = vadd.f32 1.0, %v1464_v51 }
 0xed5   : > { %943 = vperm.xlu0 %1413, %v941_v7   ;;  %1465 = vrcp.f32 %v918_v52  ;;  %v670_v7 = vsel %vm669_vm8, %v1677_v41, 0.0 }
 0xedf   : > { %v1466_v53 = vpop.eup %1465 }
 0xee0   : > { %v922_v57 = vmul.f32 %v1466_v53, %v862_v56 }
 0xf43   : > { %v925_v54 = vpop.permute.xlu0 %924 }
 0xf44   : > { %v927_v55 = vmul.f32 %v1466_v53, %v925_v54 }
 0xf46   : > { %929 = vrot.lane.b32.xlu1 %v927_v55, %s1497_s24 }
 0xf54   : > { %v1766_v61 = vpop.permute.xlu0 %943 }
 0xf55   : > { %vm945_vm14 = vcmp.eq.s32.totalorder %v1766_v61, 1 }
 0xfb8   : > { %v930_v58 = vpop.permute.xlu1 %929 }
 0xfb9   : > { %v932_v59 = vadd.f32 %v930_v58, %v922_v57  ;;  %v578_v58 = vsel %vm577_vm6, %v1645_v15, 0.0 }
 0xfbb   : > { %1467 = vtanh.f32 %v932_v59  ;;  %v954_v27 = vsel %vm945_vm14, %v932_v59, %v862_v56  ;;  %v762_v59 = vsel %vm761_vm10, %v1708_v8, 0.0 }
 0xfc5   : > { %v1468_v60 = vpop.eup %1467 }
 0xfc6   : > { %935 = vrot.lane.b32.xlu1 %v1468_v60, %s1496_s23 }
0x1038   : > { %v936_v62 = vpop.permute.xlu1 %935 }
0x1039   : > { %v1768_v63 = vmul.f32 %v1466_v53, %v936_v62 }
0x103b   : > { %v953_v0 = vsel %vm945_vm14, %v1768_v63, %v861_v38  ;;  %v946_v60 = vsel %vm945_vm14, %v1768_v63, 0.0 }
0x103c   : > { %v959_v3 = vpack.c.bf16 %v953_v0, %v953_v0 }
0x103e   : > { %961 = vrot.lane.b32.xlu0 %v959_v3, %s1497_s24 }
0x10b0   : > { %v962_v6 = vpop.permute.xlu0 %961 }
0x10b1   : > { %1388 = vmatmul.mubr.msk.bf16.vlgmr.msra.gmra.mrb[16].mxu0 %vm411_vm4, %v962_v6 }
0x1184   : > { %v1000_v11 = vpop.f32.mrb[16].mxu0 }
0x1185   : > { %v1006_v12 = vadd.f32 %v1000_v11, %v958_v10  ;;  %v1389_v14 = vpop.f32.mrb[17].mxu0 }
0x1186   : > { %v1003_v16 = vpop.f32.mrb[18].mxu0 }
0x1187   : > { %1469 = vtanh.f32 %v1006_v12  ;;  %v1390_v17 = vpop.f32.mrb[19].mxu0  ;;  %v1287_v21 = vmul.f32 -1.442695, %v1006_v12 }
0x1189   : > { %1471 = vpow2.f32 %v1287_v21 }
0x1191   : > { %v1470_v19 = vpop.eup %1469 }
0x1192   : > { %1016 = vrot.lane.b32.xlu1 %v1470_v19, %s1496_s23 }
0x1193   : > { %v1472_v22 = vpop.eup %1471 }
0x1194   : > { %v1010_v23 = vadd.f32 1.0, %v1472_v22 }
0x1196   : > { %1035 = vperm.xlu1 %1412, %v1033_v20   ;;  %1473 = vrcp.f32 %v1010_v23 }
0x11a0   : > { %v1474_v24 = vpop.eup %1473 }
0x11a1   : > { %v1014_v28 = vmul.f32 %v1474_v24, %v954_v27 }
0x1204   : > { %v1017_v25 = vpop.permute.xlu1 %1016 }
0x1205   : > { %v1019_v26 = vmul.f32 %v1474_v24, %v1017_v25 }
0x1207   : > { %1021 = vrot.lane.b32.xlu0 %v1019_v26, %s1497_s24 }
0x1215   : > { %v1036_v32 = vpop.permute.xlu1 %1035 }
0x1216   : > { %vm1037_vm0 = vcmp.eq.s32.totalorder %v1036_v32, 1 }
0x1279   : > { %v1022_v29 = vpop.permute.xlu0 %1021 }
0x127a   : > { %v1024_v30 = vadd.f32 %v1022_v29, %v1014_v28 }
0x127c   : > { %1475 = vtanh.f32 %v1024_v30  ;;  %v1046_v53 = vsel %vm1037_vm0, %v1024_v30, %v954_v27 }
0x1286   : > { %v1476_v31 = vpop.eup %1475 }
0x1287   : > { %1027 = vrot.lane.b32.xlu0 %v1476_v31, %s1496_s23 }
0x12f9   : > { %v1028_v33 = vpop.permute.xlu0 %1027 }
0x12fa   : > { %v1030_v34 = vmul.f32 %v1474_v24, %v1028_v33 }
0x12fc   : > { %v1045_v36 = vsel %vm1037_vm0, %v1030_v34, %v953_v0  ;;  %v1038_v2 = vsel %vm1037_vm0, %v1030_v34, 0.0 }
0x12fd   : > { %v1051_v38 = vpack.c.bf16 %v1045_v36, %v1045_v36 }
0x12ff   : > { %1053 = vrot.lane.b32.xlu1 %v1051_v38, %s1497_s24 }
0x1371   : > { %v1054_v40 = vpop.permute.xlu1 %1053 }
0x1372   : > { %1396 = vmatmul.mubr.msk.bf16.vlgmr.msra.gmra.mrb[16].mxu1 %vm411_vm4, %v1054_v40 }
0x1445   : > { %v1092_v43 = vpop.f32.mrb[16].mxu1 }
0x1446   : > { %v1098_v44 = vadd.f32 %v1092_v43, %v1050_v42  ;;  %v1397_v45 = vpop.f32.mrb[17].mxu1 }
0x1447   : > { %v1095_v4 = vpop.f32.mrb[18].mxu1 }
0x1448   : > { %1477 = vtanh.f32 %v1098_v44  ;;  %v1398_v46 = vpop.f32.mrb[19].mxu1  ;;  %v1290_v50 = vmul.f32 -1.442695, %v1098_v44 }
0x144a   : > { %1479 = vpow2.f32 %v1290_v50 }
0x1452   : > { %v1478_v48 = vpop.eup %1477 }
0x1453   : > { %1108 = vrot.lane.b32.xlu0 %v1478_v48, %s1496_s23 }
0x1457   : > { %1127 = vperm.xlu0 %1413, %v1125_v1  }
0x145b   : > { %489 = vrot.lane.b32.xlu0 %v1617_v49, %s1497_s24  ;;  %v1480_v49 = vpop.eup %1479 }
0x145c   : > { %v1102_v51 = vadd.f32 1.0, %v1480_v49 }
0x145e   : > { %1481 = vrcp.f32 %v1102_v51 }
0x145f   : > { %672 = vrot.lane.b32.xlu0 %v670_v7, %s1497_s24 }
0x1463   : > { %856 = vrot.lane.b32.xlu0 %v854_v9, %s1497_s24 }
0x1467   : > { %1040 = vrot.lane.b32.xlu0 %v1038_v2, %s1497_s24 }
0x1468   : > { %v1482_v39 = vpop.eup %1481 }
0x1469   : > { %v1106_v54 = vmul.f32 %v1482_v39, %v1046_v53 }
0x14c5   : > { %v1109_v41 = vpop.permute.xlu0 %1108 }
0x14c6   : > { %v1111_v52 = vmul.f32 %v1482_v39, %v1109_v41 }
0x14c8   : > { %1113 = vrot.lane.b32.xlu1 %v1111_v52, %s1497_s24 }
0x14d6   : > { %v1128_v35 = vpop.permute.xlu0 %1127 }
0x14d7   : > { %vm1129_vm2 = vcmp.eq.s32.totalorder %v1128_v35, 1 }
0x14da   : > { %v490_v37 = vpop.permute.xlu0 %489 }
0x14db   : > { %493 = vst.msk [vmem:[%s492_s8] sm:$0xff] %vm411_vm4, %v490_v37 }
0x14de   : > { %v673_v15 = vpop.permute.xlu0 %672 }
0x14e2   : > { %v857_v61 = vpop.permute.xlu0 %856 }
0x14e6   : > { %v1041_v3 = vpop.permute.xlu0 %1040 }
0x153a   : > { %v1114_v55 = vpop.permute.xlu1 %1113 }
0x153b   : > { %v1116_v56 = vadd.f32 %v1114_v55, %v1106_v54 }
0x153d   : > { %1483 = vtanh.f32 %v1116_v56 }
0x1547   : > { %v1484_v57 = vpop.eup %1483 }
0x1548   : > { %1119 = vrot.lane.b32.xlu1 %v1484_v57, %s1496_s23  ;;  %s859_s23 = scalar_lea.vmem %s1822_s21, %s1279_s10 }
0x154c   : > { %580 = vrot.lane.b32.xlu1 %v578_v58, %s1497_s24 }
0x1550   : > { %764 = vrot.lane.b32.xlu1 %v762_v59, %s1497_s24 }
0x1554   : > { %948 = vrot.lane.b32.xlu1 %v946_v60, %s1497_s24 }
0x15ba   : > { %v1120_v13 = vpop.permute.xlu1 %1119 }
0x15bb   : > { %v1122_v62 = vmul.f32 %v1482_v39, %v1120_v13 }
0x15bd   : > { %v1130_v5 = vsel %vm1129_vm2, %v1122_v62, 0.0 }
0x15be   : > { %1132 = vrot.lane.b32.xlu1 %v1130_v5, %s1497_s24  ;;  %v581_v8 = vpop.permute.xlu1 %580  ;;  %s1043_s24 = scalar_lea.vmem %s1822_s21, %s1285_s17 }
0x15bf   : > { %584 = vst.msk [vmem:[%s583_s22] sm:$0xff] %vm411_vm4, %v581_v8 }
0x15c0   : > { %676 = vst.msk [vmem:[%s675_s12] sm:$0xff] %vm411_vm4, %v673_v15 }
0x15c2   : > { %v765_v63 = vpop.permute.xlu1 %764 }
0x15c3   : > { %768 = vst.msk [vmem:[%s767_s20] sm:$0xff] %vm411_vm4, %v765_v63 }
0x15c4   : > { %860 = vst.msk [vmem:[%s859_s23] sm:$0xff] %vm411_vm4, %v857_v61 }
0x15c6   : > { %v949_v0 = vpop.permute.xlu1 %948 }
0x15c7   : > { %952 = vst.msk [vmem:[%s951_s25] sm:$0xff] %vm411_vm4, %v949_v0 }
0x15c8   : > { %1044 = vst.msk [vmem:[%s1043_s24] sm:$0xff] %vm411_vm4, %v1041_v3 }
0x1630   : > { %v1133_v6 = vpop.permute.xlu1 %1132 }
0x1631   : > { %1136 = vst.msk [vmem:[%s1135_s26] sm:$0xff] %vm411_vm4, %v1133_v6 }
0x1632 PF: > { %s15_s18 = sadd.s32 1, %s1491_s18  }
0x1633   : > { %p12_p5 = scmp.ge.s32.totalorder %s15_s18, 4  }
0x1635   :  { %14 = sbr.rel (!%p12_p5) target bundleno = 1 (0x1), region = 92 }

// kernel: bidirection_rnn_forward.4
= control target key start
LH: loop header
LB: loop body
LE: loop exit
PB: predicated region body
PF: predicated region fallthrough
CT: control target
= control target key end

     0   :  { %s1567_s18 = smov 0   ;;  %s1913_s0 = inlined_call_operand.vmem [shape: s32[8,1], index: 0, kind: input, shape index: {}]   ;;  %s1914_s1 = inlined_call_operand.vmem [shape: bf16[64,64], index: 1, kind: input, shape index: {}]   ;;  %s1915_s2 = inlined_call_operand.vmem [shape: bf16[2,64,128], index: 2, kind: input, shape index: {}]   ;;  %s1916_s3 = inlined_call_operand.vmem [shape: bf16[2,32,128], index: 3, kind: input, shape index: {}]   ;;  %s1917_s4 = inlined_call_operand.vmem [shape: f32[2,1,128], index: 4, kind: input, shape index: {}]   ;;  %s1918_s5 = inlined_call_operand.vmem [shape: f32[2,8,8,32], index: 5, kind: output, shape index: {}]  }
   0x1 LB: > { %s1573_s19 = sadd.s32 4294967295, %s1530_s18   ;;  %p1273_p0 = scmp.ge.s32.totalorder %s1530_s18, 1  ;;  %s1530_s18 = sphi %s1567_s18, %s15_s18  }
   0x2   : > { %p205_p1 = scmp.lt.s32.totalorder %s1530_s18, 3 }
   0x4   : > { %p206_p2 = pnand %p1273_p0, %p205_p1 }
   0x5   : > { %p241_p3 = scmp.lt.s32.totalorder (!%p206_p2), %s1573_s19, 1  ;;  %v1454_v0 = vld [vmem:[%s1914_s1] sm:$0xff] (!%p206_p2)   ;;  %vm327_vm0 = vcmask (!%p206_p2), 523264   ;;  %v1532_v1 = vmov (!%p206_p2), 0.0   ;;  %vm1533_vm1 = vmmov (!%p206_p2), 0   ;;  %v1534_v2 = vmov (!%p206_p2), 0  }
   0x6   : > { %209 = sbr.rel (%p206_p2) target bundleno = 5694 (0x163e), region = 40  ;;  %1363 = vmatprep.mubr.msk.bf16.mxu0 (!%p206_p2), %vm327_vm0, %v1454_v0  ;;  %1371 = vmatprep.subr.bf16.mxu1 (!%p206_p2), %v1532_v1  ;;  %v1455_v9 = vld [vmem:[%s1914_s1 + $0x8] sm:$0xff] (!%p206_p2)   ;;  %v1456_v10 = vld [vmem:[%s1914_s1 + $0x10] sm:$0xff] (!%p206_p2)   ;;  %v1457_v11 = vld [vmem:[%s1914_s1 + $0x18] sm:$0xff] (!%p206_p2)   ;;  %p418_p4 = scmp.eq.s32.totalorder (!%p206_p2), %s1573_s19, 1  ;;  %vm435_vm4 = vcmask (!%p206_p2), 261120  }
   0x7   : > { %1375 = vmatprep.mubr.msk.bf16.mxu1 (!%p206_p2), %vm1533_vm1, %v1532_v1  ;;  %1448 = vset.pattern.permute.xlu1 (!%p206_p2), %v1534_v2  ;;  %v1640_v12 = vld [vmem:[%s1913_s0] sm:$0xff] (!%p206_p2) }
   0x8   : > { %1449 = vset.pattern.permute.xlu0 (!%p206_p2), %v1534_v2 }
   0xd   : > { %s1582_s22 = scalar_select %p241_p3, %s1573_s19, 1 }
   0xe   : > { %s1635_s12 = scalar_select %p418_p4, 7, 0 }
   0xf   : > { %s1320_s23 = sshll.u32 %s1582_s22, 5  ;;  %s1321_s24 = sshll.u32 %s1582_s22, 4 }
  0x10   : > { %s245_s27 = scalar_lea.vmem %s1915_s2, %s1320_s23  ;;  %s250_s30 = scalar_lea.vmem %s1916_s3, %s1321_s24  ;;  %v504_v13 = vstv %s1635_s12 }
  0x11   : > { %v1450_v3 = vld [vmem:[%s245_s27] sm:$0xff]   ;;  %v1451_v4 = vld [vmem:[%s245_s27 + $0x8] sm:$0xff]   ;;  %v1452_v5 = vld [vmem:[%s245_s27 + $0x10] sm:$0xff]   ;;  %vm505_vm2 = vcmp.gt.s32.totalorder %v1640_v12, %v504_v13  ;;  %s253_s17 = scalar_lea.vmem %s1917_s4, %s1582_s22  ;;  %s1293_s20 = sshll.u32 %s1635_s12, 3 }
  0x12   : > { %1355 = vmatprep.subr.bf16.mxu0 %v1450_v3  ;;  %v1598_v6 = vld [vmem:[%s250_s30] sm:$0xff]   ;;  %v1601_v7 = vld [vmem:[%s250_s30 + $0x8] sm:$0xff]   ;;  %v1453_v8 = vld [vmem:[%s245_s27 + $0x18] sm:$0xff]   ;;  %v506_v14 = vsel %vm505_vm2, 1, %v1534_v2  ;;  %s421_s21 = scalar_lea.vmem [#allocation2], %s1293_s20  ;;  %s1535_s23 = smov 64  }
  0x13   : > { %1356 = vmatpush3.bf16.msra.mxu0 %v1450_v3  ;;  %1372 = vmatpush3.bf16.msra.mxu1 %v1598_v6  ;;  %v1280_v18 = vld [vmem:[%s253_s17] ss:$0 sm:$0xff]  ;;  %s1536_s24 = smov 32   ;;  %s1322_s19 = sshll.u32 %s1582_s22, 6 }
  0x14   : > { %1357 = vmatprep.subr.bf16.mxu0 %v1451_v4  ;;  %1373 = vmatprep.subr.bf16.mxu1 %v1532_v1  ;;  %s1670_s25 = scalar_select %p418_p4, 6, 1 }
  0x15   : > { %508 = vperm.xlu1 %1448, %v506_v14   ;;  %s1701_s28 = scalar_select %p418_p4, 5, 2 }
  0x16   : > { %s1297_s26 = sshll.u32 %s1670_s25, 3  ;;  %v595_v61 = vstv %s1670_s25 }
  0x17   : > { %1358 = vmatpush3.bf16.msra.mxu0 %v1451_v4  ;;  %1374 = vmatpush3.bf16.msra.mxu1 %v1601_v7  ;;  %s521_s27 = scalar_lea.vmem [#allocation2], %s1297_s26  ;;  %vm596_vm5 = vcmp.gt.s32.totalorder %v1640_v12, %v595_v61  ;;  %s1300_s29 = sshll.u32 %s1701_s28, 3 }
  0x18   : > { %1359 = vmatprep.subr.bf16.mxu0 %v1452_v5  ;;  %1379 = vmatprep.subr.bf16.mxu1 %v1532_v1  ;;  %v597_v63 = vsel %vm596_vm5, 1, %v1534_v2  ;;  %s613_s30 = scalar_lea.vmem [#allocation2], %s1300_s29 }
  0x19   : > { %s1732_s6 = scalar_select %p418_p4, 4, 3 }
  0x1a   : > { %1376 = vmatmul.mubr.bf16.vlgmr.msra.gmra.mrb[0].mxu1 %v1534_v2  ;;  %s1762_s9 = scalar_select %p418_p4, 3, 4 }
  0x1b   : > { %1360 = vmatpush3.bf16.msra.mxu0 %v1452_v5  ;;  %1380 = vmatpush3.bf16.msra.mxu1 %v1598_v6  ;;  %s1303_s7 = sshll.u32 %s1732_s6, 3 }
  0x1c   : > { %1361 = vmatprep.subr.bf16.mxu0 %v1453_v8  ;;  %1383 = vmatprep.mubr.msk.bf16.mxu1 %vm1533_vm1, %v1532_v1  ;;  %s705_s8 = scalar_lea.vmem [#allocation2], %s1303_s7  ;;  %s1306_s10 = sshll.u32 %s1762_s9, 3 }
  0x1d   : > { %1381 = vmatprep.subr.bf16.mxu1 %v1532_v1  ;;  %s797_s11 = scalar_lea.vmem [#allocation2], %s1306_s10 }
  0x1e   : > { %s1792_s13 = scalar_select %p418_p4, 2, 5 }
  0x1f   : > { %1362 = vmatpush3.bf16.msra.mxu0 %v1453_v8  ;;  %1382 = vmatpush3.bf16.msra.mxu1 %v1601_v7  ;;  %s1817_s16 = scalar_select %p418_p4, 1, 6 }
  0x20   : > { %1395 = vmatprep.subr.bf16.mxu0 %v1532_v1  ;;  %1387 = vmatprep.subr.bf16.mxu1 %v1532_v1  ;;  %s1309_s14 = sshll.u32 %s1792_s13, 3 }
  0x21   : > { %s889_s15 = scalar_lea.vmem [#allocation2], %s1309_s14  ;;  %s1312_s17 = sshll.u32 %s1817_s16, 3 }
  0x22   : > { %1364 = vmatmul.mubr.msk.bf16.vlgmr.msra.gmra.mrb[0].mxu0 %vm327_vm0, %v1455_v9 }
  0x23   : > { %1367 = vmatprep.mubr.msk.bf16.mxu0 %vm327_vm0, %v1456_v10  ;;  %1396 = vmatpush3.bf16.msra.mxu0 %v1598_v6 }
  0x24   : > { %1397 = vmatprep.subr.bf16.mxu0 %v1532_v1 }
  0x27   : > { %1398 = vmatpush3.bf16.msra.mxu0 %v1601_v7 }
  0x28   : > { %1411 = vmatprep.subr.bf16.mxu0 %v1532_v1 }
  0x2a   : > { %1368 = vmatmul.mubr.msk.bf16.gmra.mrb[4].mxu0 %vm327_vm0, %v1457_v11 }
  0x2b   : > { %1399 = vmatprep.mubr.msk.bf16.mxu0 %vm1533_vm1, %v1532_v1 }
  0x94   : > { %v509_v49 = vpop.permute.xlu1 %508 }
  0x95   : > { %vm510_vm3 = vcmp.eq.s32.totalorder %v509_v49, 1 }
  0xed   : > { %v473_v15 = vpop.f32.mrb[0].mxu1 }
  0xee   : > { %v1377_v16 = vpop.f32.mrb[1].mxu1 }
  0xef   : > { %v476_v17 = vpop.f32.mrb[2].mxu1 }
  0xf0   : > { %v1378_v19 = vpop.f32.mrb[3].mxu1 }
  0xf5   : > { %v1365_v20 = vpop.f32.mrb[0].mxu0 }
  0xf6   : > { %v383_v21 = vadd.f32 %v1365_v20, %v1280_v18  ;;  %v374_v22 = vpop.f32.mrb[1].mxu0 }
  0xf7   : > { %v375_v23 = vadd.f32 %v1280_v18, %v374_v22  ;;  %v1366_v24 = vpop.f32.mrb[2].mxu0 }
  0xf8   : > { %407 = vst [vmem:[#allocation2 + $0x10] sm:$0xff] %v383_v21  ;;  %v386_v25 = vadd.f32 %v1366_v24, %v1280_v18  ;;  %v377_v26 = vpop.f32.mrb[3].mxu0 }
  0xf9   : > { %405 = vst [vmem:[#allocation2] sm:$0xff] %v375_v23  ;;  %v378_v27 = vadd.f32 %v1280_v18, %v377_v26 }
  0xfa   : > { %408 = vst [vmem:[#allocation2 + $0x18] sm:$0xff] %v386_v25 }
  0xfb   : > { %406 = vst [vmem:[#allocation2 + $0x8] sm:$0xff] %v378_v27 }
  0xfd   : > { %v1369_v28 = vpop.f32.mrb[4].mxu0 }
  0xfe   : > { %v399_v29 = vadd.f32 %v1369_v28, %v1280_v18  ;;  %v390_v30 = vpop.f32.mrb[5].mxu0  ;;  %v687_v28 = vstv %s1701_s28 }
  0xff   : > { %v391_v31 = vadd.f32 %v1280_v18, %v390_v30  ;;  %v1370_v32 = vpop.f32.mrb[6].mxu0  ;;  %vm688_vm7 = vcmp.gt.s32.totalorder %v1640_v12, %v687_v28 }
 0x100   : > { %411 = vst [vmem:[#allocation2 + $0x30] sm:$0xff] %v399_v29  ;;  %v402_v33 = vadd.f32 %v1370_v32, %v1280_v18  ;;  %v393_v34 = vpop.f32.mrb[7].mxu0  ;;  %v689_v30 = vsel %vm688_vm7, 1, %v1534_v2 }
 0x101   : > { %409 = vst [vmem:[#allocation2 + $0x20] sm:$0xff] %v391_v31  ;;  %v394_v35 = vadd.f32 %v1280_v18, %v393_v34 }
 0x102   : > { %412 = vst [vmem:[#allocation2 + $0x38] sm:$0xff] %v402_v33 }
 0x103   : > { %410 = vst [vmem:[#allocation2 + $0x28] sm:$0xff] %v394_v35 }
 0x10a   : > { %v422_v36 = vld [vmem:[%s421_s21] sm:$0xff]  ;;  %s981_s21 = scalar_lea.vmem [#allocation2], %s1312_s17 }
 0x10b   : > { %v479_v37 = vadd.f32 %v473_v15, %v422_v36  ;;  %v522_v55 = vld [vmem:[%s521_s27] sm:$0xff]  ;;  %s1835_s27 = scalar_select %p418_p4, 0, 7 }
 0x10c   : > { %v614_v22 = vld [vmem:[%s613_s30] sm:$0xff] }
 0x10d   : > { %1460 = vtanh.f32 %v479_v37  ;;  %v1296_v39 = vmul.f32 -1.442695, %v479_v37  ;;  %s1315_s30 = sshll.u32 %s1835_s27, 3 }
 0x10f   : > { %1462 = vpow2.f32 %v1296_v39 }
 0x117   : > { %v1461_v38 = vpop.eup %1460 }
 0x118   : > { %489 = vrot.lane.b32.xlu0 %v1461_v38, %s1535_s23 }
 0x119   : > { %v1463_v40 = vpop.eup %1462 }
 0x11a   : > { %v483_v41 = vadd.f32 1.0, %v1463_v40 }
 0x11c   : > { %1464 = vrcp.f32 %v483_v41 }
 0x126   : > { %v1465_v42 = vpop.eup %1464 }
 0x127   : > { %v487_v45 = vmul.f32 0.0, %v1465_v42 }
 0x18a   : > { %v490_v43 = vpop.permute.xlu0 %489 }
 0x18b   : > { %v492_v44 = vmul.f32 %v1465_v42, %v490_v43 }
 0x18d   : > { %494 = vrot.lane.b32.xlu0 %v492_v44, %s1536_s24 }
 0x1ff   : > { %v495_v46 = vpop.permute.xlu0 %494 }
 0x200   : > { %v497_v47 = vadd.f32 %v495_v46, %v487_v45 }
 0x202   : > { %1466 = vtanh.f32 %v497_v47  ;;  %v518_v10 = vsel %vm510_vm3, %v497_v47, 0.0 }
 0x20c   : > { %v1467_v48 = vpop.eup %1466 }
 0x20d   : > { %500 = vrot.lane.b32.xlu1 %v1467_v48, %s1535_s23  ;;  %v706_v48 = vld [vmem:[%s705_s8] sm:$0xff]  ;;  %s1073_s8 = scalar_lea.vmem [#allocation2], %s1315_s30 }
 0x27f   : > { %v501_v50 = vpop.permute.xlu1 %500 }
 0x280   : > { %v503_v51 = vmul.f32 %v1465_v42, %v501_v50 }
 0x282   : > { %v1656_v52 = vsel %vm510_vm3, %v503_v51, 0.0 }
 0x283   : > { %v523_v53 = vpack.c.bf16 %v1656_v52, %v1656_v52 }
 0x285   : > { %525 = vrot.lane.b32.xlu0 %v523_v53, %s1536_s24 }
 0x2f7   : > { %v526_v54 = vpop.permute.xlu0 %525 }
 0x2f8   : > { %1384 = vmatmul.mubr.msk.bf16.vlgmr.msra.gmra.mrb[4].mxu1 %vm435_vm4, %v526_v54 }
 0x2f9   : > { %1388 = vmatpush3.bf16.msra.mxu1 %v1598_v6  ;;  %1391 = vmatprep.mubr.msk.bf16.mxu1 %vm1533_vm1, %v1532_v1 }
 0x2fa   : > { %1389 = vmatprep.subr.bf16.mxu1 %v1532_v1 }
 0x2fd   : > { %1390 = vmatpush3.bf16.msra.mxu1 %v1601_v7 }
 0x2fe   : > { %1403 = vmatprep.subr.bf16.mxu1 %v1532_v1 }
 0x3cb   : > { %v564_v56 = vpop.f32.mrb[4].mxu1 }
 0x3cc   : > { %v570_v57 = vadd.f32 %v564_v56, %v522_v55  ;;  %v1385_v58 = vpop.f32.mrb[5].mxu1  ;;  %v779_v55 = vstv %s1732_s6 }
 0x3cd   : > { %v567_v59 = vpop.f32.mrb[6].mxu1  ;;  %vm780_vm9 = vcmp.gt.s32.totalorder %v1640_v12, %v779_v55 }
 0x3ce   : > { %1468 = vtanh.f32 %v570_v57  ;;  %v1386_v60 = vpop.f32.mrb[7].mxu1  ;;  %v1299_v0 = vmul.f32 -1.442695, %v570_v57  ;;  %v781_v57 = vsel %vm780_vm9, 1, %v1534_v2 }
 0x3d0   : > { %1470 = vpow2.f32 %v1299_v0 }
 0x3d8   : > { %v1469_v62 = vpop.eup %1468 }
 0x3d9   : > { %580 = vrot.lane.b32.xlu1 %v1469_v62, %s1535_s23 }
 0x3da   : > { %v1471_v3 = vpop.eup %1470 }
 0x3db   : > { %v574_v4 = vadd.f32 1.0, %v1471_v3 }
 0x3dd   : > { %599 = vperm.xlu1 %1448, %v597_v63   ;;  %1472 = vrcp.f32 %v574_v4 }
 0x3e7   : > { %v1473_v5 = vpop.eup %1472 }
 0x3e8   : > { %v578_v11 = vmul.f32 %v1473_v5, %v518_v10 }
 0x44b   : > { %v581_v8 = vpop.permute.xlu1 %580 }
 0x44c   : > { %v583_v9 = vmul.f32 %v1473_v5, %v581_v8 }
 0x44e   : > { %585 = vrot.lane.b32.xlu0 %v583_v9, %s1536_s24 }
 0x45c   : > { %v1682_v16 = vpop.permute.xlu1 %599 }
 0x45d   : > { %vm601_vm6 = vcmp.eq.s32.totalorder %v1682_v16, 1 }
 0x4c0   : > { %v586_v13 = vpop.permute.xlu0 %585 }
 0x4c1   : > { %v588_v14 = vadd.f32 %v586_v13, %v578_v11 }
 0x4c3   : > { %1474 = vtanh.f32 %v588_v14  ;;  %v610_v37 = vsel %vm601_vm6, %v588_v14, %v518_v10 }
 0x4cd   : > { %v1475_v15 = vpop.eup %1474 }
 0x4ce   : > { %591 = vrot.lane.b32.xlu0 %v1475_v15, %s1535_s23 }
 0x540   : > { %v592_v17 = vpop.permute.xlu0 %591 }
 0x541   : > { %v1684_v18 = vmul.f32 %v1473_v5, %v592_v17  ;;  %v798_v17 = vld [vmem:[%s797_s11] sm:$0xff] }
 0x543   : > { %v609_v19 = vsel %vm601_vm6, %v1684_v18, %v1656_v52 }
 0x544   : > { %v615_v20 = vpack.c.bf16 %v609_v19, %v609_v19 }
 0x546   : > { %617 = vrot.lane.b32.xlu1 %v615_v20, %s1536_s24 }
 0x5b8   : > { %v618_v21 = vpop.permute.xlu1 %617 }
 0x5b9   : > { %1392 = vmatmul.mubr.msk.bf16.vlgmr.msra.gmra.mrb[8].mxu1 %vm435_vm4, %v618_v21 }
 0x5ba   : > { %1404 = vmatpush3.bf16.msra.mxu1 %v1598_v6  ;;  %1407 = vmatprep.mubr.msk.bf16.mxu1 %vm1533_vm1, %v1532_v1 }
 0x5bb   : > { %1405 = vmatprep.subr.bf16.mxu1 %v1532_v1 }
 0x5be   : > { %1406 = vmatpush3.bf16.msra.mxu1 %v1601_v7 }
 0x5bf   : > { %1419 = vmatprep.subr.bf16.mxu1 %v1532_v1 }
 0x68c   : > { %v656_v23 = vpop.f32.mrb[8].mxu1 }
 0x68d   : > { %v662_v24 = vadd.f32 %v656_v23, %v614_v22  ;;  %v1393_v25 = vpop.f32.mrb[9].mxu1 }
 0x68e   : > { %v659_v26 = vpop.f32.mrb[10].mxu1 }
 0x68f   : > { %1476 = vtanh.f32 %v662_v24  ;;  %v1394_v27 = vpop.f32.mrb[11].mxu1  ;;  %v1302_v31 = vmul.f32 -1.442695, %v662_v24  ;;  %v871_v24 = vstv %s1762_s9 }
 0x690   : > { %vm872_vm11 = vcmp.gt.s32.totalorder %v1640_v12, %v871_v24 }
 0x691   : > { %1478 = vpow2.f32 %v1302_v31  ;;  %v873_v26 = vsel %vm872_vm11, 1, %v1534_v2 }
 0x699   : > { %v1477_v29 = vpop.eup %1476 }
 0x69a   : > { %672 = vrot.lane.b32.xlu0 %v1477_v29, %s1535_s23 }
 0x69b   : > { %v1479_v32 = vpop.eup %1478 }
 0x69c   : > { %v666_v33 = vadd.f32 1.0, %v1479_v32 }
 0x69e   : > { %691 = vperm.xlu0 %1449, %v689_v30   ;;  %1480 = vrcp.f32 %v666_v33 }
 0x6a8   : > { %v1481_v34 = vpop.eup %1480 }
 0x6a9   : > { %v670_v38 = vmul.f32 %v1481_v34, %v610_v37 }
 0x70c   : > { %v673_v35 = vpop.permute.xlu0 %672 }
 0x70d   : > { %v675_v36 = vmul.f32 %v1481_v34, %v673_v35 }
 0x70f   : > { %677 = vrot.lane.b32.xlu1 %v675_v36, %s1536_s24 }
 0x71d   : > { %v1714_v42 = vpop.permute.xlu0 %691 }
 0x71e   : > { %vm693_vm8 = vcmp.eq.s32.totalorder %v1714_v42, 1 }
 0x781   : > { %v678_v39 = vpop.permute.xlu1 %677 }
 0x782   : > { %v680_v40 = vadd.f32 %v678_v39, %v670_v38 }
 0x784   : > { %1482 = vtanh.f32 %v680_v40  ;;  %v702_v0 = vsel %vm693_vm8, %v680_v40, %v610_v37 }
 0x78e   : > { %v1483_v41 = vpop.eup %1482 }
 0x78f   : > { %683 = vrot.lane.b32.xlu1 %v1483_v41, %s1535_s23 }
 0x801   : > { %v684_v43 = vpop.permute.xlu1 %683 }
 0x802   : > { %v1716_v44 = vmul.f32 %v1481_v34, %v684_v43 }
 0x804   : > { %v701_v45 = vsel %vm693_vm8, %v1716_v44, %v609_v19 }
 0x805   : > { %v707_v46 = vpack.c.bf16 %v701_v45, %v701_v45 }
 0x807   : > { %709 = vrot.lane.b32.xlu1 %v707_v46, %s1536_s24  ;;  %v890_v46 = vld [vmem:[%s889_s15] sm:$0xff] }
 0x879   : > { %v710_v47 = vpop.permute.xlu1 %709 }
 0x87a   : > { %1400 = vmatmul.mubr.msk.bf16.vlgmr.msra.gmra.mrb[8].mxu0 %vm435_vm4, %v710_v47 }
 0x87b   : > { %1412 = vmatpush3.bf16.msra.mxu0 %v1598_v6  ;;  %1415 = vmatprep.mubr.msk.bf16.mxu0 %vm1533_vm1, %v1532_v1 }
 0x87c   : > { %1413 = vmatprep.subr.bf16.mxu0 %v1532_v1 }
 0x87f   : > { %1414 = vmatpush3.bf16.msra.mxu0 %v1601_v7 }
 0x880   : > { %1427 = vmatprep.subr.bf16.mxu0 %v1532_v1 }
 0x94d   : > { %v748_v49 = vpop.f32.mrb[8].mxu0 }
 0x94e   : > { %v754_v50 = vadd.f32 %v748_v49, %v706_v48  ;;  %v1401_v51 = vpop.f32.mrb[9].mxu0 }
 0x94f   : > { %v751_v53 = vpop.f32.mrb[10].mxu0  ;;  %v963_v51 = vstv %s1792_s13 }
 0x950   : > { %1484 = vtanh.f32 %v754_v50  ;;  %v1402_v54 = vpop.f32.mrb[11].mxu0  ;;  %v1305_v58 = vmul.f32 -1.442695, %v754_v50  ;;  %vm964_vm13 = vcmp.gt.s32.totalorder %v1640_v12, %v963_v51 }
 0x952   : > { %1486 = vpow2.f32 %v1305_v58 }
 0x95a   : > { %v1485_v56 = vpop.eup %1484 }
 0x95b   : > { %764 = vrot.lane.b32.xlu0 %v1485_v56, %s1535_s23 }
 0x95c   : > { %v1487_v59 = vpop.eup %1486 }
 0x95d   : > { %v758_v60 = vadd.f32 1.0, %v1487_v59 }
 0x95f   : > { %783 = vperm.xlu0 %1449, %v781_v57   ;;  %1488 = vrcp.f32 %v758_v60 }
 0x969   : > { %v1489_v61 = vpop.eup %1488 }
 0x96a   : > { %v762_v3 = vmul.f32 %v1489_v61, %v702_v0 }
 0x9cd   : > { %v765_v62 = vpop.permute.xlu0 %764 }
 0x9ce   : > { %v767_v63 = vmul.f32 %v1489_v61, %v765_v62 }
 0x9d0   : > { %769 = vrot.lane.b32.xlu1 %v767_v63, %s1536_s24 }
 0x9de   : > { %v1745_v9 = vpop.permute.xlu0 %783 }
 0x9df   : > { %vm785_vm10 = vcmp.eq.s32.totalorder %v1745_v9, 1 }
 0xa42   : > { %v770_v4 = vpop.permute.xlu1 %769 }
 0xa43   : > { %v772_v5 = vadd.f32 %v770_v4, %v762_v3 }
 0xa45   : > { %1490 = vtanh.f32 %v772_v5  ;;  %v794_v33 = vsel %vm785_vm10, %v772_v5, %v702_v0 }
 0xa4f   : > { %v1491_v8 = vpop.eup %1490 }
 0xa50   : > { %775 = vrot.lane.b32.xlu1 %v1491_v8, %s1535_s23 }
 0xac2   : > { %v776_v10 = vpop.permute.xlu1 %775 }
 0xac3   : > { %v1747_v11 = vmul.f32 %v1489_v61, %v776_v10 }
 0xac5   : > { %v793_v13 = vsel %vm785_vm10, %v1747_v11, %v701_v45 }
 0xac6   : > { %v799_v14 = vpack.c.bf16 %v793_v13, %v793_v13 }
 0xac8   : > { %801 = vrot.lane.b32.xlu0 %v799_v14, %s1536_s24 }
 0xb3a   : > { %v802_v15 = vpop.permute.xlu0 %801 }
 0xb3b   : > { %1408 = vmatmul.mubr.msk.bf16.vlgmr.msra.gmra.mrb[12].mxu1 %vm435_vm4, %v802_v15 }
 0xb3c   : > { %1420 = vmatpush3.bf16.msra.mxu1 %v1598_v6  ;;  %1423 = vmatprep.mubr.msk.bf16.mxu1 %vm1533_vm1, %v1532_v1 }
 0xb3d   : > { %1421 = vmatprep.subr.bf16.mxu1 %v1532_v1 }
 0xb40   : > { %1422 = vmatpush3.bf16.msra.mxu1 %v1601_v7 }
 0xc0e   : > { %v840_v19 = vpop.f32.mrb[12].mxu1 }
 0xc0f   : > { %v846_v20 = vadd.f32 %v840_v19, %v798_v17  ;;  %v1409_v21 = vpop.f32.mrb[13].mxu1 }
 0xc10   : > { %v843_v22 = vpop.f32.mrb[14].mxu1  ;;  %v1055_v21 = vstv %s1817_s16 }
 0xc11   : > { %1492 = vtanh.f32 %v846_v20  ;;  %v1410_v23 = vpop.f32.mrb[15].mxu1  ;;  %v1308_v27 = vmul.f32 -1.442695, %v846_v20  ;;  %vm1056_vm15 = vcmp.gt.s32.totalorder %v1640_v12, %v1055_v21 }
 0xc12   : > { %v1057_v23 = vsel %vm1056_vm15, 1, %v1534_v2 }
 0xc13   : > { %1494 = vpow2.f32 %v1308_v27 }
 0xc1b   : > { %v1493_v25 = vpop.eup %1492 }
 0xc1c   : > { %856 = vrot.lane.b32.xlu1 %v1493_v25, %s1535_s23 }
 0xc1d   : > { %v1495_v28 = vpop.eup %1494 }
 0xc1e   : > { %v850_v29 = vadd.f32 1.0, %v1495_v28 }
 0xc20   : > { %875 = vperm.xlu1 %1448, %v873_v26   ;;  %1496 = vrcp.f32 %v850_v29 }
 0xc2a   : > { %v1497_v30 = vpop.eup %1496 }
 0xc2b   : > { %v854_v34 = vmul.f32 %v1497_v30, %v794_v33 }
 0xc8e   : > { %v857_v31 = vpop.permute.xlu1 %856 }
 0xc8f   : > { %v859_v32 = vmul.f32 %v1497_v30, %v857_v31 }
 0xc91   : > { %861 = vrot.lane.b32.xlu0 %v859_v32, %s1536_s24 }
 0xc9f   : > { %v1775_v38 = vpop.permute.xlu1 %875 }
 0xca0   : > { %vm877_vm12 = vcmp.eq.s32.totalorder %v1775_v38, 1 }
 0xd03   : > { %v862_v35 = vpop.permute.xlu0 %861 }
 0xd04   : > { %v864_v36 = vadd.f32 %v862_v35, %v854_v34 }
 0xd06   : > { %1498 = vtanh.f32 %v864_v36  ;;  %v886_v59 = vsel %vm877_vm12, %v864_v36, %v794_v33 }
 0xd10   : > { %v1499_v37 = vpop.eup %1498 }
 0xd11   : > { %867 = vrot.lane.b32.xlu0 %v1499_v37, %s1535_s23 }
 0xd83   : > { %v868_v39 = vpop.permute.xlu0 %867 }
 0xd84   : > { %v1777_v40 = vmul.f32 %v1497_v30, %v868_v39 }
 0xd86   : > { %v885_v41 = vsel %vm877_vm12, %v1777_v40, %v793_v13  ;;  %v982_v13 = vld [vmem:[%s981_s21] sm:$0xff]  ;;  %s1861_s21 = scalar_lea.vmem %s1918_s5, %s1322_s19 }
 0xd87   : > { %v891_v43 = vpack.c.bf16 %v885_v41, %v885_v41  ;;  %s607_s22 = scalar_lea.vmem %s1861_s21, %s1297_s26  ;;  %s699_s12 = scalar_lea.vmem %s1861_s21, %s1300_s29 }
 0xd88   : > { %s975_s25 = scalar_lea.vmem %s1861_s21, %s1309_s14  ;;  %s1159_s26 = scalar_lea.vmem %s1861_s21, %s1315_s30 }
 0xd89   : > { %893 = vrot.lane.b32.xlu1 %v891_v43, %s1536_s24 }
 0xdfb   : > { %v894_v45 = vpop.permute.xlu1 %893 }
 0xdfc   : > { %1416 = vmatmul.mubr.msk.bf16.vlgmr.msra.gmra.mrb[12].mxu0 %vm435_vm4, %v894_v45  ;;  %v1074_v45 = vld [vmem:[%s1073_s8] sm:$0xff]  ;;  %s516_s8 = scalar_lea.vmem %s1861_s21, %s1293_s20  ;;  %s791_s20 = scalar_lea.vmem %s1861_s21, %s1303_s7 }
 0xdfd   : > { %1428 = vmatpush3.bf16.msra.mxu0 %v1598_v6  ;;  %1431 = vmatprep.mubr.msk.bf16.mxu0 %vm1533_vm1, %v1532_v1 }
 0xdfe   : > { %1429 = vmatprep.subr.bf16.mxu0 %v1532_v1 }
 0xe01   : > { %1430 = vmatpush3.bf16.msra.mxu0 %v1601_v7  ;;  %v965_v7 = vsel %vm964_vm13, 1, %v1534_v2 }
 0xecf   : > { %v932_v47 = vpop.f32.mrb[12].mxu0 }
 0xed0   : > { %v938_v48 = vadd.f32 %v932_v47, %v890_v46  ;;  %v1417_v6 = vpop.f32.mrb[13].mxu0 }
 0xed1   : > { %v935_v49 = vpop.f32.mrb[14].mxu0 }
 0xed2   : > { %1500 = vtanh.f32 %v938_v48  ;;  %v1418_v50 = vpop.f32.mrb[15].mxu0  ;;  %v1311_v53 = vmul.f32 -1.442695, %v938_v48 }
 0xed3   : > { %v1147_v50 = vstv %s1835_s27 }
 0xed4   : > { %1502 = vpow2.f32 %v1311_v53  ;;  %vm1148_vm1 = vcmp.gt.s32.totalorder %v1640_v12, %v1147_v50  ;;  %v878_v12 = vsel %vm877_vm12, %v1777_v40, 0.0 }
 0xedc   : > { %v1501_v1 = vpop.eup %1500 }
 0xedd   : > { %948 = vrot.lane.b32.xlu0 %v1501_v1, %s1535_s23  ;;  %v1149_v1 = vsel %vm1148_vm1, 1, %v1534_v2 }
 0xede   : > { %v1503_v54 = vpop.eup %1502 }
 0xedf   : > { %v942_v55 = vadd.f32 1.0, %v1503_v54 }
 0xee1   : > { %967 = vperm.xlu0 %1449, %v965_v7   ;;  %1504 = vrcp.f32 %v942_v55  ;;  %v694_v7 = vsel %vm693_vm8, %v1716_v44, 0.0 }
 0xeeb   : > { %v1505_v56 = vpop.eup %1504 }
 0xeec   : > { %v946_v60 = vmul.f32 %v1505_v56, %v886_v59 }
 0xf4f   : > { %v949_v57 = vpop.permute.xlu0 %948 }
 0xf50   : > { %v951_v58 = vmul.f32 %v1505_v56, %v949_v57 }
 0xf52   : > { %953 = vrot.lane.b32.xlu1 %v951_v58, %s1536_s24 }
 0xf60   : > { %v1805_v0 = vpop.permute.xlu0 %967 }
 0xf61   : > { %vm969_vm14 = vcmp.eq.s32.totalorder %v1805_v0, 1 }
 0xfc4   : > { %v954_v61 = vpop.permute.xlu1 %953 }
 0xfc5   : > { %v956_v62 = vadd.f32 %v954_v61, %v946_v60  ;;  %v602_v61 = vsel %vm601_vm6, %v1684_v18, 0.0 }
 0xfc7   : > { %1506 = vtanh.f32 %v956_v62  ;;  %v978_v30 = vsel %vm969_vm14, %v956_v62, %v886_v59  ;;  %v786_v62 = vsel %vm785_vm10, %v1747_v11, 0.0 }
 0xfd1   : > { %v1507_v63 = vpop.eup %1506 }
 0xfd2   : > { %959 = vrot.lane.b32.xlu1 %v1507_v63, %s1535_s23 }
0x1044   : > { %v960_v3 = vpop.permute.xlu1 %959 }
0x1045   : > { %v1807_v4 = vmul.f32 %v1505_v56, %v960_v3 }
0x1047   : > { %v977_v5 = vsel %vm969_vm14, %v1807_v4, %v885_v41  ;;  %v970_v63 = vsel %vm969_vm14, %v1807_v4, 0.0 }
0x1048   : > { %v983_v8 = vpack.c.bf16 %v977_v5, %v977_v5 }
0x104a   : > { %985 = vrot.lane.b32.xlu0 %v983_v8, %s1536_s24 }
0x10bc   : > { %v986_v10 = vpop.permute.xlu0 %985 }
0x10bd   : > { %1424 = vmatmul.mubr.msk.bf16.vlgmr.msra.gmra.mrb[16].mxu1 %vm435_vm4, %v986_v10 }
0x1190   : > { %v1024_v14 = vpop.f32.mrb[16].mxu1 }
0x1191   : > { %v1030_v15 = vadd.f32 %v1024_v14, %v982_v13  ;;  %v1425_v17 = vpop.f32.mrb[17].mxu1 }
0x1192   : > { %v1027_v19 = vpop.f32.mrb[18].mxu1 }
0x1193   : > { %1508 = vtanh.f32 %v1030_v15  ;;  %v1426_v20 = vpop.f32.mrb[19].mxu1  ;;  %v1314_v24 = vmul.f32 -1.442695, %v1030_v15 }
0x1195   : > { %1510 = vpow2.f32 %v1314_v24 }
0x119d   : > { %v1509_v22 = vpop.eup %1508 }
0x119e   : > { %1040 = vrot.lane.b32.xlu1 %v1509_v22, %s1535_s23 }
0x119f   : > { %v1511_v25 = vpop.eup %1510 }
0x11a0   : > { %v1034_v26 = vadd.f32 1.0, %v1511_v25 }
0x11a2   : > { %1059 = vperm.xlu1 %1448, %v1057_v23   ;;  %1512 = vrcp.f32 %v1034_v26 }
0x11ac   : > { %v1513_v27 = vpop.eup %1512 }
0x11ad   : > { %v1038_v31 = vmul.f32 %v1513_v27, %v978_v30 }
0x1210   : > { %v1041_v28 = vpop.permute.xlu1 %1040 }
0x1211   : > { %v1043_v29 = vmul.f32 %v1513_v27, %v1041_v28 }
0x1213   : > { %1045 = vrot.lane.b32.xlu0 %v1043_v29, %s1536_s24 }
0x1221   : > { %v1060_v35 = vpop.permute.xlu1 %1059 }
0x1222   : > { %vm1061_vm0 = vcmp.eq.s32.totalorder %v1060_v35, 1 }
0x1285   : > { %v1046_v32 = vpop.permute.xlu0 %1045 }
0x1286   : > { %v1048_v33 = vadd.f32 %v1046_v32, %v1038_v31 }
0x1288   : > { %1514 = vtanh.f32 %v1048_v33  ;;  %v1070_v56 = vsel %vm1061_vm0, %v1048_v33, %v978_v30 }
0x1292   : > { %v1515_v34 = vpop.eup %1514 }
0x1293   : > { %1051 = vrot.lane.b32.xlu0 %v1515_v34, %s1535_s23 }
0x1305   : > { %v1052_v36 = vpop.permute.xlu0 %1051 }
0x1306   : > { %v1054_v37 = vmul.f32 %v1513_v27, %v1052_v36 }
0x1308   : > { %v1069_v39 = vsel %vm1061_vm0, %v1054_v37, %v977_v5  ;;  %v1062_v2 = vsel %vm1061_vm0, %v1054_v37, 0.0 }
0x1309   : > { %v1075_v41 = vpack.c.bf16 %v1069_v39, %v1069_v39 }
0x130b   : > { %1077 = vrot.lane.b32.xlu1 %v1075_v41, %s1536_s24 }
0x137d   : > { %v1078_v43 = vpop.permute.xlu1 %1077 }
0x137e   : > { %1432 = vmatmul.mubr.msk.bf16.vlgmr.msra.gmra.mrb[16].mxu0 %vm435_vm4, %v1078_v43 }
0x1451   : > { %v1116_v46 = vpop.f32.mrb[16].mxu0 }
0x1452   : > { %v1122_v47 = vadd.f32 %v1116_v46, %v1074_v45  ;;  %v1433_v48 = vpop.f32.mrb[17].mxu0 }
0x1453   : > { %v1119_v6 = vpop.f32.mrb[18].mxu0 }
0x1454   : > { %1516 = vtanh.f32 %v1122_v47  ;;  %v1434_v49 = vpop.f32.mrb[19].mxu0  ;;  %v1317_v53 = vmul.f32 -1.442695, %v1122_v47 }
0x1456   : > { %1518 = vpow2.f32 %v1317_v53 }
0x145e   : > { %v1517_v51 = vpop.eup %1516 }
0x145f   : > { %1132 = vrot.lane.b32.xlu0 %v1517_v51, %s1535_s23 }
0x1463   : > { %1151 = vperm.xlu0 %1449, %v1149_v1  }
0x1467   : > { %513 = vrot.lane.b32.xlu0 %v1656_v52, %s1536_s24  ;;  %v1519_v52 = vpop.eup %1518 }
0x1468   : > { %v1126_v54 = vadd.f32 1.0, %v1519_v52 }
0x146a   : > { %1520 = vrcp.f32 %v1126_v54 }
0x146b   : > { %696 = vrot.lane.b32.xlu0 %v694_v7, %s1536_s24 }
0x146f   : > { %880 = vrot.lane.b32.xlu0 %v878_v12, %s1536_s24 }
0x1473   : > { %1064 = vrot.lane.b32.xlu0 %v1062_v2, %s1536_s24 }
0x1474   : > { %v1521_v42 = vpop.eup %1520 }
0x1475   : > { %v1130_v57 = vmul.f32 %v1521_v42, %v1070_v56 }
0x14d1   : > { %v1133_v44 = vpop.permute.xlu0 %1132 }
0x14d2   : > { %v1135_v55 = vmul.f32 %v1521_v42, %v1133_v44 }
0x14d4   : > { %1137 = vrot.lane.b32.xlu1 %v1135_v55, %s1536_s24 }
0x14e2   : > { %v1152_v38 = vpop.permute.xlu0 %1151 }
0x14e3   : > { %vm1153_vm2 = vcmp.eq.s32.totalorder %v1152_v38, 1 }
0x14e6   : > { %v514_v40 = vpop.permute.xlu0 %513 }
0x14e7   : > { %517 = vst.msk [vmem:[%s516_s8] sm:$0xff] %vm435_vm4, %v514_v40 }
0x14ea   : > { %v697_v18 = vpop.permute.xlu0 %696 }
0x14ee   : > { %v881_v0 = vpop.permute.xlu0 %880 }
0x14f2   : > { %v1065_v8 = vpop.permute.xlu0 %1064 }
0x1546   : > { %v1138_v58 = vpop.permute.xlu1 %1137 }
0x1547   : > { %v1140_v59 = vadd.f32 %v1138_v58, %v1130_v57 }
0x1549   : > { %1522 = vtanh.f32 %v1140_v59 }
0x1553   : > { %v1523_v60 = vpop.eup %1522 }
0x1554   : > { %1143 = vrot.lane.b32.xlu1 %v1523_v60, %s1535_s23  ;;  %s883_s23 = scalar_lea.vmem %s1861_s21, %s1306_s10 }
0x1558   : > { %604 = vrot.lane.b32.xlu1 %v602_v61, %s1536_s24 }
0x155c   : > { %788 = vrot.lane.b32.xlu1 %v786_v62, %s1536_s24 }
0x1560   : > { %972 = vrot.lane.b32.xlu1 %v970_v63, %s1536_s24 }
0x15c6   : > { %v1144_v16 = vpop.permute.xlu1 %1143 }
0x15c7   : > { %v1146_v3 = vmul.f32 %v1521_v42, %v1144_v16 }
0x15c9   : > { %v1154_v9 = vsel %vm1153_vm2, %v1146_v3, 0.0 }
0x15ca   : > { %1156 = vrot.lane.b32.xlu1 %v1154_v9, %s1536_s24  ;;  %v605_v11 = vpop.permute.xlu1 %604  ;;  %s1067_s24 = scalar_lea.vmem %s1861_s21, %s1312_s17 }
0x15cb   : > { %608 = vst.msk [vmem:[%s607_s22] sm:$0xff] %vm435_vm4, %v605_v11 }
0x15cc   : > { %700 = vst.msk [vmem:[%s699_s12] sm:$0xff] %vm435_vm4, %v697_v18 }
0x15ce   : > { %v789_v4 = vpop.permute.xlu1 %788 }
0x15cf   : > { %792 = vst.msk [vmem:[%s791_s20] sm:$0xff] %vm435_vm4, %v789_v4 }
0x15d0   : > { %884 = vst.msk [vmem:[%s883_s23] sm:$0xff] %vm435_vm4, %v881_v0 }
0x15d2   : > { %v973_v5 = vpop.permute.xlu1 %972 }
0x15d3   : > { %976 = vst.msk [vmem:[%s975_s25] sm:$0xff] %vm435_vm4, %v973_v5 }
0x15d4   : > { %1068 = vst.msk [vmem:[%s1067_s24] sm:$0xff] %vm435_vm4, %v1065_v8 }
0x163c   : > { %v1157_v10 = vpop.permute.xlu1 %1156 }
0x163d   : > { %1160 = vst.msk [vmem:[%s1159_s26] sm:$0xff] %vm435_vm4, %v1157_v10 }
0x163e PF: > { %s15_s18 = sadd.s32 1, %s1530_s18  }
0x163f   : > { %p12_p5 = scmp.ge.s32.totalorder %s15_s18, 4  }
0x1641   :  { %14 = sbr.rel (!%p12_p5) target bundleno = 1 (0x1), region = 92 }

</bundles_post_ra>
